<compile_context>
chip_gen: v5e
topology: v5e:2x2
jax: 0.10.0
libtpu: 0.0.40
codegen_flags: <defaults>
</compile_context>

<pallas_src>
import functools

import jax
import jax.numpy as jnp
from jax import lax
from jax.experimental import pallas as pl
from jax.experimental.pallas import tpu as pltpu

LANE = 128


def _round_up(x, m):
    return (x + m - 1) // m * m


def _vmem_limit_bytes():
    # Generation-dependent VMEM ceiling: ~75% of physical, capped at 100 MiB.
    # (v7x: 64 MiB physical -> ~48 MiB; v5e/v6e: 128 MiB -> ~96-100 MiB.)
    try:
        cap = int(pltpu.get_tpu_info().vmem_capacity_bytes)
    except Exception:
        cap = 64 * 1024 * 1024
    return max(32 * 1024 * 1024, min(cap * 3 // 4, 100 * 1024 * 1024))


# ----------------------------------------------------------------------------
# Pallas kernel: DoubleConv = conv3x3 -> (folded BN) -> ReLU -> conv3x3 -> BN -> ReLU
# ----------------------------------------------------------------------------
def _conv3x3_acc(x, w, acc):
    """3x3 'SAME' conv of one bf16 HWC tile via kw-fused im2col.

    x  : (H, W, C)   bf16, NO spatial halo (zero halo is built here)
    w  : (3, 3*C, Co) bf16 (kh, kw*C + c, co), BN scale already folded
    acc: (H*W, Co) f32 accumulator or None (initialized from the first dot)
    """
    H, W, C = x.shape
    # kw taps fused on the lane axis: values at w-1, w, w+1 (zero at boundaries)
    z_col = jnp.zeros((H, 1, C), x.dtype)
    x_m1 = jnp.concatenate([z_col, x[:, : W - 1, :]], axis=1)
    x_p1 = jnp.concatenate([x[:, 1:, :], z_col], axis=1)
    xcat = jnp.concatenate([x_m1, x, x_p1], axis=-1)            # (H, W, 3C) bf16
    # kh taps: flatten rows and add a zero row block above/below; tap kh for
    # output (h, w) is then the free row-range slice [kh*W : kh*W + H*W).
    z_row = jnp.zeros((W, 3 * C), x.dtype)
    xflat = jnp.concatenate(
        [z_row, xcat.reshape(H * W, 3 * C), z_row], axis=0)     # ((H+2)*W, 3C) bf16
    for kh in range(3):
        d = jnp.dot(xflat[kh * W: kh * W + H * W, :], w[kh],
                    preferred_element_type=jnp.float32)
        acc = d if acc is None else acc + d
    return acc


def _double_conv_kernel(xa_ref, xb_ref, w1a_ref, w1b_ref, b1_ref, w2_ref, b2_ref,
                        o_ref, *, H, W, CmidP, CoutP):
    # xa_ref : (1, H, W, CaP) bf16   skip connection (x2), channel-padded
    # xb_ref : (1, H, W, CbP) bf16   upsampled x1, channel-padded
    # w1*_ref: (3, 3*C?P, CmidP) bf16  conv1 taps split by input-channel group
    # w2_ref : (3, 3*CmidP, CoutP) bf16
    # b*_ref : (1, C) f32            folded BN bias
    # o_ref  : (1, H, W, CoutP)      f32 (or bf16)
    xa = xa_ref[0]                                              # bf16, no upcast
    xb = xb_ref[0]

    # ---- conv1: two channel groups accumulate into one f32 accumulator -------
    acc1 = _conv3x3_acc(xa, w1a_ref[...], None)
    acc1 = _conv3x3_acc(xb, w1b_ref[...], acc1)
    y1 = jnp.maximum(acc1 + b1_ref[...], 0.0).astype(jnp.bfloat16)   # bias+ReLU, bf16 now
    y1 = y1.reshape(H, W, CmidP)

    # ---- conv2: same structure, bf16 halo slabs -------------------------------
    acc2 = _conv3x3_acc(y1, w2_ref[...], None)
    y2 = jnp.maximum(acc2 + b2_ref[...], 0.0)
    o_ref[...] = y2.reshape(1, H, W, CoutP).astype(o_ref.dtype)


def double_conv_pallas(xa_nhwc, xb_nhwc, params, out_dtype=jnp.float32):
    """DoubleConv on the implicit concat [xa, xb] along channels (both NHWC f32).

    out_dtype=jnp.bfloat16 halves the output writeback (recommended on v5e).
    """
    N, H, W, Ca = xa_nhwc.shape
    _, _, _, Cb = xb_nhwc.shape
    w1a, w1b, b1 = params['w1a'], params['w1b'], params['b1']
    w2, b2 = params['w2'], params['b2']
    CaP = w1a.shape[1] // 3
    CbP = w1b.shape[1] // 3
    CmidP = w1a.shape[2]
    CoutP = w2.shape[2]
    Cout = params['out_channels']

    # channel-pad to the 128-lane width (fused with the bf16 cast); no spatial pad
    xa_p = jnp.pad(xa_nhwc.astype(jnp.bfloat16), ((0, 0), (0, 0), (0, 0), (0, CaP - Ca)))
    xb_p = jnp.pad(xb_nhwc.astype(jnp.bfloat16), ((0, 0), (0, 0), (0, 0), (0, CbP - Cb)))

    kernel = functools.partial(_double_conv_kernel, H=H, W=W, CmidP=CmidP, CoutP=CoutP)
    out = pl.pallas_call(
        kernel,
        out_shape=jax.ShapeDtypeStruct((N, H, W, CoutP), out_dtype),
        grid_spec=pltpu.PrefetchScalarGridSpec(
            num_scalar_prefetch=0,
            grid=(N,),
            in_specs=[
                pl.BlockSpec((1, H, W, CaP), lambda n: (n, 0, 0, 0)),
                pl.BlockSpec((1, H, W, CbP), lambda n: (n, 0, 0, 0)),
                # constant-index weight/bias blocks (resident across the grid).
                # TODO(synk): pipeline_mode=pl.Buffered(1) here would avoid the
                # double-buffered weight copies at large C (VMEM headroom on v7x).
                pl.BlockSpec((3, 3 * CaP, CmidP), lambda n: (0, 0, 0)),
                pl.BlockSpec((3, 3 * CbP, CmidP), lambda n: (0, 0, 0)),
                pl.BlockSpec((1, CmidP), lambda n: (0, 0)),
                pl.BlockSpec((3, 3 * CmidP, CoutP), lambda n: (0, 0, 0)),
                pl.BlockSpec((1, CoutP), lambda n: (0, 0)),
            ],
            out_specs=pl.BlockSpec((1, H, W, CoutP), lambda n: (n, 0, 0, 0)),
        ),
        compiler_params=pltpu.CompilerParams(
            dimension_semantics=("parallel",),
            vmem_limit_bytes=_vmem_limit_bytes()),
    )(xa_p, xb_p, w1a, w1b, b1, w2, b2)

    if Cout != CoutP:                       # skip the extra HBM pass when aligned
        out = out[..., :Cout]
    return out


# ----------------------------------------------------------------------------
# Glue: bilinear x2 upsample (align_corners=True) in NHWC — plain JAX
# ----------------------------------------------------------------------------
def bilinear_upsample_x2_align_corners_nhwc(x):
    """x: (N, H, W, C) -> (N, 2H, 2W, C); matches torch.nn.Upsample(
    scale_factor=2, mode='bilinear', align_corners=True)."""
    N, H, W, C = x.shape
    Ho, Wo = 2 * H, 2 * W

    def src(out_size, in_size):
        if in_size == 1:
            return jnp.zeros((out_size,), jnp.float32)
        return (jnp.arange(out_size, dtype=jnp.float32)
                * (in_size - 1) / (out_size - 1))

    sh = src(Ho, H)
    sw = src(Wo, W)
    h0 = jnp.floor(sh).astype(jnp.int32)
    h1 = jnp.minimum(h0 + 1, H - 1)
    ah = (sh - h0.astype(jnp.float32))[None, :, None, None]
    w0 = jnp.floor(sw).astype(jnp.int32)
    w1 = jnp.minimum(w0 + 1, W - 1)
    aw = (sw - w0.astype(jnp.float32))[None, None, :, None]

    xh = x[:, h0, :, :] * (1.0 - ah) + x[:, h1, :, :] * ah
    return xh[:, :, w0, :] * (1.0 - aw) + xh[:, :, w1, :] * aw


def up_forward(params, x1, x2, out_dtype=jnp.float32):
    """Up.forward(x1, x2). x1, x2, output are NCHW (PyTorch convention)."""
    x1_nhwc = jnp.transpose(x1, (0, 2, 3, 1)).astype(jnp.float32)
    x2_nhwc = jnp.transpose(x2, (0, 2, 3, 1)).astype(jnp.float32)

    x1u = bilinear_upsample_x2_align_corners_nhwc(x1_nhwc)
    diffY = x2_nhwc.shape[1] - x1u.shape[1]
    diffX = x2_nhwc.shape[2] - x1u.shape[2]
    if diffY or diffX:
        x1u = jnp.pad(x1u, ((0, 0),
                            (diffY // 2, diffY - diffY // 2),
                            (diffX // 2, diffX - diffX // 2),
                            (0, 0)))

    # concat([x2, x1u]) and the 1px conv halo are fused into the kernel:
    # x2 / x1u enter as separate inputs, conv1 weights are split per group.
    y_nhwc = double_conv_pallas(x2_nhwc, x1u, params, out_dtype=out_dtype)
    return jnp.transpose(y_nhwc, (0, 3, 1, 2))               # back to NCHW


# ----------------------------------------------------------------------------
# Deterministic parameter construction (synthetic, no checkpoint load)
# ----------------------------------------------------------------------------
def init_up_params(key, in_channels, out_channels, skip_channels=None):
    mid = in_channels // 2
    skip = in_channels // 2 if skip_channels is None else skip_channels  # x2 channels
    upc = in_channels - skip                                             # upsampled x1 channels
    k1, k2, k3, k4 = jax.random.split(key, 4)

    # Conv2d weights in PyTorch layout (Cout, Cin, 3, 3), kaiming-ish scale
    w1_t = jax.random.normal(k1, (mid, in_channels, 3, 3), jnp.float32) \
        * (2.0 / (in_channels * 9.0)) ** 0.5
    w2_t = jax.random.normal(k2, (out_channels, mid, 3, 3), jnp.float32) \
        * (2.0 / (mid * 9.0)) ** 0.5

    # TODO(synk): BatchNorm2d folded using eval-mode running statistics; PyTorch
    # training-mode batch statistics would need a cross-batch reduction pass.
    def folded_bn(k, c):
        ka, kb, kc, kd = jax.random.split(k, 4)
        gamma = 1.0 + 0.1 * jax.random.normal(ka, (c,), jnp.float32)
        beta = 0.1 * jax.random.normal(kb, (c,), jnp.float32)
        mean = 0.1 * jax.random.normal(kc, (c,), jnp.float32)
        var = 1.0 + 0.1 * jax.random.uniform(kd, (c,), jnp.float32)
        eps = 1e-5
        scale = gamma / jnp.sqrt(var + eps)
        bias = beta - mean * scale
        return scale, bias

    s1, b1 = folded_bn(k3, mid)
    s2, b2 = folded_bn(k4, out_channels)

    # NOTE: lane padding (128) over-pads genuinely small-channel layers (as in this
    # toy test); it pays off at real UNet channel counts (>=128 channels).
    CskipP = _round_up(skip, LANE)
    CupP = _round_up(upc, LANE)
    CmidP = _round_up(mid, LANE)
    CoutP = _round_up(out_channels, LANE)

    def pack(w_t, scale, cin_start, cin, cout, cin_p, cout_p):
        # torch (Cout, Cin_total, 3, 3): take input channels [cin_start, cin_start+cin)
        # -> (kh, kw, Cin, Cout), fold BN scale into output channels, zero-pad
        # channels to lane multiples, merge kw taps into the contraction dim.
        w = jnp.transpose(w_t[:, cin_start:cin_start + cin], (2, 3, 1, 0)) \
            * scale[None, None, None, :]
        w = jnp.pad(w, ((0, 0), (0, 0), (0, cin_p - cin), (0, cout_p - cout)))
        return w.reshape(3, 3 * cin_p, cout_p).astype(jnp.bfloat16)

    w1a = pack(w1_t, s1, 0, skip, mid, CskipP, CmidP)        # x2's channel group
    w1b = pack(w1_t, s1, skip, upc, mid, CupP, CmidP)        # upsampled x1's group
    w2 = pack(w2_t, s2, 0, mid, out_channels, CmidP, CoutP)
    b1p = jnp.pad(b1, (0, CmidP - mid)).reshape(1, CmidP)
    b2p = jnp.pad(b2, (0, CoutP - out_channels)).reshape(1, CoutP)

    # unpadded HWIO copies (BN-scale folded, bf16) for the pure-JAX reference
    w1_hwio = (jnp.transpose(w1_t, (2, 3, 1, 0)) * s1[None, None, None, :]).astype(jnp.bfloat16)
    w2_hwio = (jnp.transpose(w2_t, (2, 3, 1, 0)) * s2[None, None, None, :]).astype(jnp.bfloat16)

    return {'w1a': w1a, 'w1b': w1b, 'b1': b1p, 'w2': w2, 'b2': b2p,
            'out_channels': out_channels,
            'ref_w1': w1_hwio, 'ref_b1': b1, 'ref_w2': w2_hwio, 'ref_b2': b2}


# ----------------------------------------------------------------------------
# Pure-JAX reference (same bf16-in / f32-accumulate math) for correctness check
# ----------------------------------------------------------------------------
def ref_double_conv(x_nhwc, params):
    def conv(x, w):
        return lax.conv_general_dilated(
            x.astype(jnp.bfloat16), w, (1, 1), 'SAME',
            dimension_numbers=('NHWC', 'HWIO', 'NHWC'),
            preferred_element_type=jnp.float32)

    y1 = jnp.maximum(conv(x_nhwc, params['ref_w1']) + params['ref_b1'], 0.0)
    y2 = jnp.maximum(conv(y1, params['ref_w2']) + params['ref_b2'], 0.0)
    return y2


if __name__ == "__main__":
    key = jax.random.PRNGKey(0)
    k_p, k_x1, k_x2 = jax.random.split(key, 3)

    in_channels, out_channels = 8, 4
    N, H2, W2 = 2, 16, 16
    # x1: deeper feature map (half spatial res), x2: skip connection.
    # Channels chosen so that concat([x2, upsample(x1)]) has `in_channels`.
    x1 = jax.random.normal(k_x1, (N, in_channels // 2, H2 // 2, W2 // 2), jnp.float32)
    x2 = jax.random.normal(k_x2, (N, in_channels // 2, H2, W2), jnp.float32)

    params = init_up_params(k_p, in_channels, out_channels)

    out = jax.block_until_ready(up_forward(params, x1, x2))
    assert out.shape == (N, out_channels, H2, W2), out.shape

    # verify against a pure-JAX reference of the same forward math
    x1_nhwc = jnp.transpose(x1, (0, 2, 3, 1))
    x2_nhwc = jnp.transpose(x2, (0, 2, 3, 1))
    x1u = bilinear_upsample_x2_align_corners_nhwc(x1_nhwc)
    x_cat = jnp.concatenate([x2_nhwc, x1u], axis=-1)        # diffX = diffY = 0 here
    ref = jnp.transpose(ref_double_conv(x_cat, params), (0, 3, 1, 2))
    err = float(jnp.max(jnp.abs(out.astype(jnp.float32) - ref)))
    assert err < 5e-2, err

    print("KERNEL_OK")
</pallas_src>

<mosaic_0001>
module attributes {stable_mosaic.version = 11 : i64} {
  func.func @_double_conv_kernel(%arg0: i32, %arg1: memref<1x16x16x128xbf16, #tpu.memory_space<vmem>>, %arg2: memref<1x16x16x128xbf16, #tpu.memory_space<vmem>>, %arg3: memref<3x384x128xbf16, #tpu.memory_space<vmem>>, %arg4: memref<3x384x128xbf16, #tpu.memory_space<vmem>>, %arg5: memref<1x128xf32, #tpu.memory_space<vmem>>, %arg6: memref<3x384x128xbf16, #tpu.memory_space<vmem>>, %arg7: memref<1x128xf32, #tpu.memory_space<vmem>>, %arg8: memref<1x16x16x128xf32, #tpu.memory_space<vmem>>) attributes {dimension_semantics = [#tpu.dimension_semantics<parallel>], iteration_bounds = array<i64: 2>, scalar_prefetch = 0 : i64, scratch_operands = 0 : i64, tpu.core_type = #tpu.core_type<tc>, window_params = [{transform_indices = @transform_0, window_bounds = array<i64: 1, 16, 16, 128>}, {transform_indices = @transform_1, window_bounds = array<i64: 1, 16, 16, 128>}, {pipeline_mode = #tpu.pipeline_mode<synchronous>, transform_indices = @transform_2, window_bounds = array<i64: 3, 384, 128>}, {pipeline_mode = #tpu.pipeline_mode<synchronous>, transform_indices = @transform_3, window_bounds = array<i64: 3, 384, 128>}, {pipeline_mode = #tpu.pipeline_mode<synchronous>, transform_indices = @transform_4, window_bounds = array<i64: 1, 128>}, {pipeline_mode = #tpu.pipeline_mode<synchronous>, transform_indices = @transform_5, window_bounds = array<i64: 3, 384, 128>}, {pipeline_mode = #tpu.pipeline_mode<synchronous>, transform_indices = @transform_6, window_bounds = array<i64: 1, 128>}, {transform_indices = @transform_7, window_bounds = array<i64: 1, 16, 16, 128>}]} {
    %c0 = arith.constant 0 : index
    %c0_0 = arith.constant 0 : index
    %c0_1 = arith.constant 0 : index
    %c0_2 = arith.constant 0 : index
    %0 = vector.load %arg1[%c0, %c0_0, %c0_1, %c0_2] : memref<1x16x16x128xbf16, #tpu.memory_space<vmem>>, vector<1x16x16x128xbf16>
    %1 = vector.shape_cast %0 : vector<1x16x16x128xbf16> to vector<16x16x128xbf16>
    %c0_3 = arith.constant 0 : index
    %c0_4 = arith.constant 0 : index
    %c0_5 = arith.constant 0 : index
    %c0_6 = arith.constant 0 : index
    %2 = vector.load %arg2[%c0_3, %c0_4, %c0_5, %c0_6] : memref<1x16x16x128xbf16, #tpu.memory_space<vmem>>, vector<1x16x16x128xbf16>
    %3 = vector.shape_cast %2 : vector<1x16x16x128xbf16> to vector<16x16x128xbf16>
    %c0_7 = arith.constant 0 : index
    %c0_8 = arith.constant 0 : index
    %c0_9 = arith.constant 0 : index
    %4 = vector.load %arg3[%c0_7, %c0_8, %c0_9] : memref<3x384x128xbf16, #tpu.memory_space<vmem>>, vector<3x384x128xbf16>
    %cst = arith.constant 0.000000e+00 : bf16
    %5 = vector.broadcast %cst : bf16 to vector<16x1x128xbf16>
    %6 = vector.extract_strided_slice %1 {offsets = [0, 0, 0], sizes = [16, 15, 128], strides = [1, 1, 1]} : vector<16x16x128xbf16> to vector<16x15x128xbf16>
    %7 = tpu.concatenate %5, %6 in 1 : vector<16x1x128xbf16>, vector<16x15x128xbf16> -> vector<16x16x128xbf16>
    %8 = vector.extract_strided_slice %1 {offsets = [0, 1, 0], sizes = [16, 15, 128], strides = [1, 1, 1]} : vector<16x16x128xbf16> to vector<16x15x128xbf16>
    %9 = tpu.concatenate %8, %5 in 1 : vector<16x15x128xbf16>, vector<16x1x128xbf16> -> vector<16x16x128xbf16>
    %10 = tpu.concatenate %7, %1, %9 in 2 : vector<16x16x128xbf16>, vector<16x16x128xbf16>, vector<16x16x128xbf16> -> vector<16x16x384xbf16>
    %cst_10 = arith.constant 0.000000e+00 : bf16
    %11 = vector.broadcast %cst_10 : bf16 to vector<16x384xbf16>
    %12 = vector.shape_cast %10 : vector<16x16x384xbf16> to vector<256x384xbf16>
    %13 = tpu.concatenate %11, %12, %11 in 0 : vector<16x384xbf16>, vector<256x384xbf16>, vector<16x384xbf16> -> vector<288x384xbf16>
    %14 = vector.extract_strided_slice %13 {offsets = [0, 0], sizes = [256, 384], strides = [1, 1]} : vector<288x384xbf16> to vector<256x384xbf16>
    %15 = vector.extract_strided_slice %4 {offsets = [0, 0, 0], sizes = [1, 384, 128], strides = [1, 1, 1]} : vector<3x384x128xbf16> to vector<1x384x128xbf16>
    %16 = vector.shape_cast %15 : vector<1x384x128xbf16> to vector<384x128xbf16>
    %cst_11 = arith.constant dense<0.000000e+00> : vector<256x128xf32>
    %17 = tpu.matmul %14, %16, %cst_11 {dimension_numbers = #tpu.dot_dimension_numbers<[1], [0], [0], [1], [0, 0, 1, 1], [], []>} : vector<256x384xbf16>, vector<384x128xbf16>, vector<256x128xf32> -> vector<256x128xf32>
    %18 = vector.extract_strided_slice %13 {offsets = [16, 0], sizes = [256, 384], strides = [1, 1]} : vector<288x384xbf16> to vector<256x384xbf16>
    %19 = vector.extract_strided_slice %4 {offsets = [1, 0, 0], sizes = [1, 384, 128], strides = [1, 1, 1]} : vector<3x384x128xbf16> to vector<1x384x128xbf16>
    %20 = vector.shape_cast %19 : vector<1x384x128xbf16> to vector<384x128xbf16>
    %cst_12 = arith.constant dense<0.000000e+00> : vector<256x128xf32>
    %21 = tpu.matmul %18, %20, %cst_12 {dimension_numbers = #tpu.dot_dimension_numbers<[1], [0], [0], [1], [0, 0, 1, 1], [], []>} : vector<256x384xbf16>, vector<384x128xbf16>, vector<256x128xf32> -> vector<256x128xf32>
    %22 = arith.addf %17, %21 : vector<256x128xf32>
    %23 = vector.extract_strided_slice %13 {offsets = [32, 0], sizes = [256, 384], strides = [1, 1]} : vector<288x384xbf16> to vector<256x384xbf16>
    %24 = vector.extract_strided_slice %4 {offsets = [2, 0, 0], sizes = [1, 384, 128], strides = [1, 1, 1]} : vector<3x384x128xbf16> to vector<1x384x128xbf16>
    %25 = vector.shape_cast %24 : vector<1x384x128xbf16> to vector<384x128xbf16>
    %cst_13 = arith.constant dense<0.000000e+00> : vector<256x128xf32>
    %26 = tpu.matmul %23, %25, %cst_13 {dimension_numbers = #tpu.dot_dimension_numbers<[1], [0], [0], [1], [0, 0, 1, 1], [], []>} : vector<256x384xbf16>, vector<384x128xbf16>, vector<256x128xf32> -> vector<256x128xf32>
    %27 = arith.addf %22, %26 : vector<256x128xf32>
    %c0_14 = arith.constant 0 : index
    %c0_15 = arith.constant 0 : index
    %c0_16 = arith.constant 0 : index
    %28 = vector.load %arg4[%c0_14, %c0_15, %c0_16] : memref<3x384x128xbf16, #tpu.memory_space<vmem>>, vector<3x384x128xbf16>
    %cst_17 = arith.constant 0.000000e+00 : bf16
    %29 = vector.broadcast %cst_17 : bf16 to vector<16x1x128xbf16>
    %30 = vector.extract_strided_slice %3 {offsets = [0, 0, 0], sizes = [16, 15, 128], strides = [1, 1, 1]} : vector<16x16x128xbf16> to vector<16x15x128xbf16>
    %31 = tpu.concatenate %29, %30 in 1 : vector<16x1x128xbf16>, vector<16x15x128xbf16> -> vector<16x16x128xbf16>
    %32 = vector.extract_strided_slice %3 {offsets = [0, 1, 0], sizes = [16, 15, 128], strides = [1, 1, 1]} : vector<16x16x128xbf16> to vector<16x15x128xbf16>
    %33 = tpu.concatenate %32, %29 in 1 : vector<16x15x128xbf16>, vector<16x1x128xbf16> -> vector<16x16x128xbf16>
    %34 = tpu.concatenate %31, %3, %33 in 2 : vector<16x16x128xbf16>, vector<16x16x128xbf16>, vector<16x16x128xbf16> -> vector<16x16x384xbf16>
    %cst_18 = arith.constant 0.000000e+00 : bf16
    %35 = vector.broadcast %cst_18 : bf16 to vector<16x384xbf16>
    %36 = vector.shape_cast %34 : vector<16x16x384xbf16> to vector<256x384xbf16>
    %37 = tpu.concatenate %35, %36, %35 in 0 : vector<16x384xbf16>, vector<256x384xbf16>, vector<16x384xbf16> -> vector<288x384xbf16>
    %38 = vector.extract_strided_slice %37 {offsets = [0, 0], sizes = [256, 384], strides = [1, 1]} : vector<288x384xbf16> to vector<256x384xbf16>
    %39 = vector.extract_strided_slice %28 {offsets = [0, 0, 0], sizes = [1, 384, 128], strides = [1, 1, 1]} : vector<3x384x128xbf16> to vector<1x384x128xbf16>
    %40 = vector.shape_cast %39 : vector<1x384x128xbf16> to vector<384x128xbf16>
    %cst_19 = arith.constant dense<0.000000e+00> : vector<256x128xf32>
    %41 = tpu.matmul %38, %40, %cst_19 {dimension_numbers = #tpu.dot_dimension_numbers<[1], [0], [0], [1], [0, 0, 1, 1], [], []>} : vector<256x384xbf16>, vector<384x128xbf16>, vector<256x128xf32> -> vector<256x128xf32>
    %42 = arith.addf %27, %41 : vector<256x128xf32>
    %43 = vector.extract_strided_slice %37 {offsets = [16, 0], sizes = [256, 384], strides = [1, 1]} : vector<288x384xbf16> to vector<256x384xbf16>
    %44 = vector.extract_strided_slice %28 {offsets = [1, 0, 0], sizes = [1, 384, 128], strides = [1, 1, 1]} : vector<3x384x128xbf16> to vector<1x384x128xbf16>
    %45 = vector.shape_cast %44 : vector<1x384x128xbf16> to vector<384x128xbf16>
    %cst_20 = arith.constant dense<0.000000e+00> : vector<256x128xf32>
    %46 = tpu.matmul %43, %45, %cst_20 {dimension_numbers = #tpu.dot_dimension_numbers<[1], [0], [0], [1], [0, 0, 1, 1], [], []>} : vector<256x384xbf16>, vector<384x128xbf16>, vector<256x128xf32> -> vector<256x128xf32>
    %47 = arith.addf %42, %46 : vector<256x128xf32>
    %48 = vector.extract_strided_slice %37 {offsets = [32, 0], sizes = [256, 384], strides = [1, 1]} : vector<288x384xbf16> to vector<256x384xbf16>
    %49 = vector.extract_strided_slice %28 {offsets = [2, 0, 0], sizes = [1, 384, 128], strides = [1, 1, 1]} : vector<3x384x128xbf16> to vector<1x384x128xbf16>
    %50 = vector.shape_cast %49 : vector<1x384x128xbf16> to vector<384x128xbf16>
    %cst_21 = arith.constant dense<0.000000e+00> : vector<256x128xf32>
    %51 = tpu.matmul %48, %50, %cst_21 {dimension_numbers = #tpu.dot_dimension_numbers<[1], [0], [0], [1], [0, 0, 1, 1], [], []>} : vector<256x384xbf16>, vector<384x128xbf16>, vector<256x128xf32> -> vector<256x128xf32>
    %52 = arith.addf %47, %51 : vector<256x128xf32>
    %c0_22 = arith.constant 0 : index
    %c0_23 = arith.constant 0 : index
    %53 = vector.load %arg5[%c0_22, %c0_23] : memref<1x128xf32, #tpu.memory_space<vmem>>, vector<1x128xf32>
    %54 = vector.broadcast %53 : vector<1x128xf32> to vector<256x128xf32>
    %55 = arith.addf %52, %54 : vector<256x128xf32>
    %cst_24 = arith.constant 0.000000e+00 : f32
    %56 = vector.broadcast %cst_24 : f32 to vector<256x128xf32>
    %57 = arith.maximumf %55, %56 : vector<256x128xf32>
    %58 = arith.truncf %57 : vector<256x128xf32> to vector<256x128xbf16>
    %59 = vector.shape_cast %58 : vector<256x128xbf16> to vector<16x16x128xbf16>
    %c0_25 = arith.constant 0 : index
    %c0_26 = arith.constant 0 : index
    %c0_27 = arith.constant 0 : index
    %60 = vector.load %arg6[%c0_25, %c0_26, %c0_27] : memref<3x384x128xbf16, #tpu.memory_space<vmem>>, vector<3x384x128xbf16>
    %cst_28 = arith.constant 0.000000e+00 : bf16
    %61 = vector.broadcast %cst_28 : bf16 to vector<16x1x128xbf16>
    %62 = vector.extract_strided_slice %59 {offsets = [0, 0, 0], sizes = [16, 15, 128], strides = [1, 1, 1]} : vector<16x16x128xbf16> to vector<16x15x128xbf16>
    %63 = tpu.concatenate %61, %62 in 1 : vector<16x1x128xbf16>, vector<16x15x128xbf16> -> vector<16x16x128xbf16>
    %64 = vector.extract_strided_slice %59 {offsets = [0, 1, 0], sizes = [16, 15, 128], strides = [1, 1, 1]} : vector<16x16x128xbf16> to vector<16x15x128xbf16>
    %65 = tpu.concatenate %64, %61 in 1 : vector<16x15x128xbf16>, vector<16x1x128xbf16> -> vector<16x16x128xbf16>
    %66 = tpu.concatenate %63, %59, %65 in 2 : vector<16x16x128xbf16>, vector<16x16x128xbf16>, vector<16x16x128xbf16> -> vector<16x16x384xbf16>
    %cst_29 = arith.constant 0.000000e+00 : bf16
    %67 = vector.broadcast %cst_29 : bf16 to vector<16x384xbf16>
    %68 = vector.shape_cast %66 : vector<16x16x384xbf16> to vector<256x384xbf16>
    %69 = tpu.concatenate %67, %68, %67 in 0 : vector<16x384xbf16>, vector<256x384xbf16>, vector<16x384xbf16> -> vector<288x384xbf16>
    %70 = vector.extract_strided_slice %69 {offsets = [0, 0], sizes = [256, 384], strides = [1, 1]} : vector<288x384xbf16> to vector<256x384xbf16>
    %71 = vector.extract_strided_slice %60 {offsets = [0, 0, 0], sizes = [1, 384, 128], strides = [1, 1, 1]} : vector<3x384x128xbf16> to vector<1x384x128xbf16>
    %72 = vector.shape_cast %71 : vector<1x384x128xbf16> to vector<384x128xbf16>
    %cst_30 = arith.constant dense<0.000000e+00> : vector<256x128xf32>
    %73 = tpu.matmul %70, %72, %cst_30 {dimension_numbers = #tpu.dot_dimension_numbers<[1], [0], [0], [1], [0, 0, 1, 1], [], []>} : vector<256x384xbf16>, vector<384x128xbf16>, vector<256x128xf32> -> vector<256x128xf32>
    %74 = vector.extract_strided_slice %69 {offsets = [16, 0], sizes = [256, 384], strides = [1, 1]} : vector<288x384xbf16> to vector<256x384xbf16>
    %75 = vector.extract_strided_slice %60 {offsets = [1, 0, 0], sizes = [1, 384, 128], strides = [1, 1, 1]} : vector<3x384x128xbf16> to vector<1x384x128xbf16>
    %76 = vector.shape_cast %75 : vector<1x384x128xbf16> to vector<384x128xbf16>
    %cst_31 = arith.constant dense<0.000000e+00> : vector<256x128xf32>
    %77 = tpu.matmul %74, %76, %cst_31 {dimension_numbers = #tpu.dot_dimension_numbers<[1], [0], [0], [1], [0, 0, 1, 1], [], []>} : vector<256x384xbf16>, vector<384x128xbf16>, vector<256x128xf32> -> vector<256x128xf32>
    %78 = arith.addf %73, %77 : vector<256x128xf32>
    %79 = vector.extract_strided_slice %69 {offsets = [32, 0], sizes = [256, 384], strides = [1, 1]} : vector<288x384xbf16> to vector<256x384xbf16>
    %80 = vector.extract_strided_slice %60 {offsets = [2, 0, 0], sizes = [1, 384, 128], strides = [1, 1, 1]} : vector<3x384x128xbf16> to vector<1x384x128xbf16>
    %81 = vector.shape_cast %80 : vector<1x384x128xbf16> to vector<384x128xbf16>
    %cst_32 = arith.constant dense<0.000000e+00> : vector<256x128xf32>
    %82 = tpu.matmul %79, %81, %cst_32 {dimension_numbers = #tpu.dot_dimension_numbers<[1], [0], [0], [1], [0, 0, 1, 1], [], []>} : vector<256x384xbf16>, vector<384x128xbf16>, vector<256x128xf32> -> vector<256x128xf32>
    %83 = arith.addf %78, %82 : vector<256x128xf32>
    %c0_33 = arith.constant 0 : index
    %c0_34 = arith.constant 0 : index
    %84 = vector.load %arg7[%c0_33, %c0_34] : memref<1x128xf32, #tpu.memory_space<vmem>>, vector<1x128xf32>
    %85 = vector.broadcast %84 : vector<1x128xf32> to vector<256x128xf32>
    %86 = arith.addf %83, %85 : vector<256x128xf32>
    %cst_35 = arith.constant 0.000000e+00 : f32
    %87 = vector.broadcast %cst_35 : f32 to vector<256x128xf32>
    %88 = arith.maximumf %86, %87 : vector<256x128xf32>
    %89 = vector.shape_cast %88 : vector<256x128xf32> to vector<1x16x16x128xf32>
    %c0_36 = arith.constant 0 : index
    %c0_37 = arith.constant 0 : index
    %c0_38 = arith.constant 0 : index
    %c0_39 = arith.constant 0 : index
    %90 = vector.load %arg8[%c0_36, %c0_37, %c0_38, %c0_39] : memref<1x16x16x128xf32, #tpu.memory_space<vmem>>, vector<1x16x16x128xf32>
    tpu.vector_store %arg8[%c0_36, %c0_37, %c0_38, %c0_39], %89 {strides = array<i32>} : memref<1x16x16x128xf32, #tpu.memory_space<vmem>>, vector<1x16x16x128xf32>,
    return
  }
  func.func @transform_0(%arg0: i32) -> (i32, i32, i32, i32) {
    %c0_i32 = arith.constant 0 : i32
    %c0_i32_0 = arith.constant 0 : i32
    %c0_i32_1 = arith.constant 0 : i32
    %c0_i32_2 = arith.constant 0 : i32
    return %arg0, %c0_i32, %c0_i32_0, %c0_i32_1 : i32, i32, i32, i32
  }
  func.func @transform_1(%arg0: i32) -> (i32, i32, i32, i32) {
    %c0_i32 = arith.constant 0 : i32
    %c0_i32_0 = arith.constant 0 : i32
    %c0_i32_1 = arith.constant 0 : i32
    %c0_i32_2 = arith.constant 0 : i32
    return %arg0, %c0_i32, %c0_i32_0, %c0_i32_1 : i32, i32, i32, i32
  }
  func.func @transform_2(%arg0: i32) -> (i32, i32, i32) {
    %c0_i32 = arith.constant 0 : i32
    %c0_i32_0 = arith.constant 0 : i32
    %c0_i32_1 = arith.constant 0 : i32
    %c0_i32_2 = arith.constant 0 : i32
    return %c0_i32, %c0_i32_0, %c0_i32_1 : i32, i32, i32
  }
  func.func @transform_3(%arg0: i32) -> (i32, i32, i32) {
    %c0_i32 = arith.constant 0 : i32
    %c0_i32_0 = arith.constant 0 : i32
    %c0_i32_1 = arith.constant 0 : i32
    %c0_i32_2 = arith.constant 0 : i32
    return %c0_i32, %c0_i32_0, %c0_i32_1 : i32, i32, i32
  }
  func.func @transform_4(%arg0: i32) -> (i32, i32) {
    %c0_i32 = arith.constant 0 : i32
    %c0_i32_0 = arith.constant 0 : i32
    %c0_i32_1 = arith.constant 0 : i32
    return %c0_i32, %c0_i32_0 : i32, i32
  }
  func.func @transform_5(%arg0: i32) -> (i32, i32, i32) {
    %c0_i32 = arith.constant 0 : i32
    %c0_i32_0 = arith.constant 0 : i32
    %c0_i32_1 = arith.constant 0 : i32
    %c0_i32_2 = arith.constant 0 : i32
    return %c0_i32, %c0_i32_0, %c0_i32_1 : i32, i32, i32
  }
  func.func @transform_6(%arg0: i32) -> (i32, i32) {
    %c0_i32 = arith.constant 0 : i32
    %c0_i32_0 = arith.constant 0 : i32
    %c0_i32_1 = arith.constant 0 : i32
    return %c0_i32, %c0_i32_0 : i32, i32
  }
  func.func @transform_7(%arg0: i32) -> (i32, i32, i32, i32) {
    %c0_i32 = arith.constant 0 : i32
    %c0_i32_0 = arith.constant 0 : i32
    %c0_i32_1 = arith.constant 0 : i32
    %c0_i32_2 = arith.constant 0 : i32
    return %arg0, %c0_i32, %c0_i32_0, %c0_i32_1 : i32, i32, i32, i32
  }
}

</mosaic_0001>

<bundles_post_ra>
// kernel: tpu_custom_call.1
= control target key start
LH: loop header
LB: loop body
LE: loop exit
PB: predicated region body
PF: predicated region fallthrough
CT: control target
= control target key end

     0   :  { %s10283_s0 = inlined_call_operand.hbm [shape: bf16[2,16,16,128], index: 0, kind: input, shape index: {}]   ;;  %s10284_s1 = inlined_call_operand.hbm [shape: bf16[2,16,16,128], index: 1, kind: input, shape index: {}]   ;;  %s10285_s2 = inlined_call_operand.hbm [shape: bf16[3,384,128], index: 2, kind: input, shape index: {}]   ;;  %s10286_s3 = inlined_call_operand.hbm [shape: bf16[3,384,128], index: 3, kind: input, shape index: {}]   ;;  %s10287_s4 = inlined_call_operand.vmem [shape: f32[1,128], index: 4, kind: input, shape index: {}]   ;;  %s10288_s5 = inlined_call_operand.hbm [shape: bf16[3,384,128], index: 5, kind: input, shape index: {}]   ;;  %s10289_s6 = inlined_call_operand.vmem [shape: f32[1,128], index: 6, kind: input, shape index: {}]   ;;  %s10290_s7 = inlined_call_operand.hbm [shape: f32[2,16,16,128], index: 7, kind: output, shape index: {}]  }
   0x1   :  { %10411 = sst [smem:[#allocation72_spill]] %s10283_s0 }
   0x2   :  { %10412 = sst [smem:[#allocation73_spill]] %s10285_s2 }
   0x3   :  { %10413 = sst [smem:[#allocation74_spill]] %s10286_s3 }
   0x4   :  { %10414 = sst [smem:[#allocation75_spill]] %s10288_s5 }
   0x5   :  { %12 = vsyncpa [#allocation3], 0 }
   0x6   :  { %14 = vsyncpa [#allocation3 + $0x1], 0 }
   0x7   :  { %15 = vsyncpa [#allocation6], 0 }
   0x8   :  { %17 = vsyncpa [#allocation6 + $0x1], 0 }
   0x9   :  { %18 = vsyncpa [#allocation9], 0 }
   0xa   :  { %19 = vsyncpa [#allocation4], 0 }
   0xb   :  { %21 = vsyncpa [#allocation4 + $0x1], 0  ;;  %s7692_s24 = smov 0   ;;  %s7694_s25 = smov 0  }
   0xc   :  { %s7696_s26 = smov 0   ;;  %s7698_s27 = smov 0  }
   0xd LB: > { %s7713_s28 = sadd.s32 4294967295, %s7642_s27   ;;  %s6004_s29 = sadd.s32 4294967294, %s7642_s27   ;;  %s7642_s27 = sphi %s7698_s27, %s10764_s27   ;;  %s7638_s26 = sphi %s7696_s26, %s10763_s26   ;;  %s7634_s25 = sphi %s7694_s25, %s10762_s25   ;;  %s7630_s24 = sphi %s7692_s24, %s10761_s24  }
   0xe   : > { %p47_p0 = scmp.ne.s32.totalorder %s7634_s25, %s7630_s24  ;;  %p48_p1 = scmp.eq.s32.totalorder %s7713_s28, 0 }
   0xf   : > { %p202_p2 = scmp.eq.s32.totalorder %s7713_s28, 1  ;;  %p208_p3 = scmp.eq.s32.totalorder %s6004_s29, 1 }
  0x10   : > { %p7722_p4 = por %p48_p1, %p47_p0  ;;  %p6005_p5 = scmp.ge.s32.totalorder %s7642_s27, 1 }
  0x11   : > { %p7727_p6 = por %p208_p3, %p47_p0  ;;  %p215_p7 = scmp.lt.s32.totalorder %s7642_s27, 3 }
  0x12   : > { %s10417_s2 = sld [smem:[#allocation73_spill]]  ;;  %s7644_s13 = smov [#allocation7]  }
  0x13   : > { %p7735_p8 = pnand %p6005_p5, %p215_p7  ;;  %s228_s14 = sshll.u32 %s7644_s13, 4  ;;  %s229_s14 = int_to_ptr.vmem [resolvable:$true] %s228_s14 }
  0x14   : > { %s10420_s3 = sld [smem:[#allocation74_spill]]  ;;  %s10291_s19 = smov 64  }
  0x15   : > { %p7313_p9 = pneg %p7735_p8  ;;  %s10293_s20 = smov 4  }
  0x16   : > { %s7647_s21 = smov [#allocation8]   ;;  %s10421_s5 = sld [smem:[#allocation75_spill]] }
  0x17   : > { %p7743_p10 = pnand %p7313_p9, %p48_p1  ;;  %s242_s22 = sshll.u32 %s7647_s21, 4  ;;  %s243_s22 = int_to_ptr.vmem [resolvable:$true] %s242_s22 }
  0x18   : > { %s226_s11 = sshll.u32 %s10417_s2, 4  ;;  %s7648_s10 = smov [#allocation10]   ;;  %s227_s11 = int_to_ptr.hbm [resolvable:$true] %s226_s11 }
  0x19   : > { %7316 = dma.hbm_to_vmem [thread:$0]  (!%p7743_p10), %s227_s11, 9216, %s229_s14, [#allocation6], %s10291_s19, %s10291_s19, %s10293_s20  }
  0x1a   : > { %s240_s18 = sshll.u32 %s10420_s3, 4  ;;  %s259_s11 = sshll.u32 %s7648_s10, 4  ;;  %s241_s18 = int_to_ptr.hbm [resolvable:$true] %s240_s18  ;;  %s260_s11 = int_to_ptr.vmem [resolvable:$true] %s259_s11 }
  0x1b   : > { %7319 = dma.hbm_to_vmem [thread:$0]  (!%p7743_p10), %s241_s18, 9216, %s243_s22, [#allocation9], %s10291_s19, %s10291_s19, %s10293_s20  }
  0x1c   : > { %s257_s9 = sshll.u32 %s10421_s5, 4  ;;  %s7765_s13 = sadd.s32 1, %s7642_s27   ;;  %s258_s9 = int_to_ptr.hbm [resolvable:$true] %s257_s9 }
  0x1d   : > { %7322 = dma.hbm_to_vmem [thread:$0]  (!%p7743_p10), %s258_s9, 9216, %s260_s11, [#allocation9], %s10291_s19, %s10291_s19, %s10293_s20  }
  0x1e   : > { %s31_s14 = ssub.s32 %s7642_s27, %s7765_s13  ;;  %s34_s16 = sadd.s32 1, %s7638_s26 }
  0x1f   : > { %p32_p12 = scmp.eq.s32.totalorder %s31_s14, 0  ;;  %p41_p13 = scmp.ne.s32.totalorder %s7638_s26, %s7634_s25 }
  0x20   : > { %p42_p0 = scmp.eq.s32.totalorder %s7642_s27, 0  ;;  %p7337_p3 = scmp.lt.s32.totalorder %s7642_s27, 2 }
  0x21   : > { %s7780_s17 = scalar_select %p32_p12, %s7638_s26, %s34_s16  }
  0x22   : > { %p43_p5 = por %p42_p0, %p41_p13  ;;  %p7784_p7 = por %p202_p2, %p41_p13 }
  0x23   : > { %10422 = sst [smem:[#allocation17_spill]] %s7780_s17  ;;  %s276_s15 = sand.u32 1, %s7638_s26  }
  0x24   : > { %s7020_s21 = sshll.u32 %s7642_s27, 7  ;;  %s6010_s22 = sshll.u32 %s276_s15, 7 }
  0x25   : > { %s10424_s0 = sld [smem:[#allocation72_spill]]  ;;  %s280_s11 = scalar_lea.vmem [#allocation2], %s6010_s22 }
  0x26   : > { %s288_s14 = sshll.u32 %s280_s11, 4  ;;  %p7795_p9 = pnand %p7337_p3, %p43_p5  ;;  %s289_s14 = int_to_ptr.vmem [resolvable:$true] %s288_s14 }
  0x27   : > { %s307_s2 = scalar_lea.hbm %s10284_s1, %s7020_s21  ;;  %s302_s3 = scalar_lea.vmem [#allocation5], %s6010_s22 }
  0x28   : > { %s7802_s5 = sshll.u32 %s302_s3, 4  ;;  %s308_s23 = sshll.u32 %s307_s2, 4  ;;  %s309_s23 = int_to_ptr.hbm [resolvable:$true] %s308_s23  ;;  %s311_s5 = int_to_ptr.vmem [resolvable:$true] %s7802_s5 }
  0x29   : > { %s277_s29 = scalar_lea.sflag [#allocation3], %s276_s15  ;;  %p7508_p10 = pneg %p7795_p9 }
  0x2b   : > { %s285_s9 = scalar_lea.hbm %s10424_s0, %s7020_s21  ;;  %s7511_s20 = scalar_lea.hbm %s10424_s0, 256 }
  0x2c   : > { %s286_s10 = sshll.u32 %s285_s9, 4  ;;  %s287_s10 = int_to_ptr.hbm [resolvable:$true] %s286_s10 }
  0x2d   : > { %s7504_s9 = sshra.s32 %s287_s10, 4  ;;  %s7505_s9 = int_to_ptr.hbm [resolvable:$true] %s7504_s9 }
  0x2e   : > { %s7506_s11 = scalar_lea.hbm %s7505_s9, 128  ;;  %p7512_p0 = scmp.lt.s32.totalorder %s7505_s9, %s10424_s0 }
  0x2f   : > { %p7507_p2 = scmp.ne.s32.totalorder %s7505_s9, %s7506_s11  ;;  %p7513_p3 = scmp.lt.s32.totalorder %s7511_s20, %s7506_s11 }
  0x31   : > { %p7509_p12 = pnand %p7508_p10, %p7507_p2  ;;  %p7514_p5 = por %p7513_p3, %p7512_p0 }
  0x33   : > { %p7510_p13 = pneg %p7509_p12 }
  0x35   : > { %p7515_p11 = pnand %p7514_p5, %p7510_p13 }
  0x37   : > { %7518 = shalt.err (!%p7515_p11)
}
  0x38   : > { %s10426_s2 = smov 4   ;;  %s10427_s3 = smov 64  }
  0x39   : > { %7326 = dma.hbm_to_vmem [thread:$0]  (!%p7795_p9), %s287_s10, 2048, %s289_s14, %s277_s29, %s10427_s3, %s10427_s3, %s10426_s2  }
  0x3a   : > { %s298_s17 = sand.u32 1, %s7642_s27   ;;  %s7534_s19 = sshra.s32 %s309_s23, 4  ;;  %s7535_s19 = int_to_ptr.hbm [resolvable:$true] %s7534_s19 }
  0x3b   : > { %s299_s15 = scalar_lea.sflag [#allocation6], %s298_s17  ;;  %s7536_s9 = scalar_lea.hbm %s7535_s19, 128 }
  0x3c   : > { %p7537_p2 = scmp.ne.s32.totalorder %s7535_s19, %s7536_s9  ;;  %s7541_s21 = scalar_lea.hbm %s10284_s1, 256 }
  0x3d   : > { %p7542_p13 = scmp.lt.s32.totalorder %s7535_s19, %s10284_s1  ;;  %p7543_p0 = scmp.lt.s32.totalorder %s7541_s21, %s7536_s9 }
  0x3e   : > { %p7539_p11 = pnand %p7537_p2, %p7508_p10 }
  0x3f   : > { %p7544_p3 = por %p7543_p0, %p7542_p13 }
  0x40   : > { %p7540_p12 = pneg %p7539_p11 }
  0x42   : > { %p7545_p5 = pnand %p7544_p3, %p7540_p12 }
  0x44   : > { %7548 = shalt.err (!%p7545_p5)
}
  0x45   : > { %7329 = dma.hbm_to_vmem [thread:$0]  (!%p7795_p9), %s309_s23, 2048, %s311_s5, %s299_s15, %s10427_s3, %s10427_s3, %s10426_s2  }
  0x46   : > { %322 = sbr.rel (%p7735_p8) target bundleno = 2145 (0x861), region = 48 }
  0x4b   : > { %s7839_s10 = sand.u32 1, %s7634_s25  }
  0x4c   : > { %s6017_s0 = sshll.u32 %s7839_s10, 7  ;;  %s325_s14 = scalar_lea.sflag [#allocation3], %s7839_s10 }
  0x4d   : > { %s7843_s29 = scalar_lea.vmem [#allocation2], %s6017_s0 }
  0x4e   : > { %7609 = dma.done.wait (%p7722_p4), %s325_s14, 2048  }
  0x4f   : > { %7611 = vsyncadd (%p7722_p4), %s325_s14, 4294965248  ;;  %s334_s5 = sand.u32 1, %s7713_s28   ;;  %s7850_s16 = scalar_lea.vmem [#allocation5], %s6017_s0 }
  0x50   : > { %s335_s12 = scalar_lea.sflag [#allocation6], %s334_s5 }
  0x51   : > { %7613 = dma.done.wait (%p7722_p4), %s335_s12, 2048  }
  0x52   : > { %7615 = vsyncadd (%p7722_p4), %s335_s12, 4294965248 }
  0x53   : > { %7617 = dma.done.wait (%p48_p1), [#allocation6], 9216  }
  0x54   : > { %7619 = vsyncadd (%p48_p1), [#allocation6], 4294958080 }
  0x55   : > { %7621 = dma.done.wait (%p48_p1), [#allocation9], 18432  }
  0x56   : > { %7623 = vsyncadd (%p48_p1), [#allocation9], 4294948864  ;;  %v7085_v0 = vld [vmem:[#allocation7 + $0xf8] sm:$0xff]  ;;  %v7084_v3 = vld [vmem:[#allocation7 + $0xf0] sm:$0xff]  ;;  %vm807_vm0 = vcmask 1040384   ;;  %vm874_vm2 = vcmask 1047552  }
  0x57   : > { %v7864_v1 = vld [vmem:[#allocation7 + $0x138] sm:$0xff]  ;;  %1053 = vmatpush.bf16.msra.mxu0 %v7085_v0  ;;  %7271 = vmatpush.bf16.msra.mxu3 %v7085_v0  ;;  %v7870_v4 = vld [vmem:[#allocation7 + $0x130] sm:$0xff]  ;;  %v7083_v6 = vld [vmem:[#allocation7 + $0xe8] sm:$0xff]  ;;  %vm808_vm1 = vsmask.f32 256  ;;  %v10428_v35 = vmov 0 }
  0x58   : > { %v7866_v2 = vld [vmem:[#allocation7 + $0x178] sm:$0xff]  ;;  %1142 = vmatpush.bf16.msra.mxu1 %v7864_v1  ;;  %v7872_v5 = vld [vmem:[#allocation7 + $0x170] sm:$0xff]  ;;  %v7876_v7 = vld [vmem:[#allocation7 + $0x128] sm:$0xff]  ;;  %vm875_vm3 = vsmask.f32 7424  ;;  %v10431_v37 = vmov 0 }
  0x59   : > { %1231 = vmatpush.bf16.msra.mxu2 %v7866_v2  ;;  %v7878_v8 = vld [vmem:[#allocation7 + $0x168] sm:$0xff]  ;;  %v7082_v9 = vld [vmem:[#allocation7 + $0xe0] sm:$0xff]  ;;  %v7081_v12 = vld [vmem:[#allocation7 + $0xd8] sm:$0xff]  ;;  %s6022_s19 = sshll.u32 %s7839_s10, 8  ;;  %s7270_s11 = sshll.u32 %s7713_s28, 8 }
  0x5a   : > { %v7880_v10 = vld [vmem:[#allocation7 + $0x120] sm:$0xff]  ;;  %v7894_v15 = vld [vmem:[#allocation7 + $0x118] sm:$0xff]  ;;  %v7080_v17 = vld [vmem:[#allocation7 + $0xd0] sm:$0xff]  ;;  %s10139_s9 = scalar_lea.vmem [#allocation11], %s6022_s19  ;;  %s5876_s22 = scalar_lea.hbm %s10290_s7, %s7270_s11 }
  0x5b   : > { %1054 = vmatpush.bf16.msra.mxu0 %v7084_v3  ;;  %7272 = vmatpush.bf16.msra.mxu3 %v7084_v3  ;;  %v7884_v11 = vld [vmem:[#allocation7 + $0x160] sm:$0xff]  ;;  %v7896_v16 = vld [vmem:[#allocation7 + $0x158] sm:$0xff]  ;;  %v7902_v20 = vld [vmem:[#allocation7 + $0x110] sm:$0xff]  ;;  %s5877_s0 = sshll.u32 %s10139_s9, 4  ;;  %s5879_s14 = sshll.u32 %s5876_s22, 4  ;;  %s5878_s0 = int_to_ptr.vmem [resolvable:$true] %s5877_s0  ;;  %s5880_s14 = int_to_ptr.hbm [resolvable:$true] %s5879_s14 }
  0x5c   : > { %1143 = vmatpush.bf16.msra.mxu1 %v7870_v4  ;;  %v7887_v13 = vld [vmem:[%s7843_s29] sm:$0xff]  ;;  %v7904_v21 = vld [vmem:[#allocation7 + $0x150] sm:$0xff]  ;;  %v7079_v23 = vld [vmem:[#allocation7 + $0xc8] sm:$0xff]  ;;  %s5865_s28 = scalar_lea.sflag [#allocation4], %s7839_s10  ;;  %s7584_s30 = scalar_lea.hbm %s10290_s7, 512 }
  0x5d   : > { %1232 = vmatpush.bf16.msra.mxu2 %v7872_v5  ;;  %v7890_v14 = vld [vmem:[%s7843_s29 + $0x60] sm:$0xff]  ;;  %v680_v18 = vshrl.u32 %v7887_v13, 16  ;;  %v683_v22 = vshll.u32 %v7887_v13, 16  ;;  %v7912_v27 = vld [vmem:[#allocation7 + $0x108] sm:$0xff]  ;;  %vm7924_vm4 = vmand %vm807_vm0, %vm808_vm1 }
  0x5e   : > { %v764_v19 = vshrl.u32 %v7890_v14, 16  ;;  %v767_v26 = vshll.u32 %v7890_v14, 16  ;;  %v7914_v28 = vld [vmem:[#allocation7 + $0x148] sm:$0xff]  ;;  %v7078_v30 = vld [vmem:[#allocation7 + $0xc0] sm:$0xff]  ;;  %v10429_v35 = vsel %vm7924_vm4, 4294967295, %v10428_v35  ;;  %vm7928_vm5 = vmand %vm874_vm2, %vm875_vm3 }
  0x5f   : > { %1055 = vmatpush.bf16.msra.mxu0 %v7083_v6  ;;  %7273 = vmatpush.bf16.msra.mxu3 %v7083_v6  ;;  %v682_v24 = vrot.slane %v680_v18, 7  ;;  %v826_v29 = vrot.slane %v683_v22, 1  ;;  %v7920_v33 = vld [vmem:[#allocation7 + $0x100] sm:$0xff]  ;;  %10430 = vst [vmem:[#allocation18_spill] sm:$0xff] %v10429_v35  ;;  %v10432_v37 = vsel %vm7928_vm5, 4294967295, %v10431_v37  ;;  %v7069_v38 = vld [vmem:[#allocation7 + $0x78] sm:$0xff] }
  0x60   : > { %1144 = vmatpush.bf16.msra.mxu1 %v7876_v7  ;;  %v766_v25 = vrot.slane %v764_v19, 7  ;;  %v7922_v34 = vld [vmem:[#allocation7 + $0x140] sm:$0xff]  ;;  %10433 = vst [vmem:[#allocation19_spill] sm:$0xff] %v10432_v37  ;;  %v7941_v41 = vld [vmem:[%s7843_s29 + $0x8] sm:$0xff]  ;;  %v7077_v44 = vld [vmem:[#allocation7 + $0xb8] sm:$0xff] }
  0x61   : > { %1233 = vmatpush.bf16.msra.mxu2 %v7878_v8  ;;  %v685_v31 = vor.u32 %v683_v22, %v682_v24  ;;  %v827_v36 = vor.u32 %v826_v29, %v680_v18  ;;  %v7944_v42 = vld [vmem:[%s7843_s29 + $0x68] sm:$0xff]  ;;  %v7068_v45 = vld [vmem:[#allocation7 + $0x70] sm:$0xff]  ;;  %v687_v46 = vshrl.u32 %v7941_v41, 16  ;;  %v690_v48 = vshll.u32 %v7941_v41, 16  ;;  %v8015_v22 = vld [vmem:[%s7843_s29 + $0x78] sm:$0xff] }
  0x62   : > { %v769_v32 = vor.u32 %v767_v26, %v766_v25  ;;  %v771_v47 = vshrl.u32 %v7944_v42, 16  ;;  %v7076_v49 = vld [vmem:[#allocation7 + $0xb0] sm:$0xff]  ;;  %v774_v52 = vshll.u32 %v7944_v42, 16  ;;  %v7067_v0 = vld [vmem:[#allocation7 + $0x68] sm:$0xff]  ;;  %v10295_v24 = vshrl.u32 %v8015_v22, 16  ;;  %v7066_v25 = vld [vmem:[#allocation7 + $0x60] sm:$0xff] }
  0x63   : > { %1056 = vmatpush.bf16.msra.mxu0 %v7082_v9  ;;  %7274 = vmatpush.bf16.msra.mxu3 %v7082_v9  ;;  %v7934_v39 = vsel %vm7924_vm4, 0, %v685_v31  ;;  %v7950_v43 = vsel %vm7928_vm5, %v827_v36, 0  ;;  %v689_v50 = vrot.slane %v687_v46, 7  ;;  %v828_v53 = vrot.slane %v690_v48, 1  ;;  %v7977_v59 = vld [vmem:[%s7843_s29 + $0x10] sm:$0xff] }
  0x64   : > { %1145 = vmatpush.bf16.msra.mxu1 %v7880_v10  ;;  %v7938_v40 = vsel %vm7924_vm4, 0, %v769_v32  ;;  %v773_v51 = vrot.slane %v771_v47, 7  ;;  %v7980_v60 = vld [vmem:[%s7843_s29 + $0x70] sm:$0xff]  ;;  %v694_v62 = vshrl.u32 %v7977_v59, 16  ;;  %v697_v3 = vshll.u32 %v7977_v59, 16 }
  0x65   : > { %1234 = vmatpush.bf16.msra.mxu2 %v7884_v11  ;;  %10434 = vst [vmem:[#allocation20_spill] sm:$0xff] %v7938_v40  ;;  %v692_v54 = vor.u32 %v690_v48, %v689_v50  ;;  %v829_v56 = vor.u32 %v828_v53, %v687_v46  ;;  %v10297_v63 = vshrl.u32 %v7980_v60, 16  ;;  %v10296_v31 = vshll.u32 %v8015_v22, 16  ;;  %v7074_v46 = vld [vmem:[#allocation7 + $0xa0] sm:$0xff]  ;;  %v7132_v37 = vld [vmem:[#allocation8 + $0x30] sm:$0xff] }
  0x66   : > { %v776_v55 = vor.u32 %v774_v52, %v773_v51  ;;  %v830_v9 = vrot.slane %v697_v3, 1 }
  0x67   : > { %1057 = vmatpush.bf16.msra.mxu0 %v7081_v12  ;;  %7275 = vmatpush.bf16.msra.mxu3 %v7081_v12  ;;  %v7970_v57 = vsel %vm7924_vm4, 0, %v692_v54  ;;  %v7984_v61 = vsel %vm7928_vm5, %v829_v56, 0  ;;  %v780_v6 = vrot.slane %v10297_v63, 7  ;;  %v8066_v54 = vld [vmem:[%s7843_s29 + $0x28] sm:$0xff] }
  0x68   : > { %1146 = vmatpush.bf16.msra.mxu1 %v7894_v15  ;;  %v7974_v58 = vsel %vm7924_vm4, 0, %v776_v55  ;;  %v718_v56 = vshll.u32 %v8066_v54, 16 }
  0x69   : > { %1235 = vmatpush.bf16.msra.mxu2 %v7896_v16  ;;  %10435 = vst [vmem:[#allocation21_spill] sm:$0xff] %v7974_v58 }
  0x6b   : > { %1058 = vmatpush.bf16.msra.mxu0 %v7080_v17  ;;  %7276 = vmatpush.bf16.msra.mxu3 %v7080_v17 }
  0x6c   : > { %1147 = vmatpush.bf16.msra.mxu1 %v7902_v20 }
  0x6d   : > { %1236 = vmatpush.bf16.msra.mxu2 %v7904_v21 }
  0x6f   : > { %1059 = vmatpush.bf16.msra.mxu0 %v7079_v23  ;;  %7277 = vmatpush.bf16.msra.mxu3 %v7079_v23 }
  0x70   : > { %1148 = vmatpush.bf16.msra.mxu1 %v7912_v27 }
  0x71   : > { %1237 = vmatpush.bf16.msra.mxu2 %v7914_v28 }
  0x73   : > { %1060 = vmatpush.bf16.msra.mxu0 %v7078_v30  ;;  %7278 = vmatpush.bf16.msra.mxu3 %v7078_v30  ;;  %v787_v30 = vrot.slane %v10295_v24, 7 }
  0x74   : > { %1149 = vmatpush.bf16.msra.mxu1 %v7920_v33 }
  0x75   : > { %1238 = vmatpush.bf16.msra.mxu2 %v7922_v34  ;;  %v790_v36 = vor.u32 %v10296_v31, %v787_v30  ;;  %v8100_v30 = vld [vmem:[%s7843_s29 + $0x38] sm:$0xff] }
  0x76   : > { %1061 = vmatmul.bf16.vlgmr.msra.gmra.mxu0 %v7934_v39  ;;  %1121 = vmatmul.bf16.vlgmr.msra.gmra.mxu3 %v7938_v40 }
  0x77   : > { %7279 = vmatpush.bf16.msrb.mxu3 %v7864_v1  ;;  %1553 = vmatpush.bf16.msrb.mxu0 %v7069_v38  ;;  %v7075_v1 = vld [vmem:[#allocation7 + $0xa8] sm:$0xff] }
  0x78   : > { %1150 = vmatmul.bf16.vlgmr.msra.gmra.mxu1 %v7887_v13  ;;  %1239 = vmatmul.bf16.vlgmr.msra.gmra.mxu2 %v7950_v43 }
  0x79   : > { %1642 = vmatpush.bf16.msrb.mxu1 %v7077_v44  ;;  %v8042_v44 = vsel %vm7924_vm4, 0, %v790_v36  ;;  %v729_v36 = vshrl.u32 %v8100_v30, 16 }
  0x7a   : > { %10437 = vst [vmem:[#allocation23_spill] sm:$0xff] %v8042_v44 }
  0x7b   : > { %7280 = vmatpush.bf16.msrb.mxu3 %v7870_v4  ;;  %1554 = vmatpush.bf16.msrb.mxu0 %v7068_v45  ;;  %v696_v4 = vrot.slane %v694_v62, 7  ;;  %v8045_v45 = vld [vmem:[%s7843_s29 + $0x20] sm:$0xff] }
  0x7c   : > { %v711_v48 = vshll.u32 %v8045_v45, 16 }
  0x7d   : > { %1643 = vmatpush.bf16.msrb.mxu1 %v7076_v49 }
  0x7e   : > { %v834_v50 = vrot.slane %v711_v48, 1 }
  0x7f   : > { %7281 = vmatpush.bf16.msrb.mxu3 %v7876_v7  ;;  %1555 = vmatpush.bf16.msrb.mxu0 %v7067_v0  ;;  %v781_v7 = vshll.u32 %v7980_v60, 16  ;;  %v836_v0 = vrot.slane %v718_v56, 1 }
  0x81   : > { %1644 = vmatpush.bf16.msrb.mxu1 %v7075_v1  ;;  %v783_v12 = vor.u32 %v781_v7, %v780_v6  ;;  %v8083_v6 = vld [vmem:[%s7843_s29 + $0x30] sm:$0xff] }
  0x83   : > { %7282 = vmatpush.bf16.msrb.mxu3 %v7880_v10  ;;  %v699_v10 = vor.u32 %v697_v3, %v696_v4  ;;  %v8009_v18 = vsel %vm7924_vm4, 0, %v783_v12  ;;  %1556 = vmatpush.bf16.msrb.mxu0 %v7066_v25  ;;  %v725_v12 = vshll.u32 %v8083_v6, 16 }
  0x84   : > { %10436 = vst [vmem:[#allocation22_spill] sm:$0xff] %v8009_v18 }
  0x85   : > { %v8005_v17 = vsel %vm7924_vm4, 0, %v699_v10  ;;  %1645 = vmatpush.bf16.msrb.mxu1 %v7074_v46  ;;  %v722_v10 = vshrl.u32 %v8083_v6, 16  ;;  %v732_v46 = vshll.u32 %v8100_v30, 16 }
  0x86   : > { %1066 = vmatmul.bf16.gmra.mxu0 %v7970_v57  ;;  %1126 = vmatmul.bf16.gmra.mxu3 %v7974_v58  ;;  %v10445_v58 = vshrl.u32 %v8015_v22, 16 }
  0x87   : > { %7283 = vmatpush.bf16.msrb.mxu3 %v7894_v15  ;;  %v831_v15 = vor.u32 %v830_v9, %v694_v62 }
  0x88   : > { %1155 = vmatmul.bf16.gmra.mxu1 %v7941_v41  ;;  %1244 = vmatmul.bf16.gmra.mxu2 %v7984_v61 }
  0x89   : > { %v8019_v23 = vsel %vm7928_vm5, %v831_v15, 0  ;;  %v724_v15 = vrot.slane %v722_v10, 7 }
  0x8b   : > { %7284 = vmatpush.bf16.msrb.mxu3 %v7902_v20  ;;  %v8012_v20 = vld [vmem:[%s7843_s29 + $0x18] sm:$0xff]  ;;  %v727_v25 = vor.u32 %v725_v12, %v724_v15  ;;  %v7058_v15 = vld [vmem:[#allocation7 + $0x20] sm:$0xff] }
  0x8f   : > { %7285 = vmatpush.bf16.msrb.mxu3 %v7912_v27  ;;  %v704_v27 = vshll.u32 %v8012_v20, 16 }
  0x91   : > { %v832_v32 = vrot.slane %v704_v27, 1 }
  0x93   : > { %7286 = vmatpush.bf16.msrb.mxu3 %v7920_v33 }
  0x96   : > { %1071 = vmatmul.bf16.gmra.mxu0 %v8005_v17  ;;  %1131 = vmatmul.bf16.gmra.mxu3 %v8009_v18 }
  0x97   : > { %7287 = vmatpush.bf16.msra.mxu3 %v7866_v2  ;;  %v701_v2 = vshrl.u32 %v8012_v20, 16 }
  0x98   : > { %1160 = vmatmul.bf16.gmra.mxu1 %v7977_v59  ;;  %1249 = vmatmul.bf16.gmra.mxu2 %v8019_v23 }
  0x99   : > { %v703_v29 = vrot.slane %v701_v2, 7  ;;  %v833_v38 = vor.u32 %v832_v32, %v701_v2  ;;  %v838_v2 = vrot.slane %v725_v12, 1  ;;  %v7063_v12 = vld [vmem:[#allocation7 + $0x48] sm:$0xff] }
  0x9b   : > { %7288 = vmatpush.bf16.msra.mxu3 %v7872_v5  ;;  %v706_v33 = vor.u32 %v704_v27, %v703_v29  ;;  %v839_v27 = vor.u32 %v838_v2, %v722_v10  ;;  %v8097_v29 = vsel %vm7924_vm4, 0, %v727_v25  ;;  %v7071_v2 = vld [vmem:[#allocation7 + $0x88] sm:$0xff] }
  0x9d   : > { %v8038_v5 = vsel %vm7924_vm4, 0, %v706_v33  ;;  %v8104_v32 = vsel %vm7928_vm5, %v839_v27, 0  ;;  %v7064_v33 = vld [vmem:[#allocation7 + $0x50] sm:$0xff] }
  0x9f   : > { %7289 = vmatpush.bf16.msra.mxu3 %v7878_v8  ;;  %v8049_v8 = vsel %vm7928_vm5, %v833_v38, 0  ;;  %v7061_v38 = vld [vmem:[#allocation7 + $0x38] sm:$0xff] }
  0xa3   : > { %7290 = vmatpush.bf16.msra.mxu3 %v7884_v11  ;;  %v708_v11 = vshrl.u32 %v8045_v45, 16 }
  0xa5   : > { %v710_v49 = vrot.slane %v708_v11, 7  ;;  %v835_v51 = vor.u32 %v834_v50, %v708_v11  ;;  %v7072_v11 = vld [vmem:[#allocation7 + $0x90] sm:$0xff] }
  0xa6   : > { %1076 = vmatmul.bf16.gmra.mxu0 %v8038_v5  ;;  %1136 = vmatmul.bf16.gmra.mxu3 %v8042_v44  ;;  %v7060_v50 = vld [vmem:[#allocation7 + $0x30] sm:$0xff] }
  0xa7   : > { %7291 = vmatpush.bf16.msra.mxu3 %v7896_v16  ;;  %v713_v16 = vor.u32 %v711_v48, %v710_v49  ;;  %v8070_v55 = vsel %vm7928_vm5, %v835_v51, 0  ;;  %v731_v48 = vrot.slane %v729_v36, 7  ;;  %v840_v49 = vrot.slane %v732_v46, 1 }
  0xa8   : > { %1165 = vmatmul.bf16.gmra.mxu1 %v8012_v20  ;;  %1254 = vmatmul.bf16.gmra.mxu2 %v8049_v8 }
  0xa9   : > { %v8063_v53 = vsel %vm7924_vm4, 0, %v713_v16  ;;  %v734_v16 = vor.u32 %v732_v46, %v731_v48  ;;  %v841_v51 = vor.u32 %v840_v49, %v729_v36  ;;  %v7109_v48 = vld [vmem:[#allocation7 + $0x1b8] sm:$0xff] }
  0xaa   : > { %1875 = vmatpush.bf16.msrb.mxu2 %v7109_v48 }
  0xab   : > { %7292 = vmatpush.bf16.msra.mxu3 %v7904_v21  ;;  %v715_v21 = vshrl.u32 %v8066_v54, 16 }
  0xad   : > { %v717_v62 = vrot.slane %v715_v21, 7  ;;  %v837_v3 = vor.u32 %v836_v0, %v715_v21  ;;  %v8114_v21 = vsel %vm7924_vm4, 0, %v734_v16 }
  0xaf   : > { %7293 = vmatpush.bf16.msra.mxu3 %v7914_v28  ;;  %v7065_v28 = vld [vmem:[#allocation7 + $0x58] sm:$0xff]  ;;  %v720_v1 = vor.u32 %v718_v56, %v717_v62  ;;  %v8087_v9 = vsel %vm7928_vm5, %v837_v3, 0  ;;  %v7059_v62 = vld [vmem:[#allocation7 + $0x28] sm:$0xff]  ;;  %v850_v3 = vrot.slane %v767_v26, 1 }
  0xb0   : > { %1557 = vmatpush.bf16.msrb.mxu0 %v7065_v28  ;;  %v8117_v28 = vld [vmem:[%s7843_s29 + $0x40] sm:$0xff] }
  0xb1   : > { %v8080_v4 = vsel %vm7924_vm4, 0, %v720_v1  ;;  %v736_v56 = vshrl.u32 %v8117_v28, 16  ;;  %v739_v0 = vshll.u32 %v8117_v28, 16  ;;  %v851_v27 = vor.u32 %v850_v3, %v764_v19 }
  0xb3   : > { %7294 = vmatpush.bf16.msra.mxu3 %v7922_v34  ;;  %v7073_v34 = vld [vmem:[#allocation7 + $0x98] sm:$0xff]  ;;  %v738_v1 = vrot.slane %v736_v56, 7  ;;  %v842_v10 = vrot.slane %v739_v0, 1  ;;  %v8139_v26 = vsel %vm7928_vm5, %v851_v27, 0  ;;  %v7107_v27 = vld [vmem:[#allocation7 + $0x1a8] sm:$0xff] }
  0xb4   : > { %1646 = vmatpush.bf16.msrb.mxu1 %v7073_v34  ;;  %1558 = vmatpush.bf16.msrb.mxu0 %v7064_v33  ;;  %v8121_v34 = vsel %vm7928_vm5, %v841_v51, 0  ;;  %10438 = vst [vmem:[#allocation24_spill] sm:$0xff] %v8139_v26 }
  0xb5   : > { %v741_v25 = vor.u32 %v739_v0, %v738_v1  ;;  %v843_v33 = vor.u32 %v842_v10, %v736_v56  ;;  %v852_v10 = vrot.slane %v774_v52, 1 }
  0xb6   : > { %1081 = vmatmul.bf16.gmra.mxu0 %v8063_v53  ;;  %1210 = vmatmul.bf16.vlgmr.msrb.gmra.mxu3 %v7890_v14 }
  0xb7   : > { %1464 = vmatpush.bf16.msrb.mxu3 %v7061_v38  ;;  %v8135_v38 = vsel %vm7924_vm4, 0, %v741_v25  ;;  %v8146_v14 = vsel %vm7928_vm5, %v843_v33, 0  ;;  %v7056_v25 = vld [vmem:[#allocation7 + $0x10] sm:$0xff] }
  0xb8   : > { %1170 = vmatmul.bf16.gmra.mxu1 %v8045_v45  ;;  %1259 = vmatmul.bf16.gmra.mxu2 %v8070_v55 }
  0xb9   : > { %1647 = vmatpush.bf16.msrb.mxu1 %v7072_v11  ;;  %1559 = vmatpush.bf16.msrb.mxu0 %v7063_v12  ;;  %v8142_v11 = vld [vmem:[%s7843_s29 + $0x48] sm:$0xff] }
  0xba   : > { %v743_v49 = vshrl.u32 %v8142_v11, 16  ;;  %v746_v16 = vshll.u32 %v8142_v11, 16 }
  0xbb   : > { %1465 = vmatpush.bf16.msrb.mxu3 %v7060_v50  ;;  %v7057_v50 = vld [vmem:[#allocation7 + $0x18] sm:$0xff] }
  0xbc   : > { %v745_v3 = vrot.slane %v743_v49, 7 }
  0xbd   : > { %1648 = vmatpush.bf16.msrb.mxu1 %v7071_v2 }
  0xbe   : > { %v748_v33 = vor.u32 %v746_v16, %v745_v3  ;;  %v7062_v3 = vld [vmem:[#allocation7 + $0x40] sm:$0xff] }
  0xbf   : > { %1466 = vmatpush.bf16.msrb.mxu3 %v7059_v62  ;;  %v7108_v62 = vld [vmem:[#allocation7 + $0x1b0] sm:$0xff]  ;;  %1560 = vmatpush.bf16.msrb.mxu0 %v7062_v3  ;;  %v7054_v3 = vld [vmem:[#allocation7] sm:$0xff] }
  0xc0   : > { %1876 = vmatpush.bf16.msrb.mxu2 %v7108_v62  ;;  %v8168_v62 = vsel %vm7924_vm4, 0, %v748_v33 }
  0xc3   : > { %1467 = vmatpush.bf16.msrb.mxu3 %v7058_v15  ;;  %v844_v15 = vrot.slane %v746_v16, 1 }
  0xc4   : > { %1877 = vmatpush.bf16.msrb.mxu2 %v7107_v27 }
  0xc6   : > { %1086 = vmatmul.bf16.gmra.mxu0 %v8080_v4  ;;  %1215 = vmatmul.bf16.gmra.mxu3 %v7944_v42  ;;  %v8175_v42 = vld [vmem:[%s7843_s29 + $0x50] sm:$0xff] }
  0xc7   : > { %1468 = vmatpush.bf16.msrb.mxu3 %v7057_v50  ;;  %v7106_v50 = vld [vmem:[#allocation7 + $0x1a0] sm:$0xff]  ;;  %10440 = vst [vmem:[#allocation26_spill] sm:$0xff] %v8175_v42 }
  0xc8   : > { %1175 = vmatmul.bf16.gmra.mxu1 %v8066_v54  ;;  %1264 = vmatmul.bf16.gmra.mxu2 %v8087_v9 }
  0xc9   : > { %1878 = vmatpush.bf16.msrb.mxu2 %v7106_v50 }
  0xcb   : > { %1469 = vmatpush.bf16.msrb.mxu3 %v7056_v25  ;;  %v753_v25 = vshll.u32 %v8175_v42, 16 }
  0xcd   : > { %v846_v24 = vrot.slane %v753_v25, 1 }
  0xd6   : > { %1091 = vmatmul.bf16.gmra.mxu0 %v8097_v29  ;;  %1220 = vmatmul.bf16.gmra.mxu3 %v7980_v60 }
  0xd8   : > { %1180 = vmatmul.bf16.gmra.mxu1 %v8083_v6  ;;  %1269 = vmatmul.bf16.gmra.mxu2 %v8104_v32 }
  0xe6   : > { %1096 = vmatmul.bf16.gmra.mxu0 %v8114_v21  ;;  %1225 = vmatmul.bf16.gmra.mxu3 %v8015_v22 }
  0xe8   : > { %1185 = vmatmul.bf16.gmra.mxu1 %v8100_v30  ;;  %1274 = vmatmul.bf16.gmra.mxu2 %v8121_v34 }
  0xf3   : > { %v1062_v36 = vpop.f32.mrf.mxu0 }
  0xf5   : > { %v1151_v46 = vpop.f32.mrf.mxu1 }
  0xf6   : > { %v1152_v19 = vadd.f32 %v1151_v46, %v1062_v36  ;;  %1101 = vmatmul.bf16.gmra.mxu0 %v8135_v38  ;;  %1299 = vmatmul.bf16.vlgmr.msra.gmra.mxu3 %v8139_v26  ;;  %v853_v36 = vor.u32 %v852_v10, %v771_v47  ;;  %v845_v46 = vor.u32 %v844_v15, %v743_v49  ;;  %v7105_v10 = vld [vmem:[#allocation7 + $0x198] sm:$0xff]  ;;  %v7055_v15 = vld [vmem:[#allocation7 + $0x8] sm:$0xff] }
  0xf7   : > { %1879 = vmatpush.bf16.msrb.mxu2 %v7105_v10  ;;  %1470 = vmatpush.bf16.msrb.mxu3 %v7055_v15  ;;  %v7103_v10 = vld [vmem:[#allocation7 + $0x188] sm:$0xff]  ;;  %v10441_v15 = vshrl.u32 %v7980_v60, 16  ;;  %v8208_v60 = vld [vmem:[%s7843_s29 + $0x58] sm:$0xff] }
  0xf8   : > { %1190 = vmatmul.bf16.gmra.mxu1 %v8117_v28  ;;  %1279 = vmatmul.bf16.gmra.mxu2 %v8146_v14  ;;  %v8172_v16 = vsel %vm7928_vm5, %v853_v36, 0  ;;  %v8179_v49 = vsel %vm7928_vm5, %v845_v46, 0  ;;  %v7104_v36 = vld [vmem:[#allocation7 + $0x190] sm:$0xff] }
  0xf9   : > { %v8154_v51 = vpop.f32.mrf.mxu3  ;;  %10439 = vst [vmem:[#allocation25_spill] sm:$0xff] %v8172_v16 }
  0xfb   : > { %v1240_v56 = vpop.f32.mrf.mxu2  ;;  %v1064_v1 = vpop.f32.mrf.mxu0  ;;  %1880 = vmatpush.bf16.msrb.mxu2 %v7104_v36  ;;  %1471 = vmatpush.bf16.msrb.mxu3 %v7054_v3 }
  0xfc   : > { %v8156_v0 = vadd.f32 %v1240_v56, %v1152_v19 }
  0xfd   : > { %v1153_v12 = vpop.f32.mrf.mxu1 }
  0xfe   : > { %v1154_v2 = vadd.f32 %v1153_v12, %v1064_v1  ;;  %v750_v12 = vshrl.u32 %v8175_v42, 16 }
  0xff   : > { %1881 = vmatpush.bf16.msrb.mxu2 %v7103_v10  ;;  %v10444_v10 = vshll.u32 %v8015_v22, 16 }
 0x100   : > { %v752_v50 = vrot.slane %v750_v12, 7  ;;  %v847_v44 = vor.u32 %v846_v24, %v750_v12 }
 0x101   : > { %v8162_v19 = vpop.f32.mrf.mxu3 }
 0x102   : > { %v755_v63 = vor.u32 %v753_v25, %v752_v50  ;;  %v8212_v24 = vsel %vm7928_vm5, %v847_v44, 0  ;;  %v760_v50 = vshll.u32 %v8208_v60, 16 }
 0x103   : > { %v1242_v48 = vpop.f32.mrf.mxu2  ;;  %v1067_v52 = vpop.f32.mrf.mxu0  ;;  %10443 = vst [vmem:[#allocation28_spill] sm:$0xff] %v8212_v24 }
 0x104   : > { %v8164_v56 = vadd.f32 %v1242_v48, %v1154_v2  ;;  %v7070_v2 = vld [vmem:[#allocation7 + $0x80] sm:$0xff]  ;;  %v8201_v36 = vsel %vm7924_vm4, 0, %v755_v63  ;;  %v757_v63 = vshrl.u32 %v8208_v60, 16 }
 0x105   : > { %v1156_v47 = vpop.f32.mrf.mxu1  ;;  %1649 = vmatpush.bf16.msrb.mxu1 %v7070_v2 }
 0x106   : > { %v1157_v1 = vadd.f32 %v1156_v47, %v1067_v52  ;;  %1106 = vmatmul.bf16.gmra.mxu0 %v8168_v62  ;;  %1304 = vmatmul.bf16.gmra.mxu3 %v8172_v16  ;;  %v854_v52 = vrot.slane %v781_v7, 1  ;;  %v7102_v16 = vld [vmem:[#allocation7 + $0x180] sm:$0xff]  ;;  %v759_v3 = vrot.slane %v757_v63, 7 }
 0x107   : > { %1882 = vmatpush.bf16.msrb.mxu2 %v7102_v16 }
 0x108   : > { %1195 = vmatmul.bf16.gmra.mxu1 %v8142_v11  ;;  %1284 = vmatmul.bf16.gmra.mxu2 %v8179_v49  ;;  %v855_v2 = vor.u32 %v854_v52, %v10441_v15  ;;  %v856_v15 = vrot.slane %v10444_v10, 1  ;;  %v762_v26 = vor.u32 %v760_v50, %v759_v3 }
 0x109   : > { %v8187_v27 = vpop.f32.mrf.mxu3 }
 0x10a   : > { %v8205_v25 = vsel %vm7928_vm5, %v855_v2, 0  ;;  %v857_v40 = vor.u32 %v856_v15, %v10445_v58  ;;  %v8234_v10 = vsel %vm7924_vm4, 0, %v762_v26 }
 0x10b   : > { %v1245_v33 = vpop.f32.mrf.mxu2  ;;  %v1069_v48 = vpop.f32.mrf.mxu0  ;;  %10442 = vst [vmem:[#allocation27_spill] sm:$0xff] %v8205_v25 }
 0x10c   : > { %v8189_v46 = vadd.f32 %v1245_v33, %v1157_v1 }
 0x10d   : > { %v1158_v47 = vpop.f32.mrf.mxu1 }
 0x10e   : > { %v1159_v31 = vadd.f32 %v1158_v47, %v1069_v48 }
 0x111   : > { %v8195_v1 = vpop.f32.mrf.mxu3 }
 0x113   : > { %v1247_v33 = vpop.f32.mrf.mxu2  ;;  %v1072_v7 = vpop.f32.mrf.mxu0 }
 0x114   : > { %v8197_v18 = vadd.f32 %v1247_v33, %v1159_v31  ;;  %v7117_v31 = vld [vmem:[#allocation7 + $0x1f8] sm:$0xff]  ;;  %v848_v33 = vrot.slane %v760_v50, 1 }
 0x115   : > { %v1161_v48 = vpop.f32.mrf.mxu1  ;;  %1964 = vmatpush.bf16.msra.mxu3 %v7117_v31 }
 0x116   : > { %v1162_v12 = vadd.f32 %v1161_v48, %v1072_v7  ;;  %1111 = vmatmul.bf16.gmra.mxu0 %v8201_v36  ;;  %1309 = vmatmul.bf16.gmra.mxu3 %v8205_v25  ;;  %v7125_v48 = vld [vmem:[#allocation7 + $0x238] sm:$0xff]  ;;  %v849_v31 = vor.u32 %v848_v33, %v757_v63 }
 0x117   : > { %v7133_v25 = vld [vmem:[#allocation8 + $0x38] sm:$0xff]  ;;  %2053 = vmatpush.bf16.msra.mxu0 %v7125_v48 }
 0x118   : > { %1200 = vmatmul.bf16.gmra.mxu1 %v8175_v42  ;;  %1289 = vmatmul.bf16.gmra.mxu2 %v8212_v24  ;;  %v8242_v58 = vsel %vm7928_vm5, %v849_v31, 0 }
 0x119   : > { %v8220_v52 = vpop.f32.mrf.mxu3  ;;  %2766 = vmatpush.bf16.msra.mxu1 %v7133_v25  ;;  %10447 = vst [vmem:[#allocation30_spill] sm:$0xff] %v8242_v58 }
 0x11b   : > { %v1250_v44 = vpop.f32.mrf.mxu2  ;;  %v1074_v16 = vpop.f32.mrf.mxu0 }
 0x11c   : > { %v8222_v47 = vadd.f32 %v1250_v44, %v1162_v12 }
 0x11d   : > { %v1163_v2 = vpop.f32.mrf.mxu1  ;;  %2767 = vmatpush.bf16.msra.mxu1 %v7132_v37 }
 0x11e   : > { %v1164_v7 = vadd.f32 %v1163_v2, %v1074_v16  ;;  %v8238_v16 = vsel %vm7928_vm5, %v857_v40, 0 }
 0x11f   : > { %10446 = vst [vmem:[#allocation29_spill] sm:$0xff] %v8238_v16 }
 0x121   : > { %v8228_v24 = vpop.f32.mrf.mxu3 }
 0x123   : > { %v1252_v12 = vpop.f32.mrf.mxu2  ;;  %v1077_v42 = vpop.f32.mrf.mxu0 }
 0x124   : > { %v8230_v44 = vadd.f32 %v1252_v12, %v1164_v7  ;;  %v10317_v12 = vmov 0  }
 0x125   : > { %v1166_v50 = vpop.f32.mrf.mxu1 }
 0x126   : > { %v1167_v22 = vadd.f32 %v1166_v50, %v1077_v42  ;;  %1116 = vmatmul.bf16.gmra.mxu0 %v8234_v10  ;;  %1314 = vmatmul.bf16.gmra.mxu3 %v8238_v16  ;;  %v7116_v50 = vld [vmem:[#allocation7 + $0x1f0] sm:$0xff] }
 0x127   : > { %1965 = vmatpush.bf16.msra.mxu3 %v7116_v50 }
 0x128   : > { %1205 = vmatmul.bf16.gmra.mxu1 %v8208_v60  ;;  %1294 = vmatmul.bf16.gmra.mxu2 %v8242_v58 }
 0x129   : > { %v8248_v26 = vpop.f32.mrf.mxu3 }
 0x12b   : > { %v1255_v25 = vpop.f32.mrf.mxu2  ;;  %v1079_v40 = vpop.f32.mrf.mxu0 }
 0x12c   : > { %v8250_v63 = vadd.f32 %v1255_v25, %v1167_v22 }
 0x12d   : > { %v1168_v3 = vpop.f32.mrf.mxu1 }
 0x12e   : > { %v1169_v15 = vadd.f32 %v1168_v3, %v1079_v40 }
 0x131   : > { %v8252_v2 = vpop.f32.mrf.mxu3 }
 0x133   : > { %v1257_v33 = vpop.f32.mrf.mxu2  ;;  %v1082_v7 = vpop.f32.mrf.mxu0 }
 0x134   : > { %v8254_v42 = vadd.f32 %v1257_v33, %v1169_v15 }
 0x135   : > { %v1171_v48 = vpop.f32.mrf.mxu1 }
 0x136   : > { %v1172_v31 = vadd.f32 %v1171_v48, %v1082_v7  ;;  %1472 = vmatmul.bf16.vlgmr.msrb.gmra.mxu3 %v10317_v12  ;;  %1561 = vmatmul.bf16.vlgmr.msrb.gmra.mxu0 %v10317_v12  ;;  %v7124_v48 = vld [vmem:[#allocation7 + $0x230] sm:$0xff] }
 0x137   : > { %2054 = vmatpush.bf16.msra.mxu0 %v7124_v48 }
 0x138   : > { %1650 = vmatmul.bf16.vlgmr.msrb.gmra.mxu1 %v10317_v12  ;;  %1883 = vmatmul.bf16.vlgmr.msrb.gmra.mxu2 %v7970_v57 }
 0x139   : > { %v1211_v22 = vpop.f32.mrf.mxu3 }
 0x13a   : > { %v8261_v25 = vadd.f32 %v1211_v22, %v8154_v51 }
 0x13b   : > { %v1260_v40 = vpop.f32.mrf.mxu2  ;;  %v1084_v15 = vpop.f32.mrf.mxu0 }
 0x13c   : > { %v8263_v3 = vadd.f32 %v1260_v40, %v1172_v31 }
 0x13d   : > { %v1173_v33 = vpop.f32.mrf.mxu1 }
 0x13e   : > { %v1174_v7 = vadd.f32 %v1173_v33, %v1084_v15 }
 0x141   : > { %v1213_v16 = vpop.f32.mrf.mxu3 }
 0x142   : > { %v8266_v12 = vadd.f32 %v1213_v16, %v8162_v19 }
 0x143   : > { %v1262_v35 = vpop.f32.mrf.mxu2  ;;  %v1087_v50 = vpop.f32.mrf.mxu0 }
 0x144   : > { %v8268_v58 = vadd.f32 %v1262_v35, %v1174_v7 }
 0x145   : > { %v1176_v51 = vpop.f32.mrf.mxu1 }
 0x146   : > { %v1177_v22 = vadd.f32 %v1176_v51, %v1087_v50  ;;  %1477 = vmatmul.bf16.gmra.mxu3 %v7934_v39  ;;  %1566 = vmatmul.bf16.gmra.mxu0 %v7887_v13 }
 0x148   : > { %1655 = vmatmul.bf16.gmra.mxu1 %v7950_v43  ;;  %1888 = vmatmul.bf16.gmra.mxu2 %v8005_v17 }
 0x149   : > { %v1216_v31 = vpop.f32.mrf.mxu3 }
 0x14a   : > { %v8275_v37 = vadd.f32 %v1216_v31, %v8187_v27  ;;  %v7115_v27 = vld [vmem:[#allocation7 + $0x1e8] sm:$0xff] }
 0x14b   : > { %v1265_v19 = vpop.f32.mrf.mxu2  ;;  %v1089_v35 = vpop.f32.mrf.mxu0  ;;  %1966 = vmatpush.bf16.msra.mxu3 %v7115_v27 }
 0x14c   : > { %v8277_v16 = vadd.f32 %v1265_v19, %v1177_v22 }
 0x14d   : > { %v1178_v40 = vpop.f32.mrf.mxu1 }
 0x14e   : > { %v1179_v15 = vadd.f32 %v1178_v40, %v1089_v35 }
 0x151   : > { %v1218_v33 = vpop.f32.mrf.mxu3 }
 0x152   : > { %v8280_v7 = vadd.f32 %v1218_v33, %v8195_v1 }
 0x153   : > { %v1267_v39 = vpop.f32.mrf.mxu2  ;;  %v1092_v43 = vpop.f32.mrf.mxu0 }
 0x154   : > { %v8282_v13 = vadd.f32 %v1267_v39, %v1179_v15  ;;  %v7123_v15 = vld [vmem:[#allocation7 + $0x228] sm:$0xff] }
 0x155   : > { %v1181_v48 = vpop.f32.mrf.mxu1  ;;  %2055 = vmatpush.bf16.msra.mxu0 %v7123_v15 }
 0x156   : > { %v1182_v50 = vadd.f32 %v1181_v48, %v1092_v43  ;;  %1482 = vmatmul.bf16.gmra.mxu3 %v7970_v57  ;;  %1571 = vmatmul.bf16.gmra.mxu0 %v7941_v41  ;;  %v7131_v57 = vld [vmem:[#allocation8 + $0x28] sm:$0xff] }
 0x157   : > { %2768 = vmatpush.bf16.msra.mxu1 %v7131_v57 }
 0x158   : > { %1660 = vmatmul.bf16.gmra.mxu1 %v7984_v61  ;;  %1893 = vmatmul.bf16.gmra.mxu2 %v8038_v5 }
 0x159   : > { %v1221_v51 = vpop.f32.mrf.mxu3 }
 0x15a   : > { %v8289_v1 = vadd.f32 %v1221_v51, %v8220_v52 }
 0x15b   : > { %v1270_v22 = vpop.f32.mrf.mxu2  ;;  %v1094_v19 = vpop.f32.mrf.mxu0 }
 0x15c   : > { %v8291_v31 = vadd.f32 %v1270_v22, %v1182_v50 }
 0x15d   : > { %v1183_v35 = vpop.f32.mrf.mxu1 }
 0x15e   : > { %v1184_v40 = vadd.f32 %v1183_v35, %v1094_v19 }
 0x161   : > { %v1223_v41 = vpop.f32.mrf.mxu3 }
 0x162   : > { %v8294_v33 = vadd.f32 %v1223_v41, %v8228_v24 }
 0x163   : > { %v1272_v39 = vpop.f32.mrf.mxu2  ;;  %v1097_v48 = vpop.f32.mrf.mxu0 }
 0x164   : > { %v8296_v43 = vadd.f32 %v1272_v39, %v1184_v40 }
 0x165   : > { %v1186_v52 = vpop.f32.mrf.mxu1 }
 0x166   : > { %v1187_v27 = vadd.f32 %v1186_v52, %v1097_v48  ;;  %1487 = vmatmul.bf16.gmra.mxu3 %v8005_v17  ;;  %1576 = vmatmul.bf16.gmra.mxu0 %v7977_v59 }
 0x168   : > { %1665 = vmatmul.bf16.gmra.mxu1 %v8019_v23  ;;  %1898 = vmatmul.bf16.gmra.mxu2 %v8063_v53 }
 0x169   : > { %v1226_v50 = vpop.f32.mrf.mxu3 }
 0x16a   : > { %v8303_v51 = vadd.f32 %v1226_v50, %v8248_v26  ;;  %v7114_v26 = vld [vmem:[#allocation7 + $0x1e0] sm:$0xff] }
 0x16b   : > { %v1275_v24 = vpop.f32.mrf.mxu2  ;;  %v1099_v19 = vpop.f32.mrf.mxu0  ;;  %1967 = vmatpush.bf16.msra.mxu3 %v7114_v26 }
 0x16c   : > { %v8305_v22 = vadd.f32 %v1275_v24, %v1187_v27 }
 0x16d   : > { %v1188_v35 = vpop.f32.mrf.mxu1 }
 0x16e   : > { %v1189_v40 = vadd.f32 %v1188_v35, %v1099_v19 }
 0x171   : > { %v1228_v15 = vpop.f32.mrf.mxu3 }
 0x172   : > { %v8308_v57 = vadd.f32 %v1228_v15, %v8252_v2 }
 0x173   : > { %v1277_v17 = vpop.f32.mrf.mxu2  ;;  %v1102_v41 = vpop.f32.mrf.mxu0 }
 0x174   : > { %v8310_v59 = vadd.f32 %v1277_v17, %v1189_v40  ;;  %v7122_v40 = vld [vmem:[#allocation7 + $0x220] sm:$0xff] }
 0x175   : > { %v1191_v39 = vpop.f32.mrf.mxu1  ;;  %2056 = vmatpush.bf16.msra.mxu0 %v7122_v40 }
 0x176   : > { %v1192_v48 = vadd.f32 %v1191_v39, %v1102_v41  ;;  %1492 = vmatmul.bf16.gmra.mxu3 %v8038_v5  ;;  %1581 = vmatmul.bf16.gmra.mxu0 %v8012_v20  ;;  %v7130_v5 = vld [vmem:[#allocation8 + $0x20] sm:$0xff] }
 0x177   : > { %2769 = vmatpush.bf16.msra.mxu1 %v7130_v5 }
 0x178   : > { %1670 = vmatmul.bf16.gmra.mxu1 %v8049_v8  ;;  %1903 = vmatmul.bf16.gmra.mxu2 %v8080_v4 }
 0x179   : > { %v1300_v52 = vpop.f32.mrf.mxu3 }
 0x17a   : > { %v8317_v2 = vadd.f32 %v1300_v52, %v8261_v25 }
 0x17b   : > { %v1280_v27 = vpop.f32.mrf.mxu2  ;;  %v1104_v24 = vpop.f32.mrf.mxu0 }
 0x17c   : > { %v8319_v50 = vadd.f32 %v1280_v27, %v1192_v48 }
 0x17d   : > { %v1193_v19 = vpop.f32.mrf.mxu1 }
 0x17e   : > { %v1194_v35 = vadd.f32 %v1193_v19, %v1104_v24 }
 0x181   : > { %v1302_v20 = vpop.f32.mrf.mxu3 }
 0x182   : > { %v8322_v17 = vadd.f32 %v1302_v20, %v8266_v12 }
 0x183   : > { %v1282_v15 = vpop.f32.mrf.mxu2  ;;  %v1107_v39 = vpop.f32.mrf.mxu0 }
 0x184   : > { %v8324_v41 = vadd.f32 %v1282_v15, %v1194_v35 }
 0x185   : > { %v1196_v26 = vpop.f32.mrf.mxu1 }
 0x186   : > { %v1197_v25 = vadd.f32 %v1196_v26, %v1107_v39  ;;  %1497 = vmatmul.bf16.gmra.mxu3 %v8063_v53  ;;  %1586 = vmatmul.bf16.gmra.mxu0 %v8045_v45 }
 0x188   : > { %1675 = vmatmul.bf16.gmra.mxu1 %v8070_v55  ;;  %1908 = vmatmul.bf16.gmra.mxu2 %v8097_v29 }
 0x189   : > { %v1305_v48 = vpop.f32.mrf.mxu3 }
 0x18a   : > { %v8331_v27 = vadd.f32 %v1305_v48, %v8275_v37  ;;  %v7113_v37 = vld [vmem:[#allocation7 + $0x1d8] sm:$0xff] }
 0x18b   : > { %v1285_v52 = vpop.f32.mrf.mxu2  ;;  %v1109_v24 = vpop.f32.mrf.mxu0  ;;  %1968 = vmatpush.bf16.msra.mxu3 %v7113_v37 }
 0x18c   : > { %v8333_v12 = vadd.f32 %v1285_v52, %v1197_v25 }
 0x18d   : > { %v1198_v19 = vpop.f32.mrf.mxu1 }
 0x18e   : > { %v1199_v35 = vadd.f32 %v1198_v19, %v1109_v24 }
 0x191   : > { %v1307_v40 = vpop.f32.mrf.mxu3 }
 0x192   : > { %v8336_v53 = vadd.f32 %v1307_v40, %v8280_v7 }
 0x193   : > { %v1287_v5 = vpop.f32.mrf.mxu2  ;;  %v1112_v20 = vpop.f32.mrf.mxu0 }
 0x194   : > { %v8338_v45 = vadd.f32 %v1287_v5, %v1199_v35  ;;  %v7121_v35 = vld [vmem:[#allocation7 + $0x218] sm:$0xff] }
 0x195   : > { %v1201_v15 = vpop.f32.mrf.mxu1  ;;  %2057 = vmatpush.bf16.msra.mxu0 %v7121_v35 }
 0x196   : > { %v1202_v39 = vadd.f32 %v1201_v15, %v1112_v20  ;;  %1502 = vmatmul.bf16.gmra.mxu3 %v8080_v4  ;;  %1591 = vmatmul.bf16.gmra.mxu0 %v8066_v54  ;;  %v7129_v4 = vld [vmem:[#allocation8 + $0x18] sm:$0xff] }
 0x197   : > { %2770 = vmatpush.bf16.msra.mxu1 %v7129_v4 }
 0x198   : > { %1680 = vmatmul.bf16.gmra.mxu1 %v8087_v9  ;;  %1913 = vmatmul.bf16.gmra.mxu2 %v8114_v21 }
 0x199   : > { %v1310_v26 = vpop.f32.mrf.mxu3 }
 0x19a   : > { %v8345_v7 = vadd.f32 %v1310_v26, %v8289_v1 }
 0x19b   : > { %v1290_v25 = vpop.f32.mrf.mxu2  ;;  %v1114_v52 = vpop.f32.mrf.mxu0 }
 0x19c   : > { %v8347_v48 = vadd.f32 %v1290_v25, %v1202_v39 }
 0x19d   : > { %v1203_v24 = vpop.f32.mrf.mxu1 }
 0x19e   : > { %v1204_v19 = vadd.f32 %v1203_v24, %v1114_v52 }
 0x1a1   : > { %v1312_v54 = vpop.f32.mrf.mxu3 }
 0x1a2   : > { %v8350_v5 = vadd.f32 %v1312_v54, %v8294_v33 }
 0x1a3   : > { %v1292_v40 = vpop.f32.mrf.mxu2  ;;  %v1117_v15 = vpop.f32.mrf.mxu0 }
 0x1a4   : > { %v8352_v20 = vadd.f32 %v1292_v40, %v1204_v19 }
 0x1a5   : > { %v1206_v37 = vpop.f32.mrf.mxu1 }
 0x1a6   : > { %v1207_v1 = vadd.f32 %v1206_v37, %v1117_v15  ;;  %1507 = vmatmul.bf16.gmra.mxu3 %v8097_v29  ;;  %1596 = vmatmul.bf16.gmra.mxu0 %v8083_v6 }
 0x1a8   : > { %1685 = vmatmul.bf16.gmra.mxu1 %v8104_v32  ;;  %1918 = vmatmul.bf16.gmra.mxu2 %v8135_v38 }
 0x1a9   : > { %v1315_v39 = vpop.f32.mrf.mxu3 }
 0x1aa   : > { %v8359_v25 = vadd.f32 %v1315_v39, %v8303_v51  ;;  %v7112_v51 = vld [vmem:[#allocation7 + $0x1d0] sm:$0xff] }
 0x1ab   : > { %v1295_v26 = vpop.f32.mrf.mxu2  ;;  %v1119_v52 = vpop.f32.mrf.mxu0  ;;  %1969 = vmatpush.bf16.msra.mxu3 %v7112_v51 }
 0x1ac   : > { %v8361_v33 = vadd.f32 %v1295_v26, %v1207_v1 }
 0x1ad   : > { %v1208_v24 = vpop.f32.mrf.mxu1 }
 0x1ae   : > { %v1209_v19 = vadd.f32 %v1208_v24, %v1119_v52  ;;  %v7141_v24 = vld [vmem:[#allocation8 + $0x78] sm:$0xff] }
 0x1af   : > { %2855 = vmatpush.bf16.msra.mxu2 %v7141_v24 }
 0x1b1   : > { %v1317_v35 = vpop.f32.mrf.mxu3 }
 0x1b2   : > { %v8364_v29 = vadd.f32 %v1317_v35, %v8308_v57 }
 0x1b3   : > { %v1297_v4 = vpop.f32.mrf.mxu2  ;;  %v1562_v54 = vpop.f32.mrf.mxu0 }
 0x1b4   : > { %v8366_v6 = vadd.f32 %v1297_v4, %v1209_v19  ;;  %v7128_v19 = vld [vmem:[#allocation8 + $0x10] sm:$0xff] }
 0x1b5   : > { %v1651_v40 = vpop.f32.mrf.mxu1  ;;  %2771 = vmatpush.bf16.msra.mxu1 %v7128_v19 }
 0x1b6   : > { %1512 = vmatmul.bf16.gmra.mxu3 %v8114_v21  ;;  %1601 = vmatmul.bf16.gmra.mxu0 %v8100_v30  ;;  %v7120_v21 = vld [vmem:[#allocation7 + $0x210] sm:$0xff] }
 0x1b7   : > { %2058 = vmatpush.bf16.msra.mxu0 %v7120_v21 }
 0x1b8   : > { %1690 = vmatmul.bf16.gmra.mxu1 %v8121_v34  ;;  %1923 = vmatmul.bf16.gmra.mxu2 %v8168_v62 }
 0x1b9   : > { %v1473_v15 = vpop.f32.mrf.mxu3 }
 0x1ba   : > { %v1474_v37 = vadd.f32 %v1473_v15, %v8156_v0 }
 0x1bb   : > { %v8373_v1 = vpop.f32.mrf.mxu2  ;;  %v1564_v57 = vpop.f32.mrf.mxu0 }
 0x1bc   : > { %10448 = vst [vmem:[#allocation31_spill] sm:$0xff] %v8373_v1  ;;  %v1563_v39 = vadd.f32 %v1562_v54, %v1474_v37 }
 0x1bd   : > { %v1653_v26 = vpop.f32.mrf.mxu1 }
 0x1be   : > { %v8375_v52 = vadd.f32 %v1651_v40, %v1563_v39 }
 0x1c1   : > { %v1475_v30 = vpop.f32.mrf.mxu3 }
 0x1c2   : > { %v1476_v35 = vadd.f32 %v1475_v30, %v8164_v56 }
 0x1c3   : > { %v8378_v4 = vpop.f32.mrf.mxu2  ;;  %v1567_v51 = vpop.f32.mrf.mxu0 }
 0x1c4   : > { %v1565_v0 = vadd.f32 %v1564_v57, %v1476_v35 }
 0x1c5   : > { %v1656_v15 = vpop.f32.mrf.mxu1 }
 0x1c6   : > { %v8380_v1 = vadd.f32 %v1653_v26, %v1565_v0  ;;  %1517 = vmatmul.bf16.gmra.mxu3 %v8135_v38  ;;  %1606 = vmatmul.bf16.gmra.mxu0 %v8117_v28 }
 0x1c8   : > { %1695 = vmatmul.bf16.gmra.mxu1 %v8146_v14  ;;  %1928 = vmatmul.bf16.gmra.mxu2 %v8201_v36 }
 0x1c9   : > { %v1478_v54 = vpop.f32.mrf.mxu3 }
 0x1ca   : > { %v1479_v40 = vadd.f32 %v1478_v54, %v8189_v46  ;;  %v7111_v46 = vld [vmem:[#allocation7 + $0x1c8] sm:$0xff] }
 0x1cb   : > { %v8387_v37 = vpop.f32.mrf.mxu2  ;;  %v1569_v56 = vpop.f32.mrf.mxu0  ;;  %1970 = vmatpush.bf16.msra.mxu3 %v7111_v46 }
 0x1cc   : > { %v1568_v39 = vadd.f32 %v1567_v51, %v1479_v40 }
 0x1cd   : > { %v1658_v24 = vpop.f32.mrf.mxu1 }
 0x1ce   : > { %v8389_v57 = vadd.f32 %v1656_v15, %v1568_v39  ;;  %v7140_v39 = vld [vmem:[#allocation8 + $0x70] sm:$0xff] }
 0x1cf   : > { %2856 = vmatpush.bf16.msra.mxu2 %v7140_v39 }
 0x1d1   : > { %v1480_v26 = vpop.f32.mrf.mxu3 }
 0x1d2   : > { %v1481_v21 = vadd.f32 %v1480_v26, %v8197_v18 }
 0x1d3   : > { %v8392_v38 = vpop.f32.mrf.mxu2  ;;  %v1572_v28 = vpop.f32.mrf.mxu0 }
 0x1d4   : > { %v1570_v19 = vadd.f32 %v1569_v56, %v1481_v21 }
 0x1d5   : > { %v1661_v30 = vpop.f32.mrf.mxu1 }
 0x1d6   : > { %v8394_v35 = vadd.f32 %v1658_v24, %v1570_v19  ;;  %1522 = vmatmul.bf16.gmra.mxu3 %v8168_v62  ;;  %1611 = vmatmul.bf16.gmra.mxu0 %v8142_v11  ;;  %v7119_v62 = vld [vmem:[#allocation7 + $0x208] sm:$0xff] }
 0x1d7   : > { %v7127_v24 = vld [vmem:[#allocation8 + $0x8] sm:$0xff]  ;;  %2059 = vmatpush.bf16.msra.mxu0 %v7119_v62 }
 0x1d8   : > { %1700 = vmatmul.bf16.gmra.mxu1 %v8179_v49  ;;  %1933 = vmatmul.bf16.gmra.mxu2 %v8234_v10 }
 0x1d9   : > { %v1483_v51 = vpop.f32.mrf.mxu3  ;;  %2772 = vmatpush.bf16.msra.mxu1 %v7127_v24 }
 0x1da   : > { %v1484_v18 = vadd.f32 %v1483_v51, %v8222_v47 }
 0x1db   : > { %v8401_v0 = vpop.f32.mrf.mxu2  ;;  %v1574_v15 = vpop.f32.mrf.mxu0 }
 0x1dc   : > { %v1573_v54 = vadd.f32 %v1572_v28, %v1484_v18  ;;  %v10451_v28 = vld [vmem:[#allocation26_spill] sm:$0xff]  ;;  %v10453_v18 = vld [vmem:[#allocation20_spill] sm:$0xff] }
 0x1dd   : > { %v1663_v40 = vpop.f32.mrf.mxu1 }
 0x1de   : > { %v8403_v56 = vadd.f32 %v1661_v30, %v1573_v54  ;;  %v10452_v30 = vld [vmem:[#allocation28_spill] sm:$0xff] }
 0x1e1   : > { %v1485_v11 = vpop.f32.mrf.mxu3 }
 0x1e2   : > { %v1486_v26 = vadd.f32 %v1485_v11, %v8230_v44 }
 0x1e3   : > { %v8406_v21 = vpop.f32.mrf.mxu2  ;;  %v1577_v19 = vpop.f32.mrf.mxu0 }
 0x1e4   : > { %10449 = vst [vmem:[#allocation32_spill] sm:$0xff] %v8406_v21  ;;  %v1575_v47 = vadd.f32 %v1574_v15, %v1486_v26 }
 0x1e5   : > { %v1666_v46 = vpop.f32.mrf.mxu1 }
 0x1e6   : > { %v8408_v51 = vadd.f32 %v1663_v40, %v1575_v47  ;;  %1527 = vmatmul.bf16.gmra.mxu3 %v8201_v36  ;;  %1616 = vmatmul.bf16.gmra.mxu0 %v10451_v28 }
 0x1e8   : > { %10450 = vst [vmem:[#allocation33_spill] sm:$0xff] %v8408_v51  ;;  %1705 = vmatmul.bf16.gmra.mxu1 %v10452_v30  ;;  %1938 = vmatmul.bf16.gmra.mxu2 %v10453_v18 }
 0x1e9   : > { %v1488_v54 = vpop.f32.mrf.mxu3 }
 0x1ea   : > { %v1489_v39 = vadd.f32 %v1488_v54, %v8250_v63  ;;  %v10456_v63 = vld [vmem:[#allocation30_spill] sm:$0xff] }
 0x1eb   : > { %v8415_v62 = vpop.f32.mrf.mxu2  ;;  %v1579_v44 = vpop.f32.mrf.mxu0 }
 0x1ec   : > { %v1578_v24 = vadd.f32 %v1577_v19, %v1489_v39  ;;  %v10457_v19 = vld [vmem:[#allocation21_spill] sm:$0xff] }
 0x1ed   : > { %v1668_v11 = vpop.f32.mrf.mxu1 }
 0x1ee   : > { %v8417_v15 = vadd.f32 %v1666_v46, %v1578_v24  ;;  %v7110_v46 = vld [vmem:[#allocation7 + $0x1c0] sm:$0xff] }
 0x1ef   : > { %1971 = vmatpush.bf16.msra.mxu3 %v7110_v46 }
 0x1f1   : > { %v1490_v40 = vpop.f32.mrf.mxu3 }
 0x1f2   : > { %v1491_v26 = vadd.f32 %v1490_v40, %v8254_v42 }
 0x1f3   : > { %v8420_v36 = vpop.f32.mrf.mxu2  ;;  %v1582_v47 = vpop.f32.mrf.mxu0 }
 0x1f4   : > { %10454 = vst [vmem:[#allocation26_spill] sm:$0xff] %v8420_v36  ;;  %v1580_v28 = vadd.f32 %v1579_v44, %v1491_v26  ;;  %v7139_v26 = vld [vmem:[#allocation8 + $0x68] sm:$0xff] }
 0x1f5   : > { %v1671_v51 = vpop.f32.mrf.mxu1  ;;  %2857 = vmatpush.bf16.msra.mxu2 %v7139_v26  ;;  %v10463_v26 = vld [vmem:[#allocation22_spill] sm:$0xff] }
 0x1f6   : > { %v8422_v21 = vadd.f32 %v1668_v11, %v1580_v28  ;;  %1532 = vmatmul.bf16.gmra.mxu3 %v8234_v10  ;;  %1621 = vmatmul.bf16.gmra.mxu0 %v8208_v60  ;;  %v7118_v10 = vld [vmem:[#allocation7 + $0x200] sm:$0xff] }
 0x1f7   : > { %v7126_v60 = vld [vmem:[#allocation8] sm:$0xff]  ;;  %2060 = vmatpush.bf16.msra.mxu0 %v7118_v10 }
 0x1f8   : > { %10455 = vst [vmem:[#allocation28_spill] sm:$0xff] %v8422_v21  ;;  %1710 = vmatmul.bf16.gmra.mxu1 %v10456_v63  ;;  %1943 = vmatmul.bf16.gmra.mxu2 %v10457_v19 }
 0x1f9   : > { %v1493_v54 = vpop.f32.mrf.mxu3  ;;  %2773 = vmatpush.bf16.msra.mxu1 %v7126_v60 }
 0x1fa   : > { %v1494_v42 = vadd.f32 %v1493_v54, %v8263_v3  ;;  %v7138_v3 = vld [vmem:[#allocation8 + $0x60] sm:$0xff] }
 0x1fb   : > { %v8429_v39 = vpop.f32.mrf.mxu2  ;;  %v1584_v24 = vpop.f32.mrf.mxu0  ;;  %2858 = vmatpush.bf16.msra.mxu2 %v7138_v3 }
 0x1fc   : > { %10458 = vst [vmem:[#allocation20_spill] sm:$0xff] %v8429_v39  ;;  %v1583_v44 = vadd.f32 %v1582_v47, %v1494_v42  ;;  %v7137_v42 = vld [vmem:[#allocation8 + $0x58] sm:$0xff] }
 0x1fd   : > { %v1673_v40 = vpop.f32.mrf.mxu1 }
 0x1fe   : > { %v8431_v11 = vadd.f32 %v1671_v51, %v1583_v44  ;;  %v8440_v51 = vld [vmem:[%s7843_s29 + $0x60] sm:$0xff]  ;;  %v10462_v44 = vld [vmem:[#allocation24_spill] sm:$0xff] }
 0x1ff   : > { %2859 = vmatpush.bf16.msra.mxu2 %v7137_v42  ;;  %v7134_v42 = vld [vmem:[#allocation8 + $0x40] sm:$0xff] }
 0x200   : > { %10459 = vst [vmem:[#allocation30_spill] sm:$0xff] %v8431_v11 }
 0x201   : > { %v1495_v28 = vpop.f32.mrf.mxu3 }
 0x202   : > { %v1496_v21 = vadd.f32 %v1495_v28, %v8268_v58  ;;  %v7135_v28 = vld [vmem:[#allocation8 + $0x48] sm:$0xff] }
 0x203   : > { %v8434_v46 = vpop.f32.mrf.mxu2  ;;  %v1587_v54 = vpop.f32.mrf.mxu0 }
 0x204   : > { %10460 = vst [vmem:[#allocation21_spill] sm:$0xff] %v8434_v46  ;;  %v1585_v39 = vadd.f32 %v1584_v24, %v1496_v21  ;;  %v7136_v24 = vld [vmem:[#allocation8 + $0x50] sm:$0xff] }
 0x205   : > { %v1676_v36 = vpop.f32.mrf.mxu1  ;;  %2860 = vmatpush.bf16.msra.mxu2 %v7136_v24 }
 0x206   : > { %v8436_v47 = vadd.f32 %v1673_v40, %v1585_v39  ;;  %1537 = vmatmul.bf16.gmra.mxu3 %v10453_v18  ;;  %1626 = vmatmul.bf16.gmra.mxu0 %v8440_v51 }
 0x208   : > { %10461 = vst [vmem:[#allocation34_spill] sm:$0xff] %v8436_v47  ;;  %1715 = vmatmul.bf16.gmra.mxu1 %v10462_v44  ;;  %1948 = vmatmul.bf16.gmra.mxu2 %v10463_v26 }
 0x209   : > { %v1498_v58 = vpop.f32.mrf.mxu3  ;;  %2861 = vmatpush.bf16.msra.mxu2 %v7135_v28 }
 0x20a   : > { %v1499_v10 = vadd.f32 %v1498_v58, %v8277_v16 }
 0x20b   : > { %v8446_v21 = vpop.f32.mrf.mxu2  ;;  %v1589_v39 = vpop.f32.mrf.mxu0 }
 0x20c   : > { %10464 = vst [vmem:[#allocation24_spill] sm:$0xff] %v8446_v21  ;;  %v1588_v40 = vadd.f32 %v1587_v54, %v1499_v10  ;;  %v8457_v54 = vld [vmem:[%s7843_s29 + $0x68] sm:$0xff] }
 0x20d   : > { %v1678_v18 = vpop.f32.mrf.mxu1  ;;  %2862 = vmatpush.bf16.msra.mxu2 %v7134_v42  ;;  %v10469_v10 = vld [vmem:[#allocation23_spill] sm:$0xff]  ;;  %v7165_v42 = vld [vmem:[#allocation8 + $0x138] sm:$0xff] }
 0x20e   : > { %v8448_v60 = vadd.f32 %v1676_v36, %v1588_v40  ;;  %v10468_v36 = vld [vmem:[#allocation25_spill] sm:$0xff]  ;;  %3298 = vmatpush.bf16.msrb.mxu1 %v7165_v42 }
 0x210   : > { %10465 = vst [vmem:[#allocation22_spill] sm:$0xff] %v8448_v60 }
 0x211   : > { %v1500_v3 = vpop.f32.mrf.mxu3 }
 0x212   : > { %v1501_v47 = vadd.f32 %v1500_v3, %v8282_v13  ;;  %v7149_v13 = vld [vmem:[#allocation8 + $0xb8] sm:$0xff] }
 0x213   : > { %v8451_v46 = vpop.f32.mrf.mxu2  ;;  %v1592_v11 = vpop.f32.mrf.mxu0  ;;  %2944 = vmatpush.bf16.msrb.mxu3 %v7149_v13  ;;  %v7157_v3 = vld [vmem:[#allocation8 + $0xf8] sm:$0xff] }
 0x214   : > { %10466 = vst [vmem:[#allocation35_spill] sm:$0xff] %v8451_v46  ;;  %v1590_v16 = vadd.f32 %v1589_v39, %v1501_v47  ;;  %3209 = vmatpush.bf16.msrb.mxu0 %v7157_v3 }
 0x215   : > { %v1681_v58 = vpop.f32.mrf.mxu1 }
 0x216   : > { %v8453_v21 = vadd.f32 %v1678_v18, %v1590_v16  ;;  %1542 = vmatmul.bf16.gmra.mxu3 %v10457_v19  ;;  %1631 = vmatmul.bf16.gmra.mxu0 %v8457_v54 }
 0x218   : > { %10467 = vst [vmem:[#allocation36_spill] sm:$0xff] %v8453_v21  ;;  %1720 = vmatmul.bf16.gmra.mxu1 %v10468_v36  ;;  %1953 = vmatmul.bf16.gmra.mxu2 %v10469_v10 }
 0x219   : > { %v1503_v24 = vpop.f32.mrf.mxu3 }
 0x21a   : > { %v1504_v40 = vadd.f32 %v1503_v24, %v8291_v31 }
 0x21b   : > { %v8463_v47 = vpop.f32.mrf.mxu2  ;;  %v1594_v39 = vpop.f32.mrf.mxu0 }
 0x21c   : > { %10470 = vst [vmem:[#allocation25_spill] sm:$0xff] %v8463_v47  ;;  %v1593_v18 = vadd.f32 %v1592_v11, %v1504_v40  ;;  %v8474_v11 = vld [vmem:[%s7843_s29 + $0x70] sm:$0xff]  ;;  %v10475_v40 = vmov 0   ;;  %v8488_v47 = vld [vmem:[%s7850_s16] sm:$0xff] }
 0x21d   : > { %v1683_v28 = vpop.f32.mrf.mxu1 }
 0x21e   : > { %v8465_v19 = vadd.f32 %v1681_v58, %v1593_v18  ;;  %v10474_v58 = vld [vmem:[#allocation27_spill] sm:$0xff] }
 0x220   : > { %10471 = vst [vmem:[#allocation23_spill] sm:$0xff] %v8465_v19 }
 0x221   : > { %v1505_v16 = vpop.f32.mrf.mxu3 }
 0x222   : > { %v1506_v10 = vadd.f32 %v1505_v16, %v8296_v43 }
 0x223   : > { %v8468_v21 = vpop.f32.mrf.mxu2  ;;  %v1597_v13 = vpop.f32.mrf.mxu0 }
 0x224   : > { %10472 = vst [vmem:[#allocation37_spill] sm:$0xff] %v8468_v21  ;;  %v1595_v46 = vadd.f32 %v1594_v39, %v1506_v10 }
 0x225   : > { %v1686_v31 = vpop.f32.mrf.mxu1 }
 0x226   : > { %v8470_v24 = vadd.f32 %v1683_v28, %v1595_v46  ;;  %1547 = vmatmul.bf16.gmra.mxu3 %v10463_v26  ;;  %1636 = vmatmul.bf16.gmra.mxu0 %v8474_v11 }
 0x228   : > { %10473 = vst [vmem:[#allocation38_spill] sm:$0xff] %v8470_v24  ;;  %1725 = vmatmul.bf16.gmra.mxu1 %v10474_v58  ;;  %1958 = vmatmul.bf16.gmra.mxu2 %v10475_v40 }
 0x229   : > { %v1508_v43 = vpop.f32.mrf.mxu3 }
 0x22a   : > { %v1509_v18 = vadd.f32 %v1508_v43, %v8305_v22  ;;  %v7387_v22 = vld [vmem:[%s7843_s29 + $0x8] sm:$0xff] }
 0x22b   : > { %v8480_v3 = vpop.f32.mrf.mxu2  ;;  %v1599_v39 = vpop.f32.mrf.mxu0 }
 0x22c   : > { %v1598_v46 = vadd.f32 %v1597_v13, %v1509_v18  ;;  %v7148_v13 = vld [vmem:[#allocation8 + $0xb0] sm:$0xff] }
 0x22d   : > { %v1688_v28 = vpop.f32.mrf.mxu1  ;;  %2945 = vmatpush.bf16.msrb.mxu3 %v7148_v13 }
 0x22e   : > { %v8482_v42 = vadd.f32 %v1686_v31, %v1598_v46 }
 0x231   : > { %v1510_v26 = vpop.f32.mrf.mxu3 }
 0x232   : > { %v1511_v16 = vadd.f32 %v1510_v26, %v8310_v59  ;;  %v10323_v59 = vshrl.u32 %v8488_v47, 16 }
 0x233   : > { %v8485_v10 = vpop.f32.mrf.mxu2  ;;  %v1602_v24 = vpop.f32.mrf.mxu0 }
 0x234   : > { %10476 = vst [vmem:[#allocation27_spill] sm:$0xff] %v8485_v10  ;;  %v1600_v21 = vadd.f32 %v1599_v39, %v1511_v16  ;;  %v7156_v16 = vld [vmem:[#allocation8 + $0xf0] sm:$0xff] }
 0x235   : > { %v1691_v19 = vpop.f32.mrf.mxu1  ;;  %3210 = vmatpush.bf16.msrb.mxu0 %v7156_v16 }
 0x236   : > { %v8490_v60 = vadd.f32 %v1688_v28, %v1600_v21  ;;  %1972 = vmatmul.bf16.vlgmr.msra.gmra.mxu3 %v7387_v22  ;;  %2061 = vmatmul.bf16.vlgmr.msra.gmra.mxu0 %v7984_v61  ;;  %v2401_v61 = vrot.slane %v10323_v59, 7  ;;  %v10324_v28 = vshll.u32 %v8488_v47, 16  ;;  %v7164_v22 = vld [vmem:[#allocation8 + $0x130] sm:$0xff] }
 0x237   : > { %3299 = vmatpush.bf16.msrb.mxu1 %v7164_v22 }
 0x238   : > { %10477 = vst [vmem:[#allocation39_spill] sm:$0xff] %v8490_v60  ;;  %2774 = vmatmul.bf16.vlgmr.msra.gmra.mxu1 %v10475_v40  ;;  %2863 = vmatmul.bf16.vlgmr.msra.gmra.mxu2 %v10475_v40  ;;  %v2404_v13 = vor.u32 %v10324_v28, %v2401_v61 }
 0x239   : > { %v1513_v31 = vpop.f32.mrf.mxu3 }
 0x23a   : > { %v1514_v43 = vadd.f32 %v1513_v31, %v8319_v50  ;;  %v8512_v10 = vsel %vm7924_vm4, 0, %v2404_v13 }
 0x23b   : > { %v8498_v18 = vpop.f32.mrf.mxu2  ;;  %v1604_v39 = vpop.f32.mrf.mxu0 }
 0x23c   : > { %10478 = vst [vmem:[#allocation40_spill] sm:$0xff] %v8498_v18  ;;  %v1603_v21 = vadd.f32 %v1602_v24, %v1514_v43 }
 0x23d   : > { %v1693_v46 = vpop.f32.mrf.mxu1 }
 0x23e   : > { %v8503_v26 = vadd.f32 %v1691_v19, %v1603_v21  ;;  %v8515_v19 = vld [vmem:[%s7850_s16 + $0x8] sm:$0xff] }
 0x240   : > { %10479 = vst [vmem:[#allocation41_spill] sm:$0xff] %v8503_v26  ;;  %v7388_v26 = vld [vmem:[%s7843_s29 + $0x10] sm:$0xff] }
 0x241   : > { %v1515_v50 = vpop.f32.mrf.mxu3 }
 0x242   : > { %v1516_v24 = vadd.f32 %v1515_v50, %v8324_v41  ;;  %v10325_v41 = vshrl.u32 %v8515_v19, 16 }
 0x243   : > { %v8508_v31 = vpop.f32.mrf.mxu2  ;;  %v1607_v43 = vpop.f32.mrf.mxu0 }
 0x244   : > { %v1605_v18 = vadd.f32 %v1604_v39, %v1516_v24 }
 0x245   : > { %v1696_v59 = vpop.f32.mrf.mxu1 }
 0x246   : > { %v8517_v21 = vadd.f32 %v1693_v46, %v1605_v18  ;;  %1977 = vmatmul.bf16.gmra.mxu3 %v7388_v26  ;;  %2066 = vmatmul.bf16.gmra.mxu0 %v8019_v23  ;;  %v2408_v26 = vrot.slane %v10325_v41, 7  ;;  %v10326_v23 = vshll.u32 %v8515_v19, 16 }
 0x248   : > { %10481 = vst [vmem:[#allocation42_spill] sm:$0xff] %v8517_v21  ;;  %2779 = vmatmul.bf16.gmra.mxu1 %v8512_v10  ;;  %2868 = vmatmul.bf16.gmra.mxu2 %v8488_v47  ;;  %v2411_v50 = vor.u32 %v10326_v23, %v2408_v26  ;;  %v7155_v23 = vld [vmem:[#allocation8 + $0xe8] sm:$0xff] }
 0x249   : > { %v1518_v39 = vpop.f32.mrf.mxu3  ;;  %3211 = vmatpush.bf16.msrb.mxu0 %v7155_v23 }
 0x24a   : > { %v1519_v61 = vadd.f32 %v1518_v39, %v8333_v12 }
 0x24b   : > { %v8525_v16 = vpop.f32.mrf.mxu2  ;;  %v1609_v22 = vpop.f32.mrf.mxu0 }
 0x24c   : > { %10482 = vst [vmem:[#allocation43_spill] sm:$0xff] %v8525_v16  ;;  %v1608_v18 = vadd.f32 %v1607_v43, %v1519_v61  ;;  %v8539_v43 = vsel %vm7924_vm4, 0, %v2411_v50  ;;  %v8542_v61 = vld [vmem:[%s7850_s16 + $0x10] sm:$0xff] }
 0x24d   : > { %v1698_v46 = vpop.f32.mrf.mxu1 }
 0x24e   : > { %v8530_v13 = vadd.f32 %v1696_v59, %v1608_v18  ;;  %v7389_v59 = vld [vmem:[%s7843_s29 + $0x18] sm:$0xff] }
 0x251   : > { %v1520_v24 = vpop.f32.mrf.mxu3 }
 0x252   : > { %v1521_v12 = vadd.f32 %v1520_v24, %v8338_v45  ;;  %v7147_v45 = vld [vmem:[#allocation8 + $0xa8] sm:$0xff] }
 0x253   : > { %v8535_v39 = vpop.f32.mrf.mxu2  ;;  %v1612_v28 = vpop.f32.mrf.mxu0  ;;  %2946 = vmatpush.bf16.msrb.mxu3 %v7147_v45 }
 0x254   : > { %10483 = vst [vmem:[#allocation44_spill] sm:$0xff] %v8535_v39  ;;  %v1610_v16 = vadd.f32 %v1609_v22, %v1521_v12  ;;  %v10327_v22 = vshrl.u32 %v8542_v61, 16  ;;  %v10328_v12 = vshll.u32 %v8542_v61, 16 }
 0x255   : > { %v1701_v21 = vpop.f32.mrf.mxu1 }
 0x256   : > { %v8544_v41 = vadd.f32 %v1698_v46, %v1610_v16  ;;  %1982 = vmatmul.bf16.gmra.mxu3 %v7389_v59  ;;  %2071 = vmatmul.bf16.gmra.mxu0 %v8049_v8  ;;  %v2415_v8 = vrot.slane %v10327_v22, 7 }
 0x258   : > { %10484 = vst [vmem:[#allocation45_spill] sm:$0xff] %v8544_v41  ;;  %2784 = vmatmul.bf16.gmra.mxu1 %v8539_v43  ;;  %2873 = vmatmul.bf16.gmra.mxu2 %v8515_v19  ;;  %v7163_v41 = vld [vmem:[#allocation8 + $0x128] sm:$0xff]  ;;  %v2418_v45 = vor.u32 %v10328_v12, %v2415_v8 }
 0x259   : > { %v1523_v18 = vpop.f32.mrf.mxu3  ;;  %3300 = vmatpush.bf16.msrb.mxu1 %v7163_v41 }
 0x25a   : > { %v1524_v26 = vadd.f32 %v1523_v18, %v8347_v48  ;;  %v8566_v39 = vsel %vm7924_vm4, 0, %v2418_v45 }
 0x25b   : > { %v8552_v50 = vpop.f32.mrf.mxu2  ;;  %v1614_v24 = vpop.f32.mrf.mxu0 }
 0x25c   : > { %10485 = vst [vmem:[#allocation46_spill] sm:$0xff] %v8552_v50  ;;  %v1613_v16 = vadd.f32 %v1612_v28, %v1524_v26 }
 0x25d   : > { %v1703_v46 = vpop.f32.mrf.mxu1 }
 0x25e   : > { %v8557_v59 = vadd.f32 %v1701_v21, %v1613_v16  ;;  %v8569_v21 = vld [vmem:[%s7850_s16 + $0x18] sm:$0xff] }
 0x260   : > { %10486 = vst [vmem:[#allocation47_spill] sm:$0xff] %v8557_v59  ;;  %v7390_v59 = vld [vmem:[%s7843_s29 + $0x20] sm:$0xff] }
 0x261   : > { %v1525_v48 = vpop.f32.mrf.mxu3 }
 0x262   : > { %v1526_v28 = vadd.f32 %v1525_v48, %v8352_v20  ;;  %v10329_v20 = vshrl.u32 %v8569_v21, 16 }
 0x263   : > { %v8562_v18 = vpop.f32.mrf.mxu2  ;;  %v1617_v26 = vpop.f32.mrf.mxu0 }
 0x264   : > { %v1615_v50 = vadd.f32 %v1614_v24, %v1526_v28 }
 0x265   : > { %v1706_v22 = vpop.f32.mrf.mxu1 }
 0x266   : > { %v8571_v16 = vadd.f32 %v1703_v46, %v1615_v50  ;;  %1987 = vmatmul.bf16.gmra.mxu3 %v7390_v59  ;;  %2076 = vmatmul.bf16.gmra.mxu0 %v8070_v55  ;;  %v2422_v59 = vrot.slane %v10329_v20, 7  ;;  %v10330_v55 = vshll.u32 %v8569_v21, 16 }
 0x268   : > { %10487 = vst [vmem:[#allocation48_spill] sm:$0xff] %v8571_v16  ;;  %2789 = vmatmul.bf16.gmra.mxu1 %v8566_v39  ;;  %2878 = vmatmul.bf16.gmra.mxu2 %v8542_v61  ;;  %v2425_v48 = vor.u32 %v10330_v55, %v2422_v59  ;;  %v7154_v55 = vld [vmem:[#allocation8 + $0xe0] sm:$0xff] }
 0x269   : > { %v1528_v41 = vpop.f32.mrf.mxu3  ;;  %3212 = vmatpush.bf16.msrb.mxu0 %v7154_v55 }
 0x26a   : > { %v1529_v23 = vadd.f32 %v1528_v41, %v8361_v33 }
 0x26b   : > { %v8579_v24 = vpop.f32.mrf.mxu2  ;;  %v1619_v8 = vpop.f32.mrf.mxu0 }
 0x26c   : > { %10488 = vst [vmem:[#allocation49_spill] sm:$0xff] %v8579_v24  ;;  %v1618_v50 = vadd.f32 %v1617_v26, %v1529_v23  ;;  %v8593_v26 = vsel %vm7924_vm4, 0, %v2425_v48  ;;  %v8596_v23 = vld [vmem:[%s7850_s16 + $0x20] sm:$0xff] }
 0x26d   : > { %v1708_v46 = vpop.f32.mrf.mxu1 }
 0x26e   : > { %v8584_v45 = vadd.f32 %v1706_v22, %v1618_v50  ;;  %v7391_v22 = vld [vmem:[%s7843_s29 + $0x28] sm:$0xff] }
 0x271   : > { %v1530_v28 = vpop.f32.mrf.mxu3 }
 0x272   : > { %v1531_v33 = vadd.f32 %v1530_v28, %v8366_v6  ;;  %v7146_v6 = vld [vmem:[#allocation8 + $0xa0] sm:$0xff] }
 0x273   : > { %v8589_v41 = vpop.f32.mrf.mxu2  ;;  %v1622_v12 = vpop.f32.mrf.mxu0  ;;  %2947 = vmatpush.bf16.msrb.mxu3 %v7146_v6 }
 0x274   : > { %10489 = vst [vmem:[#allocation50_spill] sm:$0xff] %v8589_v41  ;;  %v1620_v24 = vadd.f32 %v1619_v8, %v1531_v33  ;;  %v10331_v8 = vshrl.u32 %v8596_v23, 16  ;;  %v10332_v33 = vshll.u32 %v8596_v23, 16 }
 0x275   : > { %v1711_v16 = vpop.f32.mrf.mxu1 }
 0x276   : > { %v8598_v20 = vadd.f32 %v1708_v46, %v1620_v24  ;;  %1992 = vmatmul.bf16.gmra.mxu3 %v7391_v22  ;;  %2081 = vmatmul.bf16.gmra.mxu0 %v8087_v9  ;;  %v2429_v9 = vrot.slane %v10331_v8, 7 }
 0x278   : > { %10490 = vst [vmem:[#allocation51_spill] sm:$0xff] %v8598_v20  ;;  %2794 = vmatmul.bf16.gmra.mxu1 %v8593_v26  ;;  %2883 = vmatmul.bf16.gmra.mxu2 %v8569_v21  ;;  %v7162_v20 = vld [vmem:[#allocation8 + $0x120] sm:$0xff]  ;;  %v2432_v6 = vor.u32 %v10332_v33, %v2429_v9 }
 0x279   : > { %v1533_v50 = vpop.f32.mrf.mxu3  ;;  %3301 = vmatpush.bf16.msrb.mxu1 %v7162_v20 }
 0x27a   : > { %v1534_v59 = vadd.f32 %v1533_v50, %v8317_v2  ;;  %v8620_v41 = vsel %vm7924_vm4, 0, %v2432_v6 }
 0x27b   : > { %v8606_v48 = vpop.f32.mrf.mxu2  ;;  %v1624_v28 = vpop.f32.mrf.mxu0 }
 0x27c   : > { %10491 = vst [vmem:[#allocation52_spill] sm:$0xff] %v8606_v48  ;;  %v1623_v24 = vadd.f32 %v1622_v12, %v1534_v59 }
 0x27d   : > { %v1713_v46 = vpop.f32.mrf.mxu1 }
 0x27e   : > { %v8611_v22 = vadd.f32 %v1711_v16, %v1623_v24  ;;  %v8623_v16 = vld [vmem:[%s7850_s16 + $0x28] sm:$0xff] }
 0x280   : > { %10492 = vst [vmem:[#allocation53_spill] sm:$0xff] %v8611_v22  ;;  %v7392_v22 = vld [vmem:[%s7843_s29 + $0x30] sm:$0xff] }
 0x281   : > { %v1535_v2 = vpop.f32.mrf.mxu3 }
 0x282   : > { %v1536_v12 = vadd.f32 %v1535_v2, %v8322_v17  ;;  %v10333_v17 = vshrl.u32 %v8623_v16, 16 }
 0x283   : > { %v8616_v50 = vpop.f32.mrf.mxu2  ;;  %v1627_v59 = vpop.f32.mrf.mxu0 }
 0x284   : > { %v1625_v48 = vadd.f32 %v1624_v28, %v1536_v12 }
 0x285   : > { %v1716_v8 = vpop.f32.mrf.mxu1 }
 0x286   : > { %v8625_v24 = vadd.f32 %v1713_v46, %v1625_v48  ;;  %1997 = vmatmul.bf16.gmra.mxu3 %v7392_v22  ;;  %2086 = vmatmul.bf16.gmra.mxu0 %v8104_v32  ;;  %v2436_v22 = vrot.slane %v10333_v17, 7  ;;  %v10334_v32 = vshll.u32 %v8623_v16, 16 }
 0x288   : > { %10493 = vst [vmem:[#allocation54_spill] sm:$0xff] %v8625_v24  ;;  %2799 = vmatmul.bf16.gmra.mxu1 %v8620_v41  ;;  %2888 = vmatmul.bf16.gmra.mxu2 %v8596_v23  ;;  %v2439_v2 = vor.u32 %v10334_v32, %v2436_v22  ;;  %v7161_v32 = vld [vmem:[#allocation8 + $0x118] sm:$0xff] }
 0x289   : > { %v1538_v20 = vpop.f32.mrf.mxu3  ;;  %3302 = vmatpush.bf16.msrb.mxu1 %v7161_v32  ;;  %v7394_v32 = vld [vmem:[%s7843_s29 + $0x40] sm:$0xff] }
 0x28a   : > { %v1539_v55 = vadd.f32 %v1538_v20, %v8331_v27 }
 0x28b   : > { %v8633_v28 = vpop.f32.mrf.mxu2  ;;  %v1629_v9 = vpop.f32.mrf.mxu0 }
 0x28c   : > { %10494 = vst [vmem:[#allocation55_spill] sm:$0xff] %v8633_v28  ;;  %v1628_v48 = vadd.f32 %v1627_v59, %v1539_v55  ;;  %v8647_v59 = vsel %vm7924_vm4, 0, %v2439_v2  ;;  %v8650_v55 = vld [vmem:[%s7850_s16 + $0x30] sm:$0xff] }
 0x28d   : > { %v1718_v46 = vpop.f32.mrf.mxu1  ;;  %10497 = vst [vmem:[#allocation58_spill] sm:$0xff] %v8647_v59 }
 0x28e   : > { %v8638_v6 = vadd.f32 %v1716_v8, %v1628_v48  ;;  %v7393_v8 = vld [vmem:[%s7843_s29 + $0x38] sm:$0xff] }
 0x290   : > { %10495 = vst [vmem:[#allocation56_spill] sm:$0xff] %v8638_v6  ;;  %v8677_v6 = vld [vmem:[%s7850_s16 + $0x38] sm:$0xff] }
 0x291   : > { %v1540_v12 = vpop.f32.mrf.mxu3 }
 0x292   : > { %v1541_v27 = vadd.f32 %v1540_v12, %v8336_v53  ;;  %v7145_v53 = vld [vmem:[#allocation8 + $0x98] sm:$0xff] }
 0x293   : > { %v8643_v20 = vpop.f32.mrf.mxu2  ;;  %v1632_v33 = vpop.f32.mrf.mxu0  ;;  %2948 = vmatpush.bf16.msrb.mxu3 %v7145_v53 }
 0x294   : > { %10496 = vst [vmem:[#allocation57_spill] sm:$0xff] %v8643_v20  ;;  %v1630_v28 = vadd.f32 %v1629_v9, %v1541_v27  ;;  %v10335_v9 = vshrl.u32 %v8650_v55, 16  ;;  %v10336_v27 = vshll.u32 %v8650_v55, 16 }
 0x295   : > { %v1721_v24 = vpop.f32.mrf.mxu1 }
 0x296   : > { %v8652_v17 = vadd.f32 %v1718_v46, %v1630_v28  ;;  %2002 = vmatmul.bf16.gmra.mxu3 %v7393_v8  ;;  %2091 = vmatmul.bf16.gmra.mxu0 %v8121_v34  ;;  %v2443_v34 = vrot.slane %v10335_v9, 7  ;;  %v7153_v8 = vld [vmem:[#allocation8 + $0xd8] sm:$0xff] }
 0x297   : > { %3213 = vmatpush.bf16.msrb.mxu0 %v7153_v8 }
 0x298   : > { %10498 = vst [vmem:[#allocation59_spill] sm:$0xff] %v8652_v17  ;;  %2804 = vmatmul.bf16.gmra.mxu1 %v8647_v59  ;;  %2893 = vmatmul.bf16.gmra.mxu2 %v8623_v16 }
 0x299   : > { %v1543_v48 = vpop.f32.mrf.mxu3 }
 0x29a   : > { %v1544_v22 = vadd.f32 %v1543_v48, %v8345_v7  ;;  %v2446_v7 = vor.u32 %v10336_v27, %v2443_v34 }
 0x29b   : > { %v8660_v2 = vpop.f32.mrf.mxu2  ;;  %v1634_v12 = vpop.f32.mrf.mxu0 }
 0x29c   : > { %10499 = vst [vmem:[#allocation60_spill] sm:$0xff] %v8660_v2  ;;  %v1633_v28 = vadd.f32 %v1632_v33, %v1544_v22  ;;  %v8674_v20 = vsel %vm7924_vm4, 0, %v2446_v7 }
 0x29d   : > { %v1723_v46 = vpop.f32.mrf.mxu1 }
 0x29e   : > { %v8665_v17 = vadd.f32 %v1721_v24, %v1633_v28 }
 0x2a1   : > { %v1545_v53 = vpop.f32.mrf.mxu3 }
 0x2a2   : > { %v1546_v33 = vadd.f32 %v1545_v53, %v8350_v5  ;;  %v10337_v5 = vshrl.u32 %v8677_v6, 16 }
 0x2a3   : > { %v8670_v48 = vpop.f32.mrf.mxu2  ;;  %v1637_v22 = vpop.f32.mrf.mxu0 }
 0x2a4   : > { %v1635_v2 = vadd.f32 %v1634_v12, %v1546_v33  ;;  %v2450_v7 = vrot.slane %v10337_v5, 7 }
 0x2a5   : > { %v1726_v9 = vpop.f32.mrf.mxu1 }
 0x2a6   : > { %v8679_v24 = vadd.f32 %v1723_v46, %v1635_v2  ;;  %2007 = vmatmul.bf16.gmra.mxu3 %v7394_v32  ;;  %2096 = vmatmul.bf16.gmra.mxu0 %v8146_v14  ;;  %v10338_v14 = vshll.u32 %v8677_v6, 16 }
 0x2a8   : > { %10500 = vst [vmem:[#allocation61_spill] sm:$0xff] %v8679_v24  ;;  %2809 = vmatmul.bf16.gmra.mxu1 %v8674_v20  ;;  %2898 = vmatmul.bf16.gmra.mxu2 %v8650_v55  ;;  %v2453_v33 = vor.u32 %v10338_v14, %v2450_v7  ;;  %v10505_v7 = vld [vmem:[#allocation31_spill] sm:$0xff] }
 0x2a9   : > { %v1548_v12 = vpop.f32.mrf.mxu3 }
 0x2aa   : > { %v1549_v28 = vadd.f32 %v1548_v12, %v8359_v25 }
 0x2ab   : > { %v8687_v34 = vpop.f32.mrf.mxu2  ;;  %v1639_v8 = vpop.f32.mrf.mxu0 }
 0x2ac   : > { %10501 = vst [vmem:[#allocation62_spill] sm:$0xff] %v8687_v34  ;;  %v1638_v2 = vadd.f32 %v1637_v22, %v1549_v28  ;;  %v8701_v22 = vsel %vm7924_vm4, 0, %v2453_v33  ;;  %v8704_v28 = vld [vmem:[%s7850_s16 + $0x40] sm:$0xff] }
 0x2ad   : > { %v1728_v46 = vpop.f32.mrf.mxu1 }
 0x2ae   : > { %v8692_v53 = vadd.f32 %v1726_v9, %v1638_v2  ;;  %v7395_v9 = vld [vmem:[%s7843_s29 + $0x48] sm:$0xff] }
 0x2b0   : > { %10502 = vst [vmem:[#allocation63_spill] sm:$0xff] %v8692_v53  ;;  %v7160_v53 = vld [vmem:[#allocation8 + $0x110] sm:$0xff] }
 0x2b1   : > { %v1550_v32 = vpop.f32.mrf.mxu3  ;;  %3303 = vmatpush.bf16.msrb.mxu1 %v7160_v53 }
 0x2b2   : > { %v1551_v25 = vadd.f32 %v1550_v32, %v8364_v29  ;;  %v7144_v29 = vld [vmem:[#allocation8 + $0x90] sm:$0xff] }
 0x2b3   : > { %v8697_v12 = vpop.f32.mrf.mxu2  ;;  %v2062_v27 = vpop.f32.mrf.mxu0  ;;  %2949 = vmatpush.bf16.msrb.mxu3 %v7144_v29 }
 0x2b4   : > { %10503 = vst [vmem:[#allocation64_spill] sm:$0xff] %v8697_v12  ;;  %v1640_v34 = vadd.f32 %v1639_v8, %v1551_v25  ;;  %v10339_v8 = vshrl.u32 %v8704_v28, 16  ;;  %v7152_v12 = vld [vmem:[#allocation8 + $0xd0] sm:$0xff] }
 0x2b5   : > { %v2775_v24 = vpop.f32.mrf.mxu1  ;;  %3214 = vmatpush.bf16.msrb.mxu0 %v7152_v12  ;;  %v8732_v12 = vld [vmem:[%s7850_s16 + $0x48] sm:$0xff] }
 0x2b6   : > { %v8706_v5 = vadd.f32 %v1728_v46, %v1640_v34  ;;  %2012 = vmatmul.bf16.gmra.mxu3 %v7395_v9  ;;  %2101 = vmatmul.bf16.gmra.mxu0 %v8179_v49  ;;  %v2457_v49 = vrot.slane %v10339_v8, 7  ;;  %v10341_v9 = vshll.u32 %v8704_v28, 16 }
 0x2b8   : > { %10504 = vst [vmem:[#allocation65_spill] sm:$0xff] %v8706_v5  ;;  %2814 = vmatmul.bf16.gmra.mxu1 %v8701_v22  ;;  %2903 = vmatmul.bf16.gmra.mxu2 %v8677_v6  ;;  %v7173_v5 = vld [vmem:[#allocation8 + $0x178] sm:$0xff] }
 0x2b9   : > { %v1973_v2 = vpop.f32.mrf.mxu3  ;;  %3387 = vmatpush.bf16.msrb.mxu2 %v7173_v5 }
 0x2ba   : > { %v1974_v33 = vadd.f32 %v1973_v2, %v10505_v7 }
 0x2bb   : > { %v2864_v32 = vpop.f32.mrf.mxu2  ;;  %v2064_v34 = vpop.f32.mrf.mxu0 }
 0x2bc   : > { %v8714_v25 = vadd.f32 %v2864_v32, %v2775_v24  ;;  %v2063_v46 = vadd.f32 %v2062_v27, %v1974_v33  ;;  %v2460_v27 = vor.u32 %v10341_v9, %v2457_v49  ;;  %v8761_v9 = vld [vmem:[%s7850_s16 + $0x50] sm:$0xff] }
 0x2bd   : > { %v2777_v14 = vpop.f32.mrf.mxu1 }
 0x2be   : > { %10506 = vst [vmem:[#allocation31_spill] sm:$0xff] %v8714_v25  ;;  %v8720_v29 = vadd.f32 %v2063_v46, %v8375_v52  ;;  %v8729_v5 = vsel %vm7924_vm4, 0, %v2460_v27  ;;  %v7396_v52 = vld [vmem:[%s7843_s29 + $0x50] sm:$0xff] }
 0x2c1   : > { %v1975_v24 = vpop.f32.mrf.mxu3 }
 0x2c2   : > { %v1976_v2 = vadd.f32 %v1975_v24, %v8378_v4  ;;  %v10340_v4 = vshrl.u32 %v8732_v12, 16 }
 0x2c3   : > { %v2866_v7 = vpop.f32.mrf.mxu2  ;;  %v2067_v32 = vpop.f32.mrf.mxu0 }
 0x2c4   : > { %v8725_v33 = vadd.f32 %v2866_v7, %v2777_v14  ;;  %v2065_v8 = vadd.f32 %v2064_v34, %v1976_v2 }
 0x2c5   : > { %v2780_v25 = vpop.f32.mrf.mxu1 }
 0x2c6   : > { %2017 = vmatmul.bf16.gmra.mxu3 %v7396_v52  ;;  %2106 = vmatmul.bf16.gmra.mxu0 %v10452_v30  ;;  %v8737_v53 = vadd.f32 %v2065_v8, %v8380_v1  ;;  %v2464_v1 = vrot.slane %v10340_v4, 7  ;;  %v10342_v8 = vshll.u32 %v8732_v12, 16 }
 0x2c8   : > { %2819 = vmatmul.bf16.gmra.mxu1 %v8729_v5  ;;  %2908 = vmatmul.bf16.gmra.mxu2 %v8704_v28  ;;  %v2467_v7 = vor.u32 %v10342_v8, %v2464_v1  ;;  %v7151_v8 = vld [vmem:[#allocation8 + $0xc8] sm:$0xff] }
 0x2c9   : > { %v1978_v14 = vpop.f32.mrf.mxu3  ;;  %3215 = vmatpush.bf16.msrb.mxu0 %v7151_v8  ;;  %v8790_v8 = vld [vmem:[%s7850_s16 + $0x58] sm:$0xff] }
 0x2ca   : > { %v1979_v34 = vadd.f32 %v1978_v14, %v8387_v37  ;;  %v8758_v4 = vsel %vm7924_vm4, 0, %v2467_v7 }
 0x2cb   : > { %v2869_v46 = vpop.f32.mrf.mxu2  ;;  %v2069_v27 = vpop.f32.mrf.mxu0 }
 0x2cc   : > { %v8743_v49 = vadd.f32 %v2869_v46, %v2780_v25  ;;  %v2068_v24 = vadd.f32 %v2067_v32, %v1979_v34 }
 0x2cd   : > { %v2782_v30 = vpop.f32.mrf.mxu1 }
 0x2ce   : > { %v8749_v2 = vadd.f32 %v2068_v24, %v8389_v57  ;;  %v7397_v57 = vld [vmem:[%s7843_s29 + $0x58] sm:$0xff] }
 0x2d1   : > { %v1980_v37 = vpop.f32.mrf.mxu3 }
 0x2d2   : > { %v1981_v25 = vadd.f32 %v1980_v37, %v8392_v38  ;;  %v7143_v38 = vld [vmem:[#allocation8 + $0x88] sm:$0xff] }
 0x2d3   : > { %v2871_v52 = vpop.f32.mrf.mxu2  ;;  %v2072_v46 = vpop.f32.mrf.mxu0  ;;  %2950 = vmatpush.bf16.msrb.mxu3 %v7143_v38 }
 0x2d4   : > { %v8754_v14 = vadd.f32 %v2871_v52, %v2782_v30  ;;  %v2070_v32 = vadd.f32 %v2069_v27, %v1981_v25  ;;  %v10343_v27 = vshrl.u32 %v8761_v9, 16 }
 0x2d5   : > { %v2785_v34 = vpop.f32.mrf.mxu1 }
 0x2d6   : > { %10507 = vst [vmem:[#allocation66_spill] sm:$0xff] %v8754_v14  ;;  %2022 = vmatmul.bf16.gmra.mxu3 %v7397_v57  ;;  %2111 = vmatmul.bf16.gmra.mxu0 %v10456_v63  ;;  %v8766_v24 = vadd.f32 %v2070_v32, %v8394_v35  ;;  %v2471_v35 = vrot.slane %v10343_v27, 7  ;;  %v10344_v32 = vshll.u32 %v8761_v9, 16  ;;  %v7172_v57 = vld [vmem:[#allocation8 + $0x170] sm:$0xff] }
 0x2d7   : > { %3388 = vmatpush.bf16.msrb.mxu2 %v7172_v57 }
 0x2d8   : > { %10508 = vst [vmem:[#allocation67_spill] sm:$0xff] %v8766_v24  ;;  %2824 = vmatmul.bf16.gmra.mxu1 %v8758_v4  ;;  %2913 = vmatmul.bf16.gmra.mxu2 %v8732_v12  ;;  %v7159_v24 = vld [vmem:[#allocation8 + $0x108] sm:$0xff] }
 0x2d9   : > { %v1983_v30 = vpop.f32.mrf.mxu3  ;;  %3304 = vmatpush.bf16.msrb.mxu1 %v7159_v24 }
 0x2da   : > { %v1984_v1 = vadd.f32 %v1983_v30, %v8401_v0  ;;  %v2474_v0 = vor.u32 %v10344_v32, %v2471_v35 }
 0x2db   : > { %v2874_v7 = vpop.f32.mrf.mxu2  ;;  %v2074_v25 = vpop.f32.mrf.mxu0 }
 0x2dc   : > { %v8772_v37 = vadd.f32 %v2874_v7, %v2785_v34  ;;  %v2073_v52 = vadd.f32 %v2072_v46, %v1984_v1  ;;  %v10510_v34 = vld [vmem:[#allocation32_spill] sm:$0xff]  ;;  %v8787_v57 = vsel %vm7924_vm4, 0, %v2474_v0 }
 0x2dd   : > { %v2787_v63 = vpop.f32.mrf.mxu1 }
 0x2de   : > { %10509 = vst [vmem:[#allocation68_spill] sm:$0xff] %v8772_v37  ;;  %v8778_v38 = vadd.f32 %v2073_v52, %v8403_v56  ;;  %v10511_v56 = vld [vmem:[#allocation33_spill] sm:$0xff] }
 0x2e1   : > { %v1985_v46 = vpop.f32.mrf.mxu3 }
 0x2e2   : > { %v1986_v30 = vadd.f32 %v1985_v46, %v10510_v34 }
 0x2e3   : > { %v2876_v1 = vpop.f32.mrf.mxu2  ;;  %v2077_v27 = vpop.f32.mrf.mxu0 }
 0x2e4   : > { %v8783_v7 = vadd.f32 %v2876_v1, %v2787_v63  ;;  %v2075_v37 = vadd.f32 %v2074_v25, %v1986_v30  ;;  %v10345_v25 = vshrl.u32 %v8790_v8, 16 }
 0x2e5   : > { %v2790_v14 = vpop.f32.mrf.mxu1 }
 0x2e6   : > { %2027 = vmatmul.bf16.gmra.mxu3 %v8440_v51  ;;  %2116 = vmatmul.bf16.gmra.mxu0 %v10462_v44  ;;  %v8795_v24 = vadd.f32 %v2075_v37, %v10511_v56  ;;  %v2478_v44 = vrot.slane %v10345_v25, 7  ;;  %v10346_v37 = vshll.u32 %v8790_v8, 16 }
 0x2e8   : > { %10512 = vst [vmem:[#allocation32_spill] sm:$0xff] %v8795_v24  ;;  %2829 = vmatmul.bf16.gmra.mxu1 %v8787_v57  ;;  %2918 = vmatmul.bf16.gmra.mxu2 %v8761_v9  ;;  %v2481_v1 = vor.u32 %v10346_v37, %v2478_v44  ;;  %v7171_v37 = vld [vmem:[#allocation8 + $0x168] sm:$0xff] }
 0x2e9   : > { %v1988_v52 = vpop.f32.mrf.mxu3  ;;  %3389 = vmatpush.bf16.msrb.mxu2 %v7171_v37 }
 0x2ea   : > { %v1989_v63 = vadd.f32 %v1988_v52, %v8415_v62  ;;  %v10515_v62 = vld [vmem:[#allocation26_spill] sm:$0xff]  ;;  %v8816_v25 = vsel %vm7924_vm4, 0, %v2481_v1  ;;  %v10520_v1 = vld [vmem:[#allocation20_spill] sm:$0xff] }
 0x2eb   : > { %v2879_v35 = vpop.f32.mrf.mxu2  ;;  %v2079_v46 = vpop.f32.mrf.mxu0  ;;  %10517 = vst [vmem:[#allocation70_spill] sm:$0xff] %v8816_v25 }
 0x2ec   : > { %v8801_v0 = vadd.f32 %v2879_v35, %v2790_v14  ;;  %v2078_v51 = vadd.f32 %v2077_v27, %v1989_v63 }
 0x2ed   : > { %v2792_v34 = vpop.f32.mrf.mxu1 }
 0x2ee   : > { %10513 = vst [vmem:[#allocation33_spill] sm:$0xff] %v8801_v0  ;;  %v8807_v30 = vadd.f32 %v2078_v51, %v8417_v15  ;;  %v8819_v0 = vld [vmem:[%s7850_s16 + $0x60] sm:$0xff]  ;;  %v10518_v15 = vld [vmem:[#allocation28_spill] sm:$0xff] }
 0x2f0   : > { %10514 = vst [vmem:[#allocation69_spill] sm:$0xff] %v8807_v30 }
 0x2f1   : > { %v1990_v56 = vpop.f32.mrf.mxu3 }
 0x2f2   : > { %v1991_v52 = vadd.f32 %v1990_v56, %v10515_v62 }
 0x2f3   : > { %v2881_v14 = vpop.f32.mrf.mxu2  ;;  %v2082_v32 = vpop.f32.mrf.mxu0 }
 0x2f4   : > { %v8812_v35 = vadd.f32 %v2881_v14, %v2792_v34  ;;  %v2080_v27 = vadd.f32 %v2079_v46, %v1991_v52  ;;  %v7142_v34 = vld [vmem:[#allocation8 + $0x80] sm:$0xff]  ;;  %v10347_v46 = vshrl.u32 %v8819_v0, 16 }
 0x2f5   : > { %v2795_v63 = vpop.f32.mrf.mxu1  ;;  %2951 = vmatpush.bf16.msrb.mxu3 %v7142_v34  ;;  %v10522_v34 = vld [vmem:[#allocation30_spill] sm:$0xff] }
 0x2f6   : > { %10516 = vst [vmem:[#allocation26_spill] sm:$0xff] %v8812_v35  ;;  %2032 = vmatmul.bf16.gmra.mxu3 %v8457_v54  ;;  %2121 = vmatmul.bf16.gmra.mxu0 %v10468_v36  ;;  %v8824_v51 = vadd.f32 %v2080_v27, %v10518_v15  ;;  %v2485_v27 = vrot.slane %v10347_v46, 7  ;;  %v10350_v15 = vshll.u32 %v8819_v0, 16  ;;  %v7158_v35 = vld [vmem:[#allocation8 + $0x100] sm:$0xff] }
 0x2f7   : > { %3305 = vmatpush.bf16.msrb.mxu1 %v7158_v35  ;;  %v7169_v35 = vld [vmem:[#allocation8 + $0x158] sm:$0xff] }
 0x2f8   : > { %10519 = vst [vmem:[#allocation28_spill] sm:$0xff] %v8824_v51  ;;  %2834 = vmatmul.bf16.gmra.mxu1 %v8816_v25  ;;  %2923 = vmatmul.bf16.gmra.mxu2 %v8790_v8  ;;  %v7150_v51 = vld [vmem:[#allocation8 + $0xc0] sm:$0xff] }
 0x2f9   : > { %v1993_v44 = vpop.f32.mrf.mxu3  ;;  %3216 = vmatpush.bf16.msrb.mxu0 %v7150_v51  ;;  %v8848_v51 = vld [vmem:[%s7850_s16 + $0x68] sm:$0xff] }
 0x2fa   : > { %v1994_v56 = vadd.f32 %v1993_v44, %v10520_v1  ;;  %v10523_v44 = vld [vmem:[#allocation21_spill] sm:$0xff] }
 0x2fb   : > { %v2884_v62 = vpop.f32.mrf.mxu2  ;;  %v2084_v54 = vpop.f32.mrf.mxu0  ;;  %10525 = vst [vmem:[#allocation21_spill] sm:$0xff] %v8848_v51 }
 0x2fc   : > { %v8830_v52 = vadd.f32 %v2884_v62, %v2795_v63  ;;  %v2083_v14 = vadd.f32 %v2082_v32, %v1994_v56  ;;  %v2488_v63 = vor.u32 %v10350_v15, %v2485_v27  ;;  %v7170_v62 = vld [vmem:[#allocation8 + $0x160] sm:$0xff] }
 0x2fd   : > { %v2797_v36 = vpop.f32.mrf.mxu1  ;;  %3390 = vmatpush.bf16.msrb.mxu2 %v7170_v62  ;;  %v10352_v62 = vshll.u32 %v8848_v51, 16 }
 0x2fe   : > { %10521 = vst [vmem:[#allocation20_spill] sm:$0xff] %v8830_v52  ;;  %v8836_v30 = vadd.f32 %v2083_v14, %v10522_v34  ;;  %v8845_v37 = vsel %vm7924_vm4, 0, %v2488_v63  ;;  %v10526_v14 = vld [vmem:[#allocation34_spill] sm:$0xff]  ;;  %v10528_v34 = vld [vmem:[#allocation24_spill] sm:$0xff] }
 0x301   : > { %v1995_v32 = vpop.f32.mrf.mxu3  ;;  %3391 = vmatpush.bf16.msrb.mxu2 %v7169_v35  ;;  %v10530_v35 = vld [vmem:[#allocation22_spill] sm:$0xff] }
 0x302   : > { %v1996_v1 = vadd.f32 %v1995_v32, %v10523_v44  ;;  %v7168_v44 = vld [vmem:[#allocation8 + $0x150] sm:$0xff] }
 0x303   : > { %v2886_v56 = vpop.f32.mrf.mxu2  ;;  %v2087_v52 = vpop.f32.mrf.mxu0 }
 0x304   : > { %v8841_v46 = vadd.f32 %v2886_v56, %v2797_v36  ;;  %v2085_v25 = vadd.f32 %v2084_v54, %v1996_v1  ;;  %v10351_v54 = vshrl.u32 %v8848_v51, 16 }
 0x305   : > { %v2800_v24 = vpop.f32.mrf.mxu1  ;;  %3392 = vmatpush.bf16.msrb.mxu2 %v7168_v44 }
 0x306   : > { %10524 = vst [vmem:[#allocation30_spill] sm:$0xff] %v8841_v46  ;;  %2037 = vmatmul.bf16.gmra.mxu3 %v8474_v11  ;;  %2126 = vmatmul.bf16.gmra.mxu0 %v10474_v58  ;;  %v8853_v27 = vadd.f32 %v2085_v25, %v10526_v14  ;;  %v2492_v25 = vrot.slane %v10351_v54, 7  ;;  %v7167_v14 = vld [vmem:[#allocation8 + $0x148] sm:$0xff] }
 0x308   : > { %10527 = vst [vmem:[#allocation34_spill] sm:$0xff] %v8853_v27  ;;  %2839 = vmatmul.bf16.gmra.mxu1 %v8845_v37  ;;  %2928 = vmatmul.bf16.gmra.mxu2 %v8819_v0 }
 0x309   : > { %v1998_v36 = vpop.f32.mrf.mxu3  ;;  %3393 = vmatpush.bf16.msrb.mxu2 %v7167_v14  ;;  %v10536_v14 = vld [vmem:[#allocation36_spill] sm:$0xff] }
 0x30a   : > { %v1999_v63 = vadd.f32 %v1998_v36, %v10528_v34  ;;  %v2495_v36 = vor.u32 %v10352_v62, %v2492_v25  ;;  %v10532_v34 = vld [vmem:[#allocation35_spill] sm:$0xff]  ;;  %v10535_v25 = vld [vmem:[#allocation29_spill] sm:$0xff] }
 0x30b   : > { %v2889_v32 = vpop.f32.mrf.mxu2  ;;  %v2089_v11 = vpop.f32.mrf.mxu0 }
 0x30c   : > { %v8859_v1 = vadd.f32 %v2889_v32, %v2800_v24  ;;  %v2088_v58 = vadd.f32 %v2087_v52, %v1999_v63  ;;  %v7166_v32 = vld [vmem:[#allocation8 + $0x140] sm:$0xff]  ;;  %v8874_v44 = vsel %vm7924_vm4, 0, %v2495_v36  ;;  %v10538_v36 = vld [vmem:[#allocation25_spill] sm:$0xff] }
 0x30d   : > { %v2802_v56 = vpop.f32.mrf.mxu1  ;;  %10534 = vst [vmem:[#allocation71_spill] sm:$0xff] %v8874_v44  ;;  %3394 = vmatpush.bf16.msrb.mxu2 %v7166_v32 }
 0x30e   : > { %10529 = vst [vmem:[#allocation24_spill] sm:$0xff] %v8859_v1  ;;  %v8865_v15 = vadd.f32 %v2088_v58, %v10530_v35  ;;  %v8877_v58 = vld [vmem:[%s7850_s16 + $0x70] sm:$0xff]  ;;  %v7398_v35 = vld [vmem:[%s7843_s29 + $0x78] sm:$0xff]  ;;  %s7578_s29 = sshra.s32 %s5880_s14, 4  ;;  %s7579_s29 = int_to_ptr.hbm [resolvable:$true] %s7578_s29 }
 0x30f   : > { %s7580_s5 = scalar_lea.hbm %s7579_s29, 256  ;;  %p7585_p9 = scmp.lt.s32.totalorder %s7579_s29, %s10290_s7 }
 0x310   : > { %10531 = vst [vmem:[#allocation22_spill] sm:$0xff] %v8865_v15  ;;  %v10540_v15 = vld [vmem:[#allocation23_spill] sm:$0xff]  ;;  %p7581_p1 = scmp.ne.s32.totalorder %s7579_s29, %s7580_s5  ;;  %p7586_p10 = scmp.lt.s32.totalorder %s7584_s30, %s7580_s5 }
 0x311   : > { %v2000_v24 = vpop.f32.mrf.mxu3 }
 0x312   : > { %v2001_v52 = vadd.f32 %v2000_v24, %v10532_v34  ;;  %p7582_p4 = pnand %p7581_p1, %p7784_p7  ;;  %p7587_p2 = por %p7586_p10, %p7585_p9 }
 0x313   : > { %v2891_v63 = vpop.f32.mrf.mxu2  ;;  %v2092_v54 = vpop.f32.mrf.mxu0 }
 0x314   : > { %v8870_v1 = vadd.f32 %v2891_v63, %v2802_v56  ;;  %v2090_v27 = vadd.f32 %v2089_v11, %v2001_v52  ;;  %v7181_v11 = vld [vmem:[#allocation8 + $0x1b8] sm:$0xff]  ;;  %v10355_v56 = vshrl.u32 %v8877_v58, 16  ;;  %p7583_p8 = pneg %p7582_p4 }
 0x315   : > { %v2805_v46 = vpop.f32.mrf.mxu1  ;;  %3652 = vmatpush.bf16.msra.mxu3 %v7181_v11 }
 0x316   : > { %10533 = vst [vmem:[#allocation35_spill] sm:$0xff] %v8870_v1  ;;  %2042 = vmatmul.bf16.gmra.mxu3 %v7398_v35  ;;  %2131 = vmatmul.bf16.gmra.mxu0 %v10535_v25  ;;  %v8882_v24 = vadd.f32 %v2090_v27, %v10536_v14  ;;  %v2499_v27 = vrot.slane %v10355_v56, 7  ;;  %v10358_v14 = vshll.u32 %v8877_v58, 16  ;;  %v7197_v1 = vld [vmem:[#allocation8 + $0x238] sm:$0xff]  ;;  %p7588_p11 = pnand %p7587_p2, %p7583_p8 }
 0x317   : > { %3830 = vmatpush.bf16.msra.mxu1 %v7197_v1 }
 0x318   : > { %10537 = vst [vmem:[#allocation29_spill] sm:$0xff] %v8882_v24  ;;  %2844 = vmatmul.bf16.gmra.mxu1 %v8874_v44  ;;  %2933 = vmatmul.bf16.gmra.mxu2 %v8848_v51  ;;  %v7189_v24 = vld [vmem:[#allocation8 + $0x1f8] sm:$0xff]  ;;  %v2502_v11 = vor.u32 %v10358_v14, %v2499_v27 }
 0x319   : > { %v2003_v34 = vpop.f32.mrf.mxu3  ;;  %3741 = vmatpush.bf16.msra.mxu0 %v7189_v24 }
 0x31a   : > { %v2004_v52 = vadd.f32 %v2003_v34, %v10538_v36  ;;  %v10541_v34 = vld [vmem:[#allocation37_spill] sm:$0xff]  ;;  %v8903_v51 = vsel %vm7924_vm4, 0, %v2502_v11  ;;  %v10547_v11 = vshll.u32 %v8488_v47, 16 }
 0x31b   : > { %v2894_v63 = vpop.f32.mrf.mxu2  ;;  %v2094_v35 = vpop.f32.mrf.mxu0  ;;  %10543 = vst [vmem:[#allocation23_spill] sm:$0xff] %v8903_v51 }
 0x31c   : > { %v8888_v32 = vadd.f32 %v2894_v63, %v2805_v46  ;;  %v2093_v62 = vadd.f32 %v2092_v54, %v2004_v52 }
 0x31d   : > { %v2807_v25 = vpop.f32.mrf.mxu1 }
 0x31e   : > { %10539 = vst [vmem:[#allocation36_spill] sm:$0xff] %v8888_v32  ;;  %v8894_v44 = vadd.f32 %v2093_v62, %v10540_v15  ;;  %v10544_v15 = vld [vmem:[#allocation38_spill] sm:$0xff] }
 0x321   : > { %v2005_v46 = vpop.f32.mrf.mxu3 }
 0x322   : > { %v2006_v36 = vadd.f32 %v2005_v46, %v10541_v34  ;;  %v2542_v46 = vrot.slane %v10547_v11, 1 }
 0x323   : > { %v2896_v54 = vpop.f32.mrf.mxu2  ;;  %v2097_v63 = vpop.f32.mrf.mxu0 }
 0x324   : > { %v8899_v52 = vadd.f32 %v2896_v54, %v2807_v25  ;;  %v2095_v56 = vadd.f32 %v2094_v35, %v2006_v36 }
 0x325   : > { %v2810_v32 = vpop.f32.mrf.mxu1 }
 0x326   : > { %10542 = vst [vmem:[#allocation25_spill] sm:$0xff] %v8899_v52  ;;  %2047 = vmatmul.bf16.gmra.mxu3 %v10475_v40  ;;  %2136 = vmatmul.bf16.gmra.mxu0 %v10475_v40  ;;  %v8908_v1 = vadd.f32 %v2095_v56, %v10544_v15  ;;  %v10548_v56 = vshrl.u32 %v8488_v47, 16 }
 0x328   : > { %10545 = vst [vmem:[#allocation37_spill] sm:$0xff] %v8908_v1  ;;  %2849 = vmatmul.bf16.gmra.mxu1 %v8903_v51  ;;  %2938 = vmatmul.bf16.gmra.mxu2 %v8877_v58  ;;  %v2543_v15 = vor.u32 %v2542_v46, %v10548_v56  ;;  %v10549_v1 = vld [vmem:[#allocation27_spill] sm:$0xff]  ;;  %v10554_v56 = vshll.u32 %v8515_v19, 16 }
 0x329   : > { %v2008_v62 = vpop.f32.mrf.mxu3 }
 0x32a   : > { %v2009_v24 = vadd.f32 %v2008_v62, %v8480_v3  ;;  %v2590_v11 = vsel %vm7928_vm5, %v2543_v15, 0  ;;  %v7188_v15 = vld [vmem:[#allocation8 + $0x1f0] sm:$0xff] }
 0x32b   : > { %v2899_v35 = vpop.f32.mrf.mxu2  ;;  %v2099_v27 = vpop.f32.mrf.mxu0  ;;  %3742 = vmatpush.bf16.msra.mxu0 %v7188_v15 }
 0x32c   : > { %v8913_v25 = vadd.f32 %v2899_v35, %v2810_v32  ;;  %v2098_v34 = vadd.f32 %v2097_v63, %v2009_v24 }
 0x32d   : > { %v2812_v36 = vpop.f32.mrf.mxu1 }
 0x32e   : > { %10546 = vst [vmem:[#allocation38_spill] sm:$0xff] %v8913_v25  ;;  %v8918_v54 = vadd.f32 %v2098_v34, %v8482_v42  ;;  %v10551_v42 = vld [vmem:[#allocation39_spill] sm:$0xff] }
 0x331   : > { %v2010_v14 = vpop.f32.mrf.mxu3 }
 0x332   : > { %v2011_v60 = vadd.f32 %v2010_v14, %v10549_v1  ;;  %v7180_v14 = vld [vmem:[#allocation8 + $0x1b0] sm:$0xff] }
 0x333   : > { %v2901_v52 = vpop.f32.mrf.mxu2  ;;  %v2102_v32 = vpop.f32.mrf.mxu0  ;;  %3653 = vmatpush.bf16.msra.mxu3 %v7180_v14  ;;  %v10556_v14 = vshrl.u32 %v8515_v19, 16 }
 0x334   : > { %v8923_v3 = vadd.f32 %v2901_v52, %v2812_v36  ;;  %v2100_v62 = vadd.f32 %v2099_v27, %v2011_v60  ;;  %v10552_v52 = vld [vmem:[#allocation40_spill] sm:$0xff] }
 0x335   : > { %v2815_v35 = vpop.f32.mrf.mxu1 }
 0x336   : > { %2952 = vmatmul.bf16.vlgmr.msrb.gmra.mxu3 %v10475_v40  ;;  %3217 = vmatmul.bf16.vlgmr.msrb.gmra.mxu0 %v8512_v10  ;;  %v8930_v63 = vadd.f32 %v2100_v62, %v10551_v42  ;;  %v2544_v10 = vrot.slane %v10554_v56, 1  ;;  %v7196_v62 = vld [vmem:[#allocation8 + $0x230] sm:$0xff] }
 0x337   : > { %3831 = vmatpush.bf16.msra.mxu1 %v7196_v62 }
 0x338   : > { %3306 = vmatmul.bf16.vlgmr.msrb.gmra.mxu1 %v8488_v47  ;;  %3395 = vmatmul.bf16.vlgmr.msrb.gmra.mxu2 %v2590_v11  ;;  %v10555_v47 = vld [vmem:[#allocation41_spill] sm:$0xff]  ;;  %v2545_v40 = vor.u32 %v2544_v10, %v10556_v14 }
 0x339   : > { %v2013_v1 = vpop.f32.mrf.mxu3 }
 0x33a   : > { %v2014_v24 = vadd.f32 %v2013_v1, %v10552_v52  ;;  %v8948_v56 = vsel %vm7928_vm5, %v2545_v40, 0 }
 0x33b   : > { %v2904_v60 = vpop.f32.mrf.mxu2  ;;  %v2104_v46 = vpop.f32.mrf.mxu0 }
 0x33c   : > { %v8934_v27 = vadd.f32 %v2904_v60, %v2815_v35  ;;  %v2103_v34 = vadd.f32 %v2102_v32, %v2014_v24 }
 0x33d   : > { %v2817_v36 = vpop.f32.mrf.mxu1 }
 0x33e   : > { %10553 = vst [vmem:[#allocation27_spill] sm:$0xff] %v8934_v27  ;;  %v8939_v42 = vadd.f32 %v2103_v34, %v10555_v47  ;;  %v10558_v34 = vld [vmem:[#allocation42_spill] sm:$0xff] }
 0x341   : > { %v2015_v1 = vpop.f32.mrf.mxu3 }
 0x342   : > { %v2016_v35 = vadd.f32 %v2015_v1, %v8508_v31 }
 0x343   : > { %v2906_v52 = vpop.f32.mrf.mxu2  ;;  %v2107_v32 = vpop.f32.mrf.mxu0 }
 0x344   : > { %v8944_v60 = vadd.f32 %v2906_v52, %v2817_v36  ;;  %v2105_v24 = vadd.f32 %v2104_v46, %v2016_v35  ;;  %v10560_v36 = vld [vmem:[#allocation43_spill] sm:$0xff]  ;;  %v10562_v52 = vshrl.u32 %v8542_v61, 16 }
 0x345   : > { %v2820_v27 = vpop.f32.mrf.mxu1 }
 0x346   : > { %10557 = vst [vmem:[#allocation19_spill] sm:$0xff] %v8944_v60  ;;  %2957 = vmatmul.bf16.gmra.mxu3 %v2590_v11  ;;  %3222 = vmatmul.bf16.gmra.mxu0 %v8539_v43  ;;  %v8952_v15 = vadd.f32 %v2105_v24, %v10558_v34  ;;  %v10561_v11 = vshll.u32 %v8542_v61, 16  ;;  %v10563_v34 = vld [vmem:[#allocation44_spill] sm:$0xff] }
 0x348   : > { %10559 = vst [vmem:[#allocation39_spill] sm:$0xff] %v8952_v15  ;;  %3311 = vmatmul.bf16.gmra.mxu1 %v8515_v19  ;;  %3400 = vmatmul.bf16.gmra.mxu2 %v8948_v56  ;;  %v2546_v1 = vrot.slane %v10561_v11, 1 }
 0x349   : > { %v2018_v31 = vpop.f32.mrf.mxu3 }
 0x34a   : > { %v2019_v10 = vadd.f32 %v2018_v31, %v10560_v36  ;;  %v2547_v19 = vor.u32 %v2546_v1, %v10562_v52 }
 0x34b   : > { %v2909_v62 = vpop.f32.mrf.mxu2  ;;  %v2109_v47 = vpop.f32.mrf.mxu0 }
 0x34c   : > { %v8957_v46 = vadd.f32 %v2909_v62, %v2820_v27  ;;  %v2108_v14 = vadd.f32 %v2107_v32, %v2019_v10  ;;  %v8971_v32 = vsel %vm7928_vm5, %v2547_v19, 0 }
 0x34d   : > { %v2822_v40 = vpop.f32.mrf.mxu1 }
 0x34e   : > { %v8962_v35 = vadd.f32 %v2108_v14, %v8530_v13  ;;  %v10565_v13 = vld [vmem:[#allocation45_spill] sm:$0xff] }
 0x351   : > { %v2020_v24 = vpop.f32.mrf.mxu3 }
 0x352   : > { %v2021_v15 = vadd.f32 %v2020_v24, %v10563_v34  ;;  %v10569_v24 = vshll.u32 %v8569_v21, 16 }
 0x353   : > { %v2911_v60 = vpop.f32.mrf.mxu2  ;;  %v2112_v27 = vpop.f32.mrf.mxu0 }
 0x354   : > { %v8967_v31 = vadd.f32 %v2911_v60, %v2822_v40  ;;  %v2110_v36 = vadd.f32 %v2109_v47, %v2021_v15  ;;  %v7179_v60 = vld [vmem:[#allocation8 + $0x1a8] sm:$0xff]  ;;  %v10567_v15 = vld [vmem:[#allocation46_spill] sm:$0xff]  ;;  %v2548_v34 = vrot.slane %v10569_v24, 1 }
 0x355   : > { %v2825_v62 = vpop.f32.mrf.mxu1  ;;  %3654 = vmatpush.bf16.msra.mxu3 %v7179_v60  ;;  %v10572_v60 = vshrl.u32 %v8569_v21, 16 }
 0x356   : > { %10564 = vst [vmem:[#allocation40_spill] sm:$0xff] %v8967_v31  ;;  %2962 = vmatmul.bf16.gmra.mxu3 %v8948_v56  ;;  %3227 = vmatmul.bf16.gmra.mxu0 %v8566_v39  ;;  %v8976_v10 = vadd.f32 %v2110_v36, %v10565_v13  ;;  %v7187_v36 = vld [vmem:[#allocation8 + $0x1e8] sm:$0xff] }
 0x357   : > { %v7195_v13 = vld [vmem:[#allocation8 + $0x228] sm:$0xff]  ;;  %3743 = vmatpush.bf16.msra.mxu0 %v7187_v36  ;;  %v2549_v31 = vor.u32 %v2548_v34, %v10572_v60 }
 0x358   : > { %10566 = vst [vmem:[#allocation41_spill] sm:$0xff] %v8976_v10  ;;  %3316 = vmatmul.bf16.gmra.mxu1 %v8542_v61  ;;  %3405 = vmatmul.bf16.gmra.mxu2 %v8971_v32  ;;  %v10570_v61 = vld [vmem:[#allocation47_spill] sm:$0xff] }
 0x359   : > { %v2023_v14 = vpop.f32.mrf.mxu3  ;;  %3832 = vmatpush.bf16.msra.mxu1 %v7195_v13  ;;  %v8995_v24 = vsel %vm7928_vm5, %v2549_v31, 0 }
 0x35a   : > { %v2024_v47 = vadd.f32 %v2023_v14, %v10567_v15 }
 0x35b   : > { %v2914_v40 = vpop.f32.mrf.mxu2  ;;  %v2114_v1 = vpop.f32.mrf.mxu0 }
 0x35c   : > { %v8981_v11 = vadd.f32 %v2914_v40, %v2825_v62  ;;  %v2113_v52 = vadd.f32 %v2112_v27, %v2024_v47 }
 0x35d   : > { %v2827_v19 = vpop.f32.mrf.mxu1 }
 0x35e   : > { %10568 = vst [vmem:[#allocation42_spill] sm:$0xff] %v8981_v11  ;;  %v8986_v10 = vadd.f32 %v2113_v52, %v10570_v61  ;;  %v10574_v52 = vld [vmem:[#allocation48_spill] sm:$0xff] }
 0x360   : > { %10571 = vst [vmem:[#allocation43_spill] sm:$0xff] %v8986_v10 }
 0x361   : > { %v2025_v14 = vpop.f32.mrf.mxu3 }
 0x362   : > { %v2026_v62 = vadd.f32 %v2025_v14, %v8562_v18  ;;  %v10577_v14 = vshll.u32 %v8596_v23, 16 }
 0x363   : > { %v2916_v15 = vpop.f32.mrf.mxu2  ;;  %v2117_v27 = vpop.f32.mrf.mxu0 }
 0x364   : > { %v8991_v40 = vadd.f32 %v2916_v15, %v2827_v19  ;;  %v2115_v47 = vadd.f32 %v2114_v1, %v2026_v62  ;;  %v10576_v19 = vld [vmem:[#allocation49_spill] sm:$0xff]  ;;  %v2550_v62 = vrot.slane %v10577_v14, 1 }
 0x365   : > { %v2830_v11 = vpop.f32.mrf.mxu1 }
 0x366   : > { %10573 = vst [vmem:[#allocation44_spill] sm:$0xff] %v8991_v40  ;;  %2967 = vmatmul.bf16.gmra.mxu3 %v8971_v32  ;;  %3232 = vmatmul.bf16.gmra.mxu0 %v8593_v26  ;;  %v9000_v36 = vadd.f32 %v2115_v47, %v10574_v52  ;;  %v10578_v47 = vshrl.u32 %v8596_v23, 16 }
 0x368   : > { %10575 = vst [vmem:[#allocation45_spill] sm:$0xff] %v9000_v36  ;;  %3321 = vmatmul.bf16.gmra.mxu1 %v8569_v21  ;;  %3410 = vmatmul.bf16.gmra.mxu2 %v8995_v24  ;;  %v2551_v21 = vor.u32 %v2550_v62, %v10578_v47  ;;  %v10579_v36 = vld [vmem:[#allocation50_spill] sm:$0xff] }
 0x369   : > { %v2028_v18 = vpop.f32.mrf.mxu3 }
 0x36a   : > { %v2029_v34 = vadd.f32 %v2028_v18, %v10576_v19 }
 0x36b   : > { %v2919_v1 = vpop.f32.mrf.mxu2  ;;  %v2119_v61 = vpop.f32.mrf.mxu0 }
 0x36c   : > { %v9005_v13 = vadd.f32 %v2919_v1, %v2830_v11  ;;  %v2118_v31 = vadd.f32 %v2117_v27, %v2029_v34  ;;  %v9019_v27 = vsel %vm7928_vm5, %v2551_v21, 0  ;;  %v10585_v21 = vshll.u32 %v8623_v16, 16 }
 0x36d   : > { %v2832_v60 = vpop.f32.mrf.mxu1 }
 0x36e   : > { %v9010_v15 = vadd.f32 %v2118_v31, %v8584_v45  ;;  %v10581_v45 = vld [vmem:[#allocation51_spill] sm:$0xff] }
 0x371   : > { %v2030_v52 = vpop.f32.mrf.mxu3 }
 0x372   : > { %v2031_v40 = vadd.f32 %v2030_v52, %v10579_v36  ;;  %v2552_v52 = vrot.slane %v10585_v21, 1 }
 0x373   : > { %v2921_v10 = vpop.f32.mrf.mxu2  ;;  %v2122_v11 = vpop.f32.mrf.mxu0 }
 0x374   : > { %v9015_v18 = vadd.f32 %v2921_v10, %v2832_v60  ;;  %v2120_v19 = vadd.f32 %v2119_v61, %v2031_v40  ;;  %v7178_v10 = vld [vmem:[#allocation8 + $0x1a0] sm:$0xff]  ;;  %v10583_v40 = vld [vmem:[#allocation52_spill] sm:$0xff] }
 0x375   : > { %v2835_v1 = vpop.f32.mrf.mxu1  ;;  %3655 = vmatpush.bf16.msra.mxu3 %v7178_v10  ;;  %v10588_v10 = vshrl.u32 %v8623_v16, 16 }
 0x376   : > { %10580 = vst [vmem:[#allocation46_spill] sm:$0xff] %v9015_v18  ;;  %2972 = vmatmul.bf16.gmra.mxu3 %v8995_v24  ;;  %3237 = vmatmul.bf16.gmra.mxu0 %v8620_v41  ;;  %v9024_v34 = vadd.f32 %v2120_v19, %v10581_v45  ;;  %v7186_v19 = vld [vmem:[#allocation8 + $0x1e0] sm:$0xff] }
 0x377   : > { %v7194_v45 = vld [vmem:[#allocation8 + $0x220] sm:$0xff]  ;;  %3744 = vmatpush.bf16.msra.mxu0 %v7186_v19  ;;  %v2553_v18 = vor.u32 %v2552_v52, %v10588_v10 }
 0x378   : > { %10582 = vst [vmem:[#allocation47_spill] sm:$0xff] %v9024_v34  ;;  %3326 = vmatmul.bf16.gmra.mxu1 %v8596_v23  ;;  %3415 = vmatmul.bf16.gmra.mxu2 %v9019_v27  ;;  %v10586_v23 = vld [vmem:[#allocation53_spill] sm:$0xff] }
 0x379   : > { %v2033_v36 = vpop.f32.mrf.mxu3  ;;  %3833 = vmatpush.bf16.msra.mxu1 %v7194_v45  ;;  %v9043_v21 = vsel %vm7928_vm5, %v2553_v18, 0 }
 0x37a   : > { %v2034_v61 = vadd.f32 %v2033_v36, %v10583_v40 }
 0x37b   : > { %v2924_v31 = vpop.f32.mrf.mxu2  ;;  %v2124_v14 = vpop.f32.mrf.mxu0 }
 0x37c   : > { %v9029_v60 = vadd.f32 %v2924_v31, %v2835_v1  ;;  %v2123_v62 = vadd.f32 %v2122_v11, %v2034_v61 }
 0x37d   : > { %v2837_v47 = vpop.f32.mrf.mxu1 }
 0x37e   : > { %10584 = vst [vmem:[#allocation48_spill] sm:$0xff] %v9029_v60  ;;  %v9034_v34 = vadd.f32 %v2123_v62, %v10586_v23  ;;  %v10590_v62 = vld [vmem:[#allocation54_spill] sm:$0xff] }
 0x380   : > { %10587 = vst [vmem:[#allocation49_spill] sm:$0xff] %v9034_v34 }
 0x381   : > { %v2035_v36 = vpop.f32.mrf.mxu3 }
 0x382   : > { %v2036_v1 = vadd.f32 %v2035_v36, %v8616_v50  ;;  %v10593_v36 = vshll.u32 %v8650_v55, 16 }
 0x383   : > { %v2926_v40 = vpop.f32.mrf.mxu2  ;;  %v2127_v11 = vpop.f32.mrf.mxu0 }
 0x384   : > { %v9039_v31 = vadd.f32 %v2926_v40, %v2837_v47  ;;  %v2125_v61 = vadd.f32 %v2124_v14, %v2036_v1  ;;  %v10592_v47 = vld [vmem:[#allocation55_spill] sm:$0xff]  ;;  %v2554_v1 = vrot.slane %v10593_v36, 1  ;;  %v10594_v40 = vld [vmem:[#allocation56_spill] sm:$0xff] }
 0x385   : > { %v2840_v60 = vpop.f32.mrf.mxu1 }
 0x386   : > { %10589 = vst [vmem:[#allocation50_spill] sm:$0xff] %v9039_v31  ;;  %2977 = vmatmul.bf16.gmra.mxu3 %v9019_v27  ;;  %3242 = vmatmul.bf16.gmra.mxu0 %v8647_v59  ;;  %v9048_v19 = vadd.f32 %v2125_v61, %v10590_v62  ;;  %v10595_v61 = vshrl.u32 %v8650_v55, 16 }
 0x388   : > { %10591 = vst [vmem:[#allocation51_spill] sm:$0xff] %v9048_v19  ;;  %3331 = vmatmul.bf16.gmra.mxu1 %v8623_v16  ;;  %3420 = vmatmul.bf16.gmra.mxu2 %v9043_v21  ;;  %v2555_v16 = vor.u32 %v2554_v1, %v10595_v61  ;;  %v10596_v19 = vld [vmem:[#allocation57_spill] sm:$0xff] }
 0x389   : > { %v2038_v50 = vpop.f32.mrf.mxu3 }
 0x38a   : > { %v2039_v52 = vadd.f32 %v2038_v50, %v10592_v47 }
 0x38b   : > { %v2929_v14 = vpop.f32.mrf.mxu2  ;;  %v2129_v23 = vpop.f32.mrf.mxu0 }
 0x38c   : > { %v9053_v45 = vadd.f32 %v2929_v14, %v2840_v60  ;;  %v2128_v18 = vadd.f32 %v2127_v11, %v2039_v52  ;;  %v9067_v11 = vsel %vm7928_vm5, %v2555_v16, 0  ;;  %v10598_v52 = vld [vmem:[#allocation59_spill] sm:$0xff]  ;;  %v10602_v16 = vshll.u32 %v8677_v6, 16 }
 0x38d   : > { %v2842_v10 = vpop.f32.mrf.mxu1 }
 0x38e   : > { %v9058_v31 = vadd.f32 %v2128_v18, %v10594_v40 }
 0x391   : > { %v2040_v62 = vpop.f32.mrf.mxu3 }
 0x392   : > { %v2041_v34 = vadd.f32 %v2040_v62, %v10596_v19  ;;  %v2556_v62 = vrot.slane %v10602_v16, 1 }
 0x393   : > { %v2931_v59 = vpop.f32.mrf.mxu2  ;;  %v2132_v60 = vpop.f32.mrf.mxu0 }
 0x394   : > { %v9063_v50 = vadd.f32 %v2931_v59, %v2842_v10  ;;  %v2130_v47 = vadd.f32 %v2129_v23, %v2041_v34  ;;  %v7177_v59 = vld [vmem:[#allocation8 + $0x198] sm:$0xff]  ;;  %v10600_v34 = vld [vmem:[#allocation60_spill] sm:$0xff] }
 0x395   : > { %v2845_v14 = vpop.f32.mrf.mxu1  ;;  %3656 = vmatpush.bf16.msra.mxu3 %v7177_v59 }
 0x396   : > { %10597 = vst [vmem:[#allocation52_spill] sm:$0xff] %v9063_v50  ;;  %2982 = vmatmul.bf16.gmra.mxu3 %v9043_v21  ;;  %3247 = vmatmul.bf16.gmra.mxu0 %v8674_v20  ;;  %v9072_v18 = vadd.f32 %v2130_v47, %v10598_v52  ;;  %v7185_v47 = vld [vmem:[#allocation8 + $0x1d8] sm:$0xff] }
 0x397   : > { %v7193_v52 = vld [vmem:[#allocation8 + $0x218] sm:$0xff]  ;;  %3745 = vmatpush.bf16.msra.mxu0 %v7185_v47 }
 0x398   : > { %10599 = vst [vmem:[#allocation53_spill] sm:$0xff] %v9072_v18  ;;  %3336 = vmatmul.bf16.gmra.mxu1 %v8650_v55  ;;  %3425 = vmatmul.bf16.gmra.mxu2 %v9067_v11  ;;  %v10604_v18 = vshrl.u32 %v8677_v6, 16 }
 0x399   : > { %v2043_v19 = vpop.f32.mrf.mxu3  ;;  %3834 = vmatpush.bf16.msra.mxu1 %v7193_v52 }
 0x39a   : > { %v2044_v23 = vadd.f32 %v2043_v19, %v10600_v34  ;;  %v2557_v50 = vor.u32 %v2556_v62, %v10604_v18 }
 0x39b   : > { %v2934_v10 = vpop.f32.mrf.mxu2  ;;  %v2134_v1 = vpop.f32.mrf.mxu0 }
 0x39c   : > { %v9077_v36 = vadd.f32 %v2934_v10, %v2845_v14  ;;  %v2133_v40 = vadd.f32 %v2132_v60, %v2044_v23  ;;  %v9091_v16 = vsel %vm7928_vm5, %v2557_v50, 0 }
 0x39d   : > { %v2847_v61 = vpop.f32.mrf.mxu1 }
 0x39e   : > { %10601 = vst [vmem:[#allocation54_spill] sm:$0xff] %v9077_v36  ;;  %v9082_v55 = vadd.f32 %v2133_v40, %v8665_v17  ;;  %v10606_v17 = vld [vmem:[#allocation61_spill] sm:$0xff]  ;;  %v10608_v40 = vld [vmem:[#allocation62_spill] sm:$0xff] }
 0x3a0   : > { %10603 = vst [vmem:[#allocation55_spill] sm:$0xff] %v9082_v55 }
 0x3a1   : > { %v2045_v59 = vpop.f32.mrf.mxu3 }
 0x3a2   : > { %v2046_v14 = vadd.f32 %v2045_v59, %v8670_v48  ;;  %v10609_v59 = vshll.u32 %v8704_v28, 16 }
 0x3a3   : > { %v2936_v19 = vpop.f32.mrf.mxu2  ;;  %v2137_v60 = vpop.f32.mrf.mxu0 }
 0x3a4   : > { %v9087_v34 = vadd.f32 %v2936_v19, %v2847_v61  ;;  %v2135_v23 = vadd.f32 %v2134_v1, %v2046_v14  ;;  %v2558_v14 = vrot.slane %v10609_v59, 1  ;;  %v10610_v19 = vld [vmem:[#allocation63_spill] sm:$0xff] }
 0x3a5   : > { %v2850_v10 = vpop.f32.mrf.mxu1 }
 0x3a6   : > { %10605 = vst [vmem:[#allocation56_spill] sm:$0xff] %v9087_v34  ;;  %2987 = vmatmul.bf16.gmra.mxu3 %v9067_v11  ;;  %3252 = vmatmul.bf16.gmra.mxu0 %v8701_v22  ;;  %v9096_v18 = vadd.f32 %v2135_v23, %v10606_v17  ;;  %v10611_v23 = vshrl.u32 %v8704_v28, 16 }
 0x3a8   : > { %10607 = vst [vmem:[#allocation57_spill] sm:$0xff] %v9096_v18  ;;  %3341 = vmatmul.bf16.gmra.mxu1 %v8677_v6  ;;  %3430 = vmatmul.bf16.gmra.mxu2 %v9091_v16  ;;  %v2559_v6 = vor.u32 %v2558_v14, %v10611_v23  ;;  %v10612_v18 = vld [vmem:[#allocation64_spill] sm:$0xff] }
 0x3a9   : > { %v2048_v48 = vpop.f32.mrf.mxu3 }
 0x3aa   : > { %v2049_v61 = vadd.f32 %v2048_v48, %v10608_v40 }
 0x3ab   : > { %v2939_v1 = vpop.f32.mrf.mxu2  ;;  %v2139_v47 = vpop.f32.mrf.mxu0 }
 0x3ac   : > { %v9101_v62 = vadd.f32 %v2939_v1, %v2850_v10  ;;  %v2138_v50 = vadd.f32 %v2137_v60, %v2049_v61  ;;  %v9115_v60 = vsel %vm7928_vm5, %v2559_v6, 0 }
 0x3ad   : > { %v2852_v52 = vpop.f32.mrf.mxu1 }
 0x3ae   : > { %v9106_v34 = vadd.f32 %v2138_v50, %v10610_v19  ;;  %v10614_v50 = vld [vmem:[#allocation65_spill] sm:$0xff] }
 0x3b1   : > { %v2050_v17 = vpop.f32.mrf.mxu3 }
 0x3b2   : > { %v2051_v55 = vadd.f32 %v2050_v17, %v10612_v18  ;;  %v10617_v17 = vshll.u32 %v8732_v12, 16 }
 0x3b3   : > { %v2941_v36 = vpop.f32.mrf.mxu2  ;;  %v3218_v10 = vpop.f32.mrf.mxu0 }
 0x3b4   : > { %v9111_v48 = vadd.f32 %v2941_v36, %v2852_v52  ;;  %v2140_v40 = vadd.f32 %v2139_v47, %v2051_v55  ;;  %v7176_v36 = vld [vmem:[#allocation8 + $0x190] sm:$0xff]  ;;  %v10616_v55 = vld [vmem:[#allocation31_spill] sm:$0xff] }
 0x3b5   : > { %v3307_v1 = vpop.f32.mrf.mxu1  ;;  %3657 = vmatpush.bf16.msra.mxu3 %v7176_v36 }
 0x3b6   : > { %10613 = vst [vmem:[#allocation59_spill] sm:$0xff] %v9111_v48  ;;  %v3308_v61 = vadd.f32 %v3307_v1, %v3218_v10  ;;  %2992 = vmatmul.bf16.gmra.mxu3 %v9091_v16  ;;  %3257 = vmatmul.bf16.gmra.mxu0 %v8729_v5  ;;  %v9120_v59 = vadd.f32 %v2140_v40, %v10614_v50  ;;  %v2560_v10 = vrot.slane %v10617_v17, 1  ;;  %v7184_v50 = vld [vmem:[#allocation8 + $0x1d0] sm:$0xff]  ;;  %v10618_v48 = vshrl.u32 %v8732_v12, 16 }
 0x3b7   : > { %3746 = vmatpush.bf16.msra.mxu0 %v7184_v50 }
 0x3b8   : > { %10615 = vst [vmem:[#allocation60_spill] sm:$0xff] %v9120_v59  ;;  %3346 = vmatmul.bf16.gmra.mxu1 %v8704_v28  ;;  %3435 = vmatmul.bf16.gmra.mxu2 %v9115_v60  ;;  %v7229_v28 = vld [vmem:[#allocation10 + $0xf8] sm:$0xff]  ;;  %v7192_v59 = vld [vmem:[#allocation8 + $0x210] sm:$0xff]  ;;  %v2561_v36 = vor.u32 %v2560_v10, %v10618_v48 }
 0x3b9   : > { %v2953_v18 = vpop.f32.mrf.mxu3  ;;  %4643 = vmatpush.bf16.msra.mxu2 %v7229_v28  ;;  %3835 = vmatpush.bf16.msra.mxu1 %v7192_v59  ;;  %v10619_v28 = vshll.u32 %v8761_v9, 16 }
 0x3ba   : > { %v2954_v47 = vadd.f32 %v2953_v18, %v10616_v55 }
 0x3bb   : > { %v3396_v52 = vpop.f32.mrf.mxu2  ;;  %v3220_v19 = vpop.f32.mrf.mxu0  ;;  %v2562_v50 = vrot.slane %v10619_v28, 1 }
 0x3bc   : > { %v3397_v14 = vadd.f32 %v3396_v52, %v3308_v61  ;;  %v3033_v23 = vadd.f32 %v2954_v47, %v8720_v29 }
 0x3bd   : > { %v3309_v6 = vpop.f32.mrf.mxu1 }
 0x3be   : > { %v3310_v40 = vadd.f32 %v3309_v6, %v3220_v19  ;;  %v9128_v1 = vadd.f32 %v3397_v14, %v3033_v23  ;;  %v9136_v14 = vsel %vm7928_vm5, %v2561_v36, 0 }
 0x3c1   : > { %v2955_v18 = vpop.f32.mrf.mxu3 }
 0x3c2   : > { %v2956_v61 = vadd.f32 %v2955_v18, %v8725_v33 }
 0x3c3   : > { %v3398_v29 = vpop.f32.mrf.mxu2  ;;  %v3223_v47 = vpop.f32.mrf.mxu0 }
 0x3c4   : > { %v3399_v55 = vadd.f32 %v3398_v29, %v3310_v40  ;;  %v3034_v52 = vadd.f32 %v2956_v61, %v8737_v53  ;;  %v10620_v61 = vshrl.u32 %v8761_v9, 16 }
 0x3c5   : > { %v3312_v19 = vpop.f32.mrf.mxu1 }
 0x3c6   : > { %v3313_v23 = vadd.f32 %v3312_v19, %v3223_v47  ;;  %v9138_v6 = vadd.f32 %v3399_v55, %v3034_v52  ;;  %2997 = vmatmul.bf16.gmra.mxu3 %v9115_v60  ;;  %3262 = vmatmul.bf16.gmra.mxu0 %v8758_v4  ;;  %v10621_v55 = vld [vmem:[#allocation66_spill] sm:$0xff] }
 0x3c8   : > { %3351 = vmatmul.bf16.gmra.mxu1 %v8732_v12  ;;  %3440 = vmatmul.bf16.gmra.mxu2 %v9136_v14  ;;  %v2563_v12 = vor.u32 %v2562_v50, %v10620_v61 }
 0x3c9   : > { %v2958_v33 = vpop.f32.mrf.mxu3 }
 0x3ca   : > { %v2959_v48 = vadd.f32 %v2958_v33, %v8743_v49 }
 0x3cb   : > { %v3401_v53 = vpop.f32.mrf.mxu2  ;;  %v3225_v17 = vpop.f32.mrf.mxu0 }
 0x3cc   : > { %v3402_v59 = vadd.f32 %v3401_v53, %v3313_v23  ;;  %v3035_v10 = vadd.f32 %v2959_v48, %v8749_v2  ;;  %v10622_v23 = vld [vmem:[#allocation67_spill] sm:$0xff]  ;;  %v9156_v2 = vsel %vm7928_vm5, %v2563_v12, 0 }
 0x3cd   : > { %v3314_v40 = vpop.f32.mrf.mxu1 }
 0x3ce   : > { %v3315_v36 = vadd.f32 %v3314_v40, %v3225_v17  ;;  %v9148_v18 = vadd.f32 %v3402_v59, %v3035_v10  ;;  %v7175_v59 = vld [vmem:[#allocation8 + $0x188] sm:$0xff]  ;;  %v10623_v40 = vld [vmem:[#allocation68_spill] sm:$0xff] }
 0x3cf   : > { %3658 = vmatpush.bf16.msra.mxu3 %v7175_v59 }
 0x3d1   : > { %v2960_v29 = vpop.f32.mrf.mxu3 }
 0x3d2   : > { %v2961_v47 = vadd.f32 %v2960_v29, %v10621_v55  ;;  %v10624_v55 = vshll.u32 %v8790_v8, 16 }
 0x3d3   : > { %v3403_v52 = vpop.f32.mrf.mxu2  ;;  %v3228_v19 = vpop.f32.mrf.mxu0 }
 0x3d4   : > { %v3404_v49 = vadd.f32 %v3403_v52, %v3315_v36  ;;  %v3036_v33 = vadd.f32 %v2961_v47, %v10622_v23  ;;  %v2564_v47 = vrot.slane %v10624_v55, 1  ;;  %v7191_v23 = vld [vmem:[#allocation8 + $0x208] sm:$0xff]  ;;  %v10629_v55 = vld [vmem:[#allocation70_spill] sm:$0xff] }
 0x3d5   : > { %v3317_v53 = vpop.f32.mrf.mxu1  ;;  %3836 = vmatpush.bf16.msra.mxu1 %v7191_v23 }
 0x3d6   : > { %v3318_v48 = vadd.f32 %v3317_v53, %v3228_v19  ;;  %v9158_v17 = vadd.f32 %v3404_v49, %v3036_v33  ;;  %3002 = vmatmul.bf16.gmra.mxu3 %v9136_v14  ;;  %3267 = vmatmul.bf16.gmra.mxu0 %v8787_v57  ;;  %v7183_v19 = vld [vmem:[#allocation8 + $0x1c8] sm:$0xff]  ;;  %v10626_v33 = vshrl.u32 %v8790_v8, 16 }
 0x3d7   : > { %3747 = vmatpush.bf16.msra.mxu0 %v7183_v19 }
 0x3d8   : > { %3356 = vmatmul.bf16.gmra.mxu1 %v8761_v9  ;;  %3445 = vmatmul.bf16.gmra.mxu2 %v9156_v2  ;;  %v7228_v9 = vld [vmem:[#allocation10 + $0xf0] sm:$0xff]  ;;  %v2565_v53 = vor.u32 %v2564_v47, %v10626_v33  ;;  %v10630_v47 = vld [vmem:[#allocation33_spill] sm:$0xff] }
 0x3d9   : > { %v2963_v10 = vpop.f32.mrf.mxu3  ;;  %4644 = vmatpush.bf16.msra.mxu2 %v7228_v9  ;;  %v10631_v33 = vld [vmem:[#allocation69_spill] sm:$0xff] }
 0x3da   : > { %v2964_v28 = vadd.f32 %v2963_v10, %v10623_v40 }
 0x3db   : > { %v3406_v50 = vpop.f32.mrf.mxu2  ;;  %v3230_v61 = vpop.f32.mrf.mxu0 }
 0x3dc   : > { %v3407_v36 = vadd.f32 %v3406_v50, %v3318_v48  ;;  %v3037_v12 = vadd.f32 %v2964_v28, %v8778_v38  ;;  %v10627_v28 = vld [vmem:[#allocation32_spill] sm:$0xff] }
 0x3dd   : > { %v3319_v29 = vpop.f32.mrf.mxu1 }
 0x3de   : > { %v3320_v52 = vadd.f32 %v3319_v29, %v3230_v61  ;;  %v9168_v49 = vadd.f32 %v3407_v36, %v3037_v12  ;;  %v9176_v36 = vsel %vm7928_vm5, %v2565_v53, 0 }
 0x3e0   : > { %10625 = vst [vmem:[#allocation61_spill] sm:$0xff] %v9168_v49 }
 0x3e1   : > { %v2965_v59 = vpop.f32.mrf.mxu3 }
 0x3e2   : > { %v2966_v48 = vadd.f32 %v2965_v59, %v8783_v7 }
 0x3e3   : > { %v3408_v38 = vpop.f32.mrf.mxu2  ;;  %v3233_v40 = vpop.f32.mrf.mxu0 }
 0x3e4   : > { %v3409_v10 = vadd.f32 %v3408_v38, %v3320_v52  ;;  %v3038_v50 = vadd.f32 %v2966_v48, %v10627_v28  ;;  %v10632_v48 = vshll.u32 %v8819_v0, 16  ;;  %v10634_v28 = vshrl.u32 %v8819_v0, 16 }
 0x3e5   : > { %v3322_v61 = vpop.f32.mrf.mxu1 }
 0x3e6   : > { %v3323_v12 = vadd.f32 %v3322_v61, %v3233_v40  ;;  %v9178_v29 = vadd.f32 %v3409_v10, %v3038_v50  ;;  %3007 = vmatmul.bf16.gmra.mxu3 %v9156_v2  ;;  %3272 = vmatmul.bf16.gmra.mxu0 %v10629_v55  ;;  %v2566_v38 = vrot.slane %v10632_v48, 1  ;;  %v10635_v61 = vld [vmem:[#allocation26_spill] sm:$0xff] }
 0x3e8   : > { %10628 = vst [vmem:[#allocation62_spill] sm:$0xff] %v9178_v29  ;;  %3361 = vmatmul.bf16.gmra.mxu1 %v8790_v8  ;;  %3450 = vmatmul.bf16.gmra.mxu2 %v9176_v36  ;;  %v2567_v8 = vor.u32 %v2566_v38, %v10634_v28  ;;  %v10640_v28 = vld [vmem:[#allocation21_spill] sm:$0xff] }
 0x3e9   : > { %v2968_v7 = vpop.f32.mrf.mxu3 }
 0x3ea   : > { %v2969_v52 = vadd.f32 %v2968_v7, %v10630_v47 }
 0x3eb   : > { %v3411_v9 = vpop.f32.mrf.mxu2  ;;  %v3235_v23 = vpop.f32.mrf.mxu0 }
 0x3ec   : > { %v3412_v19 = vadd.f32 %v3411_v9, %v3323_v12  ;;  %v3039_v53 = vadd.f32 %v2969_v52, %v10631_v33  ;;  %v10636_v12 = vld [vmem:[#allocation28_spill] sm:$0xff]  ;;  %v9196_v52 = vsel %vm7928_vm5, %v2567_v8, 0  ;;  %v10641_v8 = vshll.u32 %v10640_v28, 16 }
 0x3ed   : > { %v3324_v59 = vpop.f32.mrf.mxu1  ;;  %10637 = vst [vmem:[#allocation64_spill] sm:$0xff] %v9196_v52 }
 0x3ee   : > { %v3325_v10 = vadd.f32 %v3324_v59, %v3235_v23  ;;  %v9188_v40 = vadd.f32 %v3412_v19, %v3039_v53 }
 0x3f0   : > { %10633 = vst [vmem:[#allocation63_spill] sm:$0xff] %v9188_v40 }
 0x3f1   : > { %v2970_v50 = vpop.f32.mrf.mxu3 }
 0x3f2   : > { %v2971_v29 = vadd.f32 %v2970_v50, %v10635_v61  ;;  %v2568_v50 = vrot.slane %v10641_v8, 1 }
 0x3f3   : > { %v3413_v49 = vpop.f32.mrf.mxu2  ;;  %v3238_v47 = vpop.f32.mrf.mxu0 }
 0x3f4   : > { %v3414_v7 = vadd.f32 %v3413_v49, %v3325_v10  ;;  %v3040_v9 = vadd.f32 %v2971_v29, %v10636_v12  ;;  %v7174_v49 = vld [vmem:[#allocation8 + $0x180] sm:$0xff]  ;;  %v10639_v29 = vld [vmem:[#allocation20_spill] sm:$0xff] }
 0x3f5   : > { %v3327_v55 = vpop.f32.mrf.mxu1  ;;  %3659 = vmatpush.bf16.msra.mxu3 %v7174_v49  ;;  %v7190_v12 = vld [vmem:[#allocation8 + $0x200] sm:$0xff] }
 0x3f6   : > { %v3328_v33 = vadd.f32 %v3327_v55, %v3238_v47  ;;  %v9198_v23 = vadd.f32 %v3414_v7, %v3040_v9  ;;  %3012 = vmatmul.bf16.gmra.mxu3 %v9176_v36  ;;  %3277 = vmatmul.bf16.gmra.mxu0 %v8845_v37  ;;  %v7182_v47 = vld [vmem:[#allocation8 + $0x1c0] sm:$0xff]  ;;  %v10643_v9 = vshrl.u32 %v10640_v28, 16 }
 0x3f7   : > { %3748 = vmatpush.bf16.msra.mxu0 %v7182_v47  ;;  %3837 = vmatpush.bf16.msra.mxu1 %v7190_v12  ;;  %v10649_v47 = vld [vmem:[#allocation24_spill] sm:$0xff] }
 0x3f8   : > { %10638 = vst [vmem:[#allocation65_spill] sm:$0xff] %v9198_v23  ;;  %3366 = vmatmul.bf16.gmra.mxu1 %v8819_v0  ;;  %3455 = vmatmul.bf16.gmra.mxu2 %v9196_v52  ;;  %v7227_v0 = vld [vmem:[#allocation10 + $0xe8] sm:$0xff]  ;;  %v2569_v49 = vor.u32 %v2568_v50, %v10643_v9 }
 0x3f9   : > { %v2973_v19 = vpop.f32.mrf.mxu3  ;;  %4645 = vmatpush.bf16.msra.mxu2 %v7227_v0  ;;  %v10648_v50 = vld [vmem:[#allocation71_spill] sm:$0xff] }
 0x3fa   : > { %v2974_v53 = vadd.f32 %v2973_v19, %v10639_v29 }
 0x3fb   : > { %v3416_v59 = vpop.f32.mrf.mxu2  ;;  %v3240_v38 = vpop.f32.mrf.mxu0 }
 0x3fc   : > { %v3417_v48 = vadd.f32 %v3416_v59, %v3328_v33  ;;  %v3041_v55 = vadd.f32 %v2974_v53, %v8836_v30  ;;  %v10644_v33 = vld [vmem:[#allocation30_spill] sm:$0xff] }
 0x3fd   : > { %v3329_v10 = vpop.f32.mrf.mxu1  ;;  %v10645_v59 = vld [vmem:[#allocation34_spill] sm:$0xff] }
 0x3fe   : > { %v3330_v61 = vadd.f32 %v3329_v10, %v3240_v38  ;;  %v9208_v7 = vadd.f32 %v3417_v48, %v3041_v55  ;;  %v9216_v48 = vsel %vm7928_vm5, %v2569_v49, 0  ;;  %v10650_v49 = vld [vmem:[#allocation22_spill] sm:$0xff] }
 0x3ff   : > { %10646 = vst [vmem:[#allocation66_spill] sm:$0xff] %v9216_v48 }
 0x400   : > { %10642 = vst [vmem:[#allocation31_spill] sm:$0xff] %v9208_v7 }
 0x401   : > { %v2975_v19 = vpop.f32.mrf.mxu3 }
 0x402   : > { %v2976_v29 = vadd.f32 %v2975_v19, %v10644_v33 }
 0x403   : > { %v3418_v30 = vpop.f32.mrf.mxu2  ;;  %v3243_v53 = vpop.f32.mrf.mxu0 }
 0x404   : > { %v3042_v23 = vadd.f32 %v2976_v29, %v10645_v59  ;;  %v3419_v8 = vadd.f32 %v3418_v30, %v3330_v61 }
 0x405   : > { %v3332_v38 = vpop.f32.mrf.mxu1 }
 0x406   : > { %v3333_v55 = vadd.f32 %v3332_v38, %v3243_v53  ;;  %v9218_v10 = vadd.f32 %v3419_v8, %v3042_v23  ;;  %3017 = vmatmul.bf16.gmra.mxu3 %v9196_v52  ;;  %3282 = vmatmul.bf16.gmra.mxu0 %v10648_v50  ;;  %v10651_v23 = vshll.u32 %v8877_v58, 16 }
 0x408   : > { %10647 = vst [vmem:[#allocation67_spill] sm:$0xff] %v9218_v10  ;;  %3371 = vmatmul.bf16.gmra.mxu1 %v10640_v28  ;;  %3460 = vmatmul.bf16.gmra.mxu2 %v9216_v48  ;;  %v2570_v30 = vrot.slane %v10651_v23, 1  ;;  %v10653_v28 = vshrl.u32 %v8877_v58, 16  ;;  %v10654_v10 = vld [vmem:[#allocation35_spill] sm:$0xff] }
 0x409   : > { %v2978_v0 = vpop.f32.mrf.mxu3 }
 0x40a   : > { %v2979_v61 = vadd.f32 %v2978_v0, %v10649_v47  ;;  %v2571_v8 = vor.u32 %v2570_v30, %v10653_v28  ;;  %v9234_v47 = vld [vmem:[%s7850_s16 + $0x78] sm:$0xff] }
 0x40b   : > { %v3421_v12 = vpop.f32.mrf.mxu2  ;;  %v3245_v19 = vpop.f32.mrf.mxu0 }
 0x40c   : > { %v3422_v9 = vadd.f32 %v3421_v12, %v3333_v55  ;;  %v3043_v33 = vadd.f32 %v2979_v61, %v10650_v49  ;;  %v10655_v55 = vld [vmem:[#allocation29_spill] sm:$0xff]  ;;  %v9239_v23 = vsel %vm7928_vm5, %v2571_v8, 0 }
 0x40d   : > { %v3334_v29 = vpop.f32.mrf.mxu1 }
 0x40e   : > { %v3335_v53 = vadd.f32 %v3334_v29, %v3245_v19  ;;  %v9228_v59 = vadd.f32 %v3422_v9, %v3043_v33  ;;  %v10657_v33 = vld [vmem:[#allocation36_spill] sm:$0xff] }
 0x410   : > { %10652 = vst [vmem:[#allocation68_spill] sm:$0xff] %v9228_v59 }
 0x411   : > { %v2980_v38 = vpop.f32.mrf.mxu3 }
 0x412   : > { %v2981_v7 = vadd.f32 %v2980_v38, %v10654_v10  ;;  %v2504_v10 = vshrl.u32 %v9234_v47, 16 }
 0x413   : > { %v3423_v50 = vpop.f32.mrf.mxu2  ;;  %v3248_v0 = vpop.f32.mrf.mxu0 }
 0x414   : > { %v3044_v12 = vadd.f32 %v2981_v7, %v10655_v55  ;;  %v3424_v61 = vadd.f32 %v3423_v50, %v3335_v53  ;;  %v2507_v7 = vshll.u32 %v9234_v47, 16  ;;  %v2506_v8 = vrot.slane %v2504_v10, 7 }
 0x415   : > { %v3337_v49 = vpop.f32.mrf.mxu1 }
 0x416   : > { %v3338_v9 = vadd.f32 %v3337_v49, %v3248_v0  ;;  %v9241_v19 = vadd.f32 %v3424_v61, %v3044_v12  ;;  %3022 = vmatmul.bf16.gmra.mxu3 %v9216_v48  ;;  %3287 = vmatmul.bf16.gmra.mxu0 %v8903_v51  ;;  %v2572_v55 = vrot.slane %v2507_v7, 1  ;;  %v2509_v49 = vor.u32 %v2507_v7, %v2506_v8  ;;  %v10658_v51 = vld [vmem:[#allocation25_spill] sm:$0xff] }
 0x418   : > { %10656 = vst [vmem:[#allocation32_spill] sm:$0xff] %v9241_v19  ;;  %3376 = vmatmul.bf16.gmra.mxu1 %v8877_v58  ;;  %3465 = vmatmul.bf16.gmra.mxu2 %v9239_v23  ;;  %v7226_v58 = vld [vmem:[#allocation10 + $0xe0] sm:$0xff]  ;;  %v2573_v19 = vor.u32 %v2572_v55, %v2504_v10 }
 0x419   : > { %v2983_v50 = vpop.f32.mrf.mxu3  ;;  %4646 = vmatpush.bf16.msra.mxu2 %v7226_v58 }
 0x41a   : > { %v2984_v29 = vadd.f32 %v2983_v50, %v10657_v33 }
 0x41b   : > { %v3426_v30 = vpop.f32.mrf.mxu2  ;;  %v3250_v28 = vpop.f32.mrf.mxu0 }
 0x41c   : > { %v3427_v53 = vadd.f32 %v3426_v30, %v3338_v9  ;;  %v3045_v38 = vadd.f32 %v2984_v29, %v8894_v44  ;;  %v9256_v9 = vsel %vm7924_vm4, 0, %v2509_v49  ;;  %v10660_v30 = vld [vmem:[#allocation37_spill] sm:$0xff] }
 0x41d   : > { %v3339_v0 = vpop.f32.mrf.mxu1 }
 0x41e   : > { %v3340_v12 = vadd.f32 %v3339_v0, %v3250_v28  ;;  %v9251_v61 = vadd.f32 %v3427_v53, %v3045_v38  ;;  %v9261_v53 = vsel %vm7928_vm5, %v2573_v19, 0 }
 0x421   : > { %v2985_v59 = vpop.f32.mrf.mxu3 }
 0x422   : > { %v2986_v48 = vadd.f32 %v2985_v59, %v10658_v51  ;;  %v10661_v59 = vld [vmem:[#allocation38_spill] sm:$0xff] }
 0x423   : > { %v3428_v40 = vpop.f32.mrf.mxu2  ;;  %v3253_v50 = vpop.f32.mrf.mxu0 }
 0x424   : > { %v3046_v44 = vadd.f32 %v2986_v48, %v10660_v30  ;;  %v3429_v29 = vadd.f32 %v3428_v40, %v3340_v12 }
 0x425   : > { %v3342_v52 = vpop.f32.mrf.mxu1 }
 0x426   : > { %v3343_v7 = vadd.f32 %v3342_v52, %v3253_v50  ;;  %v9263_v10 = vadd.f32 %v3429_v29, %v3046_v44  ;;  %3027 = vmatmul.bf16.gmra.mxu3 %v9239_v23  ;;  %3292 = vmatmul.bf16.gmra.mxu0 %v9256_v9 }
 0x428   : > { %3381 = vmatmul.bf16.gmra.mxu1 %v9234_v47  ;;  %3470 = vmatmul.bf16.gmra.mxu2 %v9261_v53 }
 0x429   : > { %v2988_v51 = vpop.f32.mrf.mxu3 }
 0x42a   : > { %v2989_v48 = vadd.f32 %v2988_v51, %v10661_v59  ;;  %v10662_v59 = vld [vmem:[#allocation27_spill] sm:$0xff] }
 0x42b   : > { %v3431_v40 = vpop.f32.mrf.mxu2  ;;  %v3255_v8 = vpop.f32.mrf.mxu0 }
 0x42c   : > { %v3432_v28 = vadd.f32 %v3431_v40, %v3343_v7  ;;  %v3047_v19 = vadd.f32 %v2989_v48, %v8918_v54  ;;  %v7399_v7 = vld [vmem:[%s7850_s16 + $0x8] sm:$0xff] }
 0x42d   : > { %v3344_v52 = vpop.f32.mrf.mxu1 }
 0x42e   : > { %v3345_v38 = vadd.f32 %v3344_v52, %v3255_v8  ;;  %v9271_v0 = vadd.f32 %v3432_v28, %v3047_v19 }
 0x431   : > { %v2990_v55 = vpop.f32.mrf.mxu3 }
 0x432   : > { %v2991_v12 = vadd.f32 %v2990_v55, %v8923_v3  ;;  %v10663_v55 = vld [vmem:[#allocation19_spill] sm:$0xff] }
 0x433   : > { %v3433_v58 = vpop.f32.mrf.mxu2  ;;  %v3258_v49 = vpop.f32.mrf.mxu0 }
 0x434   : > { %v3048_v50 = vadd.f32 %v2991_v12, %v8930_v63  ;;  %v3434_v30 = vadd.f32 %v3433_v58, %v3345_v38  ;;  %v7225_v38 = vld [vmem:[#allocation10 + $0xd8] sm:$0xff] }
 0x435   : > { %v3347_v44 = vpop.f32.mrf.mxu1  ;;  %4647 = vmatpush.bf16.msra.mxu2 %v7225_v38 }
 0x436   : > { %v3348_v29 = vadd.f32 %v3347_v44, %v3258_v49  ;;  %v9275_v51 = vadd.f32 %v3434_v30, %v3048_v50  ;;  %3660 = vmatmul.bf16.vlgmr.msra.gmra.mxu3 %v8539_v43  ;;  %3749 = vmatmul.bf16.vlgmr.msra.gmra.mxu0 %v7399_v7  ;;  %v10664_v49 = vld [vmem:[#allocation39_spill] sm:$0xff] }
 0x438   : > { %3838 = vmatmul.bf16.vlgmr.msra.gmra.mxu1 %v8948_v56 }
 0x439   : > { %v2993_v54 = vpop.f32.mrf.mxu3 }
 0x43a   : > { %v2994_v48 = vadd.f32 %v2993_v54, %v10662_v59 }
 0x43b   : > { %v3436_v40 = vpop.f32.mrf.mxu2  ;;  %v3260_v28 = vpop.f32.mrf.mxu0 }
 0x43c   : > { %v3437_v3 = vadd.f32 %v3436_v40, %v3348_v29  ;;  %v3049_v8 = vadd.f32 %v2994_v48, %v8939_v42  ;;  %v7400_v42 = vld [vmem:[%s7850_s16 + $0x10] sm:$0xff] }
 0x43d   : > { %v3349_v63 = vpop.f32.mrf.mxu1 }
 0x43e   : > { %v3350_v19 = vadd.f32 %v3349_v63, %v3260_v28  ;;  %v9282_v52 = vadd.f32 %v3437_v3, %v3049_v8 }
 0x441   : > { %v2995_v43 = vpop.f32.mrf.mxu3 }
 0x442   : > { %v2996_v12 = vadd.f32 %v2995_v43, %v10663_v55  ;;  %v10665_v43 = vld [vmem:[#allocation40_spill] sm:$0xff] }
 0x443   : > { %v3438_v58 = vpop.f32.mrf.mxu2  ;;  %v3263_v56 = vpop.f32.mrf.mxu0 }
 0x444   : > { %v3050_v50 = vadd.f32 %v2996_v12, %v10664_v49  ;;  %v3439_v30 = vadd.f32 %v3438_v58, %v3350_v19  ;;  %v10666_v58 = vld [vmem:[#allocation41_spill] sm:$0xff] }
 0x445   : > { %v3352_v44 = vpop.f32.mrf.mxu1 }
 0x446   : > { %v3353_v29 = vadd.f32 %v3352_v44, %v3263_v56  ;;  %v9286_v7 = vadd.f32 %v3439_v30, %v3050_v50  ;;  %3665 = vmatmul.bf16.gmra.mxu3 %v8566_v39  ;;  %3754 = vmatmul.bf16.gmra.mxu0 %v7400_v42  ;;  %v7401_v30 = vld [vmem:[%s7850_s16 + $0x18] sm:$0xff]  ;;  %v10667_v44 = vld [vmem:[#allocation42_spill] sm:$0xff] }
 0x448   : > { %3843 = vmatmul.bf16.gmra.mxu1 %v8971_v32 }
 0x449   : > { %v2998_v54 = vpop.f32.mrf.mxu3 }
 0x44a   : > { %v2999_v59 = vadd.f32 %v2998_v54, %v8957_v46 }
 0x44b   : > { %v3441_v48 = vpop.f32.mrf.mxu2  ;;  %v3265_v3 = vpop.f32.mrf.mxu0 }
 0x44c   : > { %v3442_v40 = vadd.f32 %v3441_v48, %v3353_v29  ;;  %v3051_v28 = vadd.f32 %v2999_v59, %v8962_v35  ;;  %v10668_v48 = vld [vmem:[#allocation43_spill] sm:$0xff] }
 0x44d   : > { %v3354_v8 = vpop.f32.mrf.mxu1 }
 0x44e   : > { %v3355_v63 = vadd.f32 %v3354_v8, %v3265_v3  ;;  %v9293_v19 = vadd.f32 %v3442_v40, %v3051_v28 }
 0x451   : > { %v3000_v38 = vpop.f32.mrf.mxu3 }
 0x452   : > { %v3001_v39 = vadd.f32 %v3000_v38, %v10665_v43  ;;  %v10669_v38 = vld [vmem:[#allocation44_spill] sm:$0xff] }
 0x453   : > { %v3443_v55 = vpop.f32.mrf.mxu2  ;;  %v3268_v12 = vpop.f32.mrf.mxu0 }
 0x454   : > { %v3052_v32 = vadd.f32 %v3001_v39, %v10666_v58  ;;  %v3444_v56 = vadd.f32 %v3443_v55, %v3355_v63  ;;  %v7224_v63 = vld [vmem:[#allocation10 + $0xd0] sm:$0xff]  ;;  %v10670_v55 = vld [vmem:[#allocation45_spill] sm:$0xff] }
 0x455   : > { %v3357_v49 = vpop.f32.mrf.mxu1  ;;  %4648 = vmatpush.bf16.msra.mxu2 %v7224_v63 }
 0x456   : > { %v3358_v46 = vadd.f32 %v3357_v49, %v3268_v12  ;;  %v9297_v50 = vadd.f32 %v3444_v56, %v3052_v32  ;;  %3670 = vmatmul.bf16.gmra.mxu3 %v8593_v26  ;;  %3759 = vmatmul.bf16.gmra.mxu0 %v7401_v30 }
 0x458   : > { %3848 = vmatmul.bf16.gmra.mxu1 %v8995_v24 }
 0x459   : > { %v3003_v35 = vpop.f32.mrf.mxu3 }
 0x45a   : > { %v3004_v29 = vadd.f32 %v3003_v35, %v10667_v44 }
 0x45b   : > { %v3446_v42 = vpop.f32.mrf.mxu2  ;;  %v3270_v59 = vpop.f32.mrf.mxu0 }
 0x45c   : > { %v3447_v54 = vadd.f32 %v3446_v42, %v3358_v46  ;;  %v3053_v40 = vadd.f32 %v3004_v29, %v10668_v48  ;;  %v7402_v46 = vld [vmem:[%s7850_s16 + $0x20] sm:$0xff] }
 0x45d   : > { %v3359_v3 = vpop.f32.mrf.mxu1 }
 0x45e   : > { %v3360_v28 = vadd.f32 %v3359_v3, %v3270_v59  ;;  %v9304_v8 = vadd.f32 %v3447_v54, %v3053_v40 }
 0x461   : > { %v3005_v26 = vpop.f32.mrf.mxu3 }
 0x462   : > { %v3006_v43 = vadd.f32 %v3005_v26, %v10669_v38  ;;  %v10672_v38 = vld [vmem:[#allocation47_spill] sm:$0xff] }
 0x463   : > { %v3448_v39 = vpop.f32.mrf.mxu2  ;;  %v3273_v24 = vpop.f32.mrf.mxu0 }
 0x464   : > { %v3054_v12 = vadd.f32 %v3006_v43, %v10670_v55  ;;  %v3449_v58 = vadd.f32 %v3448_v39, %v3360_v28  ;;  %v10671_v28 = vld [vmem:[#allocation46_spill] sm:$0xff] }
 0x465   : > { %v3362_v32 = vpop.f32.mrf.mxu1  ;;  %v10673_v55 = vld [vmem:[#allocation58_spill] sm:$0xff] }
 0x466   : > { %v3363_v56 = vadd.f32 %v3362_v32, %v3273_v24  ;;  %v9308_v49 = vadd.f32 %v3449_v58, %v3054_v12  ;;  %3675 = vmatmul.bf16.gmra.mxu3 %v8620_v41  ;;  %3764 = vmatmul.bf16.gmra.mxu0 %v7402_v46  ;;  %v7403_v12 = vld [vmem:[%s7850_s16 + $0x28] sm:$0xff]  ;;  %v10674_v58 = vld [vmem:[#allocation48_spill] sm:$0xff] }
 0x468   : > { %3853 = vmatmul.bf16.gmra.mxu1 %v9019_v27 }
 0x469   : > { %v3008_v30 = vpop.f32.mrf.mxu3 }
 0x46a   : > { %v3009_v35 = vadd.f32 %v3008_v30, %v9005_v13 }
 0x46b   : > { %v3451_v44 = vpop.f32.mrf.mxu2  ;;  %v3275_v42 = vpop.f32.mrf.mxu0 }
 0x46c   : > { %v3452_v29 = vadd.f32 %v3451_v44, %v3363_v56  ;;  %v3055_v54 = vadd.f32 %v3009_v35, %v9010_v15  ;;  %v10675_v35 = vld [vmem:[#allocation49_spill] sm:$0xff] }
 0x46d   : > { %v3364_v59 = vpop.f32.mrf.mxu1 }
 0x46e   : > { %v3365_v48 = vadd.f32 %v3364_v59, %v3275_v42  ;;  %v9315_v40 = vadd.f32 %v3452_v29, %v3055_v54  ;;  %v7223_v59 = vld [vmem:[#allocation10 + $0xc8] sm:$0xff] }
 0x46f   : > { %4649 = vmatpush.bf16.msra.mxu2 %v7223_v59 }
 0x471   : > { %v3010_v3 = vpop.f32.mrf.mxu3 }
 0x472   : > { %v3011_v41 = vadd.f32 %v3010_v3, %v10671_v28  ;;  %v10676_v3 = vld [vmem:[#allocation50_spill] sm:$0xff] }
 0x473   : > { %v3453_v63 = vpop.f32.mrf.mxu2  ;;  %v3278_v26 = vpop.f32.mrf.mxu0 }
 0x474   : > { %v3056_v27 = vadd.f32 %v3011_v41, %v10672_v38  ;;  %v3454_v43 = vadd.f32 %v3453_v63, %v3365_v48  ;;  %v10677_v63 = vld [vmem:[#allocation51_spill] sm:$0xff] }
 0x475   : > { %v3367_v39 = vpop.f32.mrf.mxu1 }
 0x476   : > { %v3368_v13 = vadd.f32 %v3367_v39, %v3278_v26  ;;  %v9319_v24 = vadd.f32 %v3454_v43, %v3056_v27  ;;  %3680 = vmatmul.bf16.gmra.mxu3 %v10673_v55  ;;  %3769 = vmatmul.bf16.gmra.mxu0 %v7403_v12 }
 0x478   : > { %3858 = vmatmul.bf16.gmra.mxu1 %v9043_v21 }
 0x479   : > { %v3013_v15 = vpop.f32.mrf.mxu3 }
 0x47a   : > { %v3014_v32 = vadd.f32 %v3013_v15, %v10674_v58 }
 0x47b   : > { %v3456_v56 = vpop.f32.mrf.mxu2  ;;  %v3280_v30 = vpop.f32.mrf.mxu0 }
 0x47c   : > { %v3457_v46 = vadd.f32 %v3456_v56, %v3368_v13  ;;  %v3057_v44 = vadd.f32 %v3014_v32, %v10675_v35  ;;  %v7404_v13 = vld [vmem:[%s7850_s16 + $0x30] sm:$0xff] }
 0x47d   : > { %v3369_v29 = vpop.f32.mrf.mxu1 }
 0x47e   : > { %v3370_v42 = vadd.f32 %v3369_v29, %v3280_v30  ;;  %v9326_v54 = vadd.f32 %v3457_v46, %v3057_v44  ;;  %v10678_v29 = vld [vmem:[#allocation52_spill] sm:$0xff] }
 0x481   : > { %v3015_v48 = vpop.f32.mrf.mxu3 }
 0x482   : > { %v3016_v28 = vadd.f32 %v3015_v48, %v10676_v3  ;;  %v10679_v48 = vld [vmem:[#allocation53_spill] sm:$0xff] }
 0x483   : > { %v3458_v41 = vpop.f32.mrf.mxu2  ;;  %v3283_v21 = vpop.f32.mrf.mxu0 }
 0x484   : > { %v3058_v26 = vadd.f32 %v3016_v28, %v10677_v63  ;;  %v3459_v38 = vadd.f32 %v3458_v41, %v3370_v42  ;;  %v10680_v63 = vld [vmem:[#allocation54_spill] sm:$0xff] }
 0x485   : > { %v3372_v27 = vpop.f32.mrf.mxu1 }
 0x486   : > { %v3373_v43 = vadd.f32 %v3372_v27, %v3283_v21  ;;  %v9330_v39 = vadd.f32 %v3459_v38, %v3058_v26  ;;  %3685 = vmatmul.bf16.gmra.mxu3 %v8674_v20  ;;  %3774 = vmatmul.bf16.gmra.mxu0 %v7404_v13  ;;  %v7405_v21 = vld [vmem:[%s7850_s16 + $0x38] sm:$0xff]  ;;  %v10681_v13 = vld [vmem:[#allocation55_spill] sm:$0xff] }
 0x488   : > { %3863 = vmatmul.bf16.gmra.mxu1 %v9067_v11 }
 0x489   : > { %v3018_v55 = vpop.f32.mrf.mxu3 }
 0x48a   : > { %v3019_v12 = vadd.f32 %v3018_v55, %v9053_v45 }
 0x48b   : > { %v3461_v15 = vpop.f32.mrf.mxu2  ;;  %v3285_v32 = vpop.f32.mrf.mxu0 }
 0x48c   : > { %v3462_v58 = vadd.f32 %v3461_v15, %v3373_v43  ;;  %v3059_v56 = vadd.f32 %v3019_v12, %v9058_v31 }
 0x48d   : > { %v3374_v46 = vpop.f32.mrf.mxu1 }
 0x48e   : > { %v3375_v30 = vadd.f32 %v3374_v46, %v3285_v32  ;;  %v9337_v35 = vadd.f32 %v3462_v58, %v3059_v56  ;;  %v10682_v56 = vld [vmem:[#allocation56_spill] sm:$0xff] }
 0x491   : > { %v3020_v44 = vpop.f32.mrf.mxu3 }
 0x492   : > { %v3021_v20 = vadd.f32 %v3020_v44, %v10678_v29  ;;  %v10683_v44 = vld [vmem:[#allocation57_spill] sm:$0xff] }
 0x493   : > { %v3463_v42 = vpop.f32.mrf.mxu2  ;;  %v3288_v59 = vpop.f32.mrf.mxu0 }
 0x494   : > { %v3060_v11 = vadd.f32 %v3021_v20, %v10679_v48  ;;  %v3464_v3 = vadd.f32 %v3463_v42, %v3375_v30  ;;  %v7406_v48 = vld [vmem:[%s7850_s16 + $0x40] sm:$0xff] }
 0x495   : > { %v3377_v28 = vpop.f32.mrf.mxu1 }
 0x496   : > { %v3378_v45 = vadd.f32 %v3377_v28, %v3288_v59  ;;  %v9341_v41 = vadd.f32 %v3464_v3, %v3060_v11  ;;  %3690 = vmatmul.bf16.gmra.mxu3 %v8701_v22  ;;  %3779 = vmatmul.bf16.gmra.mxu0 %v7405_v21  ;;  %v7222_v11 = vld [vmem:[#allocation10 + $0xc0] sm:$0xff] }
 0x497   : > { %4650 = vmatpush.bf16.msra.mxu2 %v7222_v11 }
 0x498   : > { %3868 = vmatmul.bf16.gmra.mxu1 %v9091_v16 }
 0x499   : > { %v3023_v31 = vpop.f32.mrf.mxu3 }
 0x49a   : > { %v3024_v26 = vadd.f32 %v3023_v31, %v10680_v63 }
 0x49b   : > { %v3466_v38 = vpop.f32.mrf.mxu2  ;;  %v3290_v43 = vpop.f32.mrf.mxu0 }
 0x49c   : > { %v3467_v27 = vadd.f32 %v3466_v38, %v3378_v45  ;;  %v3061_v55 = vadd.f32 %v3024_v26, %v10681_v13 }
 0x49d   : > { %v3379_v12 = vpop.f32.mrf.mxu1 }
 0x49e   : > { %v3380_v15 = vadd.f32 %v3379_v12, %v3290_v43  ;;  %v9348_v58 = vadd.f32 %v3467_v27, %v3061_v55  ;;  %v10684_v43 = vld [vmem:[#allocation59_spill] sm:$0xff] }
 0x4a1   : > { %v3025_v32 = vpop.f32.mrf.mxu3 }
 0x4a2   : > { %v3026_v22 = vadd.f32 %v3025_v32, %v10682_v56 }
 0x4a3   : > { %v3468_v46 = vpop.f32.mrf.mxu2  ;;  %v3293_v30 = vpop.f32.mrf.mxu0 }
 0x4a4   : > { %v3062_v16 = vadd.f32 %v3026_v22, %v10683_v44  ;;  %v3469_v29 = vadd.f32 %v3468_v46, %v3380_v15  ;;  %v7407_v22 = vld [vmem:[%s7850_s16 + $0x48] sm:$0xff] }
 0x4a5   : > { %v3382_v20 = vpop.f32.mrf.mxu1 }
 0x4a6   : > { %v3383_v42 = vadd.f32 %v3382_v20, %v3293_v30  ;;  %v9352_v59 = vadd.f32 %v3469_v29, %v3062_v16  ;;  %3695 = vmatmul.bf16.gmra.mxu3 %v8729_v5  ;;  %3784 = vmatmul.bf16.gmra.mxu0 %v7406_v48  ;;  %v9372_v20 = vld [vmem:[%s10287_s4] ss:$0 sm:$0xff] }
 0x4a8   : > { %3873 = vmatmul.bf16.gmra.mxu1 %v9115_v60  ;;  %v10685_v60 = vld [vmem:[#allocation60_spill] sm:$0xff] }
 0x4a9   : > { %v3028_v3 = vpop.f32.mrf.mxu3 }
 0x4aa   : > { %v3029_v28 = vadd.f32 %v3028_v3, %v9101_v62 }
 0x4ab   : > { %v3471_v45 = vpop.f32.mrf.mxu2  ;;  %v3295_v31 = vpop.f32.mrf.mxu0 }
 0x4ac   : > { %v3472_v21 = vadd.f32 %v3471_v45, %v3383_v42  ;;  %v3063_v63 = vadd.f32 %v3029_v28, %v9106_v34 }
 0x4ad   : > { %v3384_v26 = vpop.f32.mrf.mxu1 }
 0x4ae   : > { %v3385_v38 = vadd.f32 %v3384_v26, %v3295_v31  ;;  %v9359_v27 = vadd.f32 %v3472_v21, %v3063_v63  ;;  %v7408_v21 = vld [vmem:[%s7850_s16 + $0x50] sm:$0xff]  ;;  %v7213_v31 = vld [vmem:[#allocation10 + $0x78] sm:$0xff] }
 0x4af   : > { %v7245_v63 = vld [vmem:[#allocation10 + $0x178] sm:$0xff]  ;;  %5143 = vmatpush.bf16.msrb.mxu2 %v7213_v31 }
 0x4b0   : > { %v7205_v26 = vld [vmem:[#allocation10 + $0x38] sm:$0xff]  ;;  %4821 = vmatpush.bf16.msrb.mxu0 %v7245_v63 }
 0x4b1   : > { %v3030_v5 = vpop.f32.mrf.mxu3  ;;  %5054 = vmatpush.bf16.msrb.mxu1 %v7205_v26 }
 0x4b2   : > { %v3031_v13 = vadd.f32 %v3030_v5, %v10684_v43 }
 0x4b3   : > { %v3473_v55 = vpop.f32.mrf.mxu2  ;;  %v3750_v12 = vpop.f32.mrf.mxu0 }
 0x4b4   : > { %v3064_v15 = vadd.f32 %v3031_v13, %v10685_v60  ;;  %v3474_v32 = vadd.f32 %v3473_v55, %v3385_v38 }
 0x4b5   : > { %v3839_v56 = vpop.f32.mrf.mxu1 }
 0x4b6   : > { %v9363_v62 = vadd.f32 %v3474_v32, %v3064_v15  ;;  %3700 = vmatmul.bf16.gmra.mxu3 %v8758_v4  ;;  %3789 = vmatmul.bf16.gmra.mxu0 %v7407_v22 }
 0x4b8   : > { %3878 = vmatmul.bf16.gmra.mxu1 %v9136_v14 }
 0x4b9   : > { %v3661_v34 = vpop.f32.mrf.mxu3 }
 0x4ba   : > { %v3751_v46 = vadd.f32 %v3750_v12, %v3661_v34 }
 0x4bb   : > { %v3752_v30 = vpop.f32.mrf.mxu0 }
 0x4bc   : > { %v3840_v44 = vadd.f32 %v3839_v56, %v3751_v46 }
 0x4bd   : > { %v3841_v16 = vpop.f32.mrf.mxu1 }
 0x4be   : > { %v3919_v29 = vadd.f32 %v3840_v44, %v9128_v1  ;;  %v7237_v1 = vld [vmem:[#allocation10 + $0x138] sm:$0xff] }
 0x4bf   : > { %4732 = vmatpush.bf16.msrb.mxu3 %v7237_v1 }
 0x4c0   : > { %v3955_v4 = vadd.f32 %v9372_v20, %v3919_v29 }
 0x4c1   : > { %v3663_v42 = vpop.f32.mrf.mxu3 }
 0x4c2   : > { %v3753_v48 = vadd.f32 %v3752_v30, %v3663_v42  ;;  %v3987_v28 = vmax.f32 %v3955_v4, 0.0 }
 0x4c3   : > { %v3755_v11 = vpop.f32.mrf.mxu0 }
 0x4c4   : > { %v3842_v3 = vadd.f32 %v3841_v16, %v3753_v48  ;;  %v4019_v43 = vpack.c.bf16 %v3987_v28, %v3987_v28 }
 0x4c5   : > { %v3844_v14 = vpop.f32.mrf.mxu1 }
 0x4c6   : > { %v3920_v45 = vadd.f32 %v3842_v3, %v9138_v6  ;;  %3705 = vmatmul.bf16.gmra.mxu3 %v8787_v57  ;;  %3794 = vmatmul.bf16.gmra.mxu0 %v7408_v21  ;;  %v4227_v15 = vunpack.c.l.b16 %v4019_v43 }
 0x4c8   : > { %3883 = vmatmul.bf16.gmra.mxu1 %v9156_v2  ;;  %v3956_v38 = vadd.f32 %v9372_v20, %v3920_v45 }
 0x4c9   : > { %v3666_v5 = vpop.f32.mrf.mxu3 }
 0x4ca   : > { %v3988_v13 = vmax.f32 %v3956_v38, 0.0  ;;  %v3756_v6 = vadd.f32 %v3755_v11, %v3666_v5 }
 0x4cb   : > { %v3757_v55 = vpop.f32.mrf.mxu0 }
 0x4cc   : > { %v4020_v57 = vpack.c.bf16 %v3988_v13, %v3988_v13  ;;  %v3845_v12 = vadd.f32 %v3844_v14, %v3756_v6  ;;  %v10686_v14 = vld [vmem:[#allocation70_spill] sm:$0xff] }
 0x4cd   : > { %v3846_v60 = vpop.f32.mrf.mxu1 }
 0x4ce   : > { %v4228_v32 = vunpack.c.l.b16 %v4020_v57  ;;  %v3921_v2 = vadd.f32 %v3845_v12, %v9148_v18  ;;  %v7409_v18 = vld [vmem:[%s7850_s16 + $0x58] sm:$0xff] }
 0x4cf   : > { %v10687_v57 = vld [vmem:[#allocation61_spill] sm:$0xff] }
 0x4d0   : > { %v9381_v56 = vpack.c.b16 %v4228_v32, %v4227_v15  ;;  %v3957_v34 = vadd.f32 %v9372_v20, %v3921_v2 }
 0x4d1   : > { %v3668_v22 = vpop.f32.mrf.mxu3 }
 0x4d2   : > { %v3758_v46 = vadd.f32 %v3757_v55, %v3668_v22  ;;  %v4276_v30 = vshrl.u32 %v9381_v56, 16  ;;  %v4279_v44 = vshll.u32 %v9381_v56, 16  ;;  %v3989_v11 = vmax.f32 %v3957_v34, 0.0 }
 0x4d3   : > { %v3760_v16 = vpop.f32.mrf.mxu0 }
 0x4d4   : > { %v3847_v29 = vadd.f32 %v3846_v60, %v3758_v46  ;;  %v4278_v4 = vrot.slane %v4276_v30, 7  ;;  %v4419_v48 = vrot.slane %v4279_v44, 1  ;;  %v4021_v63 = vpack.c.bf16 %v3989_v11, %v3989_v11 }
 0x4d5   : > { %v3849_v42 = vpop.f32.mrf.mxu1 }
 0x4d6   : > { %v3922_v3 = vadd.f32 %v3847_v29, %v9158_v17  ;;  %3710 = vmatmul.bf16.gmra.mxu3 %v10686_v14  ;;  %3799 = vmatmul.bf16.gmra.mxu0 %v7409_v18  ;;  %v4281_v28 = vor.u32 %v4279_v44, %v4278_v4  ;;  %v9389_v45 = vor.u32 %v4419_v48, %v4276_v30  ;;  %v4229_v6 = vunpack.c.l.b16 %v4021_v63  ;;  %v7410_v48 = vld [vmem:[%s7850_s16 + $0x60] sm:$0xff]  ;;  %v7212_v14 = vld [vmem:[#allocation10 + $0x70] sm:$0xff] }
 0x4d7   : > { %v7244_v18 = vld [vmem:[#allocation10 + $0x170] sm:$0xff]  ;;  %5144 = vmatpush.bf16.msrb.mxu2 %v7212_v14  ;;  %v10692_v14 = vld [vmem:[#allocation71_spill] sm:$0xff] }
 0x4d8   : > { %3888 = vmatmul.bf16.gmra.mxu1 %v9176_v36  ;;  %v3958_v21 = vadd.f32 %v9372_v20, %v3922_v3  ;;  %v9395_v1 = vsel %vm7924_vm4, 0, %v4281_v28  ;;  %v7236_v3 = vld [vmem:[#allocation10 + $0x130] sm:$0xff]  ;;  %4822 = vmatpush.bf16.msrb.mxu0 %v7244_v18  ;;  %v7411_v18 = vld [vmem:[%s7850_s16 + $0x68] sm:$0xff] }
 0x4d9   : > { %v3671_v31 = vpop.f32.mrf.mxu3  ;;  %4651 = vmatmul.bf16.vlgmr.msra.gmra.mxu2 %v9395_v1  ;;  %4733 = vmatpush.bf16.msrb.mxu3 %v7236_v3 }
 0x4da   : > { %v3990_v17 = vmax.f32 %v3958_v21, 0.0  ;;  %v3761_v26 = vadd.f32 %v3760_v16, %v3671_v31  ;;  %v10689_v21 = vld [vmem:[#allocation64_spill] sm:$0xff] }
 0x4db   : > { %v3762_v38 = vpop.f32.mrf.mxu0  ;;  %v7204_v31 = vld [vmem:[#allocation10 + $0x30] sm:$0xff] }
 0x4dc   : > { %v4022_v5 = vpack.c.bf16 %v3990_v17, %v3990_v17  ;;  %v3850_v43 = vadd.f32 %v3849_v42, %v3761_v26  ;;  %v10688_v42 = vld [vmem:[#allocation62_spill] sm:$0xff]  ;;  %5055 = vmatpush.bf16.msrb.mxu1 %v7204_v31 }
 0x4dd   : > { %v3851_v13 = vpop.f32.mrf.mxu1 }
 0x4de   : > { %v4230_v55 = vunpack.c.l.b16 %v4022_v5  ;;  %v3923_v36 = vadd.f32 %v3850_v43, %v10687_v57 }
 0x4e0   : > { %v9399_v12 = vpack.c.b16 %v4230_v55, %v4229_v6  ;;  %v3959_v15 = vadd.f32 %v9372_v20, %v3923_v36 }
 0x4e1   : > { %v3673_v60 = vpop.f32.mrf.mxu3 }
 0x4e2   : > { %v3763_v32 = vadd.f32 %v3762_v38, %v3673_v60  ;;  %v4283_v2 = vshrl.u32 %v9399_v12, 16  ;;  %v4286_v22 = vshll.u32 %v9399_v12, 16  ;;  %v3991_v29 = vmax.f32 %v3959_v15, 0.0  ;;  %v10690_v60 = vld [vmem:[#allocation63_spill] sm:$0xff] }
 0x4e3   : > { %v3765_v34 = vpop.f32.mrf.mxu0 }
 0x4e4   : > { %v3852_v46 = vadd.f32 %v3851_v13, %v3763_v32  ;;  %v4285_v44 = vrot.slane %v4283_v2, 7  ;;  %v4421_v16 = vrot.slane %v4286_v22, 1  ;;  %v4023_v26 = vpack.c.bf16 %v3991_v29, %v3991_v29 }
 0x4e5   : > { %v3854_v30 = vpop.f32.mrf.mxu1 }
 0x4e6   : > { %v3924_v4 = vadd.f32 %v3852_v46, %v10688_v42  ;;  %3715 = vmatmul.bf16.gmra.mxu3 %v8845_v37  ;;  %3804 = vmatmul.bf16.gmra.mxu0 %v7410_v48  ;;  %v4288_v11 = vor.u32 %v4286_v22, %v4285_v44  ;;  %v9407_v28 = vor.u32 %v4421_v16, %v4283_v2  ;;  %v4231_v57 = vunpack.c.l.b16 %v4023_v26 }
 0x4e8   : > { %3893 = vmatmul.bf16.gmra.mxu1 %v10689_v21  ;;  %v3960_v63 = vadd.f32 %v9372_v20, %v3924_v4  ;;  %v9413_v17 = vsel %vm7924_vm4, 0, %v4288_v11  ;;  %v10691_v11 = vld [vmem:[#allocation65_spill] sm:$0xff] }
 0x4e9   : > { %v3676_v37 = vpop.f32.mrf.mxu3  ;;  %4656 = vmatmul.bf16.gmra.mxu2 %v9413_v17 }
 0x4ea   : > { %v3992_v38 = vmax.f32 %v3960_v63, 0.0  ;;  %v3766_v5 = vadd.f32 %v3765_v34, %v3676_v37  ;;  %v10693_v63 = vld [vmem:[#allocation66_spill] sm:$0xff] }
 0x4eb   : > { %v3767_v43 = vpop.f32.mrf.mxu0 }
 0x4ec   : > { %v4024_v13 = vpack.c.bf16 %v3992_v38, %v3992_v38  ;;  %v3855_v6 = vadd.f32 %v3854_v30, %v3766_v5 }
 0x4ed   : > { %v3856_v55 = vpop.f32.mrf.mxu1 }
 0x4ee   : > { %v4232_v36 = vunpack.c.l.b16 %v4024_v13  ;;  %v3925_v15 = vadd.f32 %v3855_v6, %v10690_v60 }
 0x4f0   : > { %v9417_v32 = vpack.c.b16 %v4232_v36, %v4231_v57  ;;  %v3961_v22 = vadd.f32 %v9372_v20, %v3925_v15 }
 0x4f1   : > { %v3678_v2 = vpop.f32.mrf.mxu3 }
 0x4f2   : > { %v3768_v46 = vadd.f32 %v3767_v43, %v3678_v2  ;;  %v4290_v44 = vshrl.u32 %v9417_v32, 16  ;;  %v4293_v34 = vshll.u32 %v9417_v32, 16  ;;  %v3993_v48 = vmax.f32 %v3961_v22, 0.0  ;;  %v10695_v2 = vld [vmem:[#allocation31_spill] sm:$0xff] }
 0x4f3   : > { %v3770_v16 = vpop.f32.mrf.mxu0 }
 0x4f4   : > { %v3857_v29 = vadd.f32 %v3856_v55, %v3768_v46  ;;  %v4292_v30 = vrot.slane %v4290_v44, 7  ;;  %v4423_v4 = vrot.slane %v4293_v34, 1  ;;  %v4025_v5 = vpack.c.bf16 %v3993_v48, %v3993_v48  ;;  %v7235_v46 = vld [vmem:[#allocation10 + $0x128] sm:$0xff] }
 0x4f5   : > { %v3859_v42 = vpop.f32.mrf.mxu1  ;;  %4734 = vmatpush.bf16.msrb.mxu3 %v7235_v46 }
 0x4f6   : > { %v3926_v3 = vadd.f32 %v3857_v29, %v10691_v11  ;;  %3720 = vmatmul.bf16.gmra.mxu3 %v10692_v14  ;;  %3809 = vmatmul.bf16.gmra.mxu0 %v7411_v18  ;;  %v4295_v21 = vor.u32 %v4293_v34, %v4292_v30  ;;  %v9425_v31 = vor.u32 %v4423_v4, %v4290_v44  ;;  %v4233_v60 = vunpack.c.l.b16 %v4025_v5  ;;  %v7243_v44 = vld [vmem:[#allocation10 + $0x168] sm:$0xff]  ;;  %v7234_v11 = vld [vmem:[#allocation10 + $0x120] sm:$0xff] }
 0x4f7   : > { %v7203_v34 = vld [vmem:[#allocation10 + $0x28] sm:$0xff]  ;;  %4823 = vmatpush.bf16.msrb.mxu0 %v7243_v44  ;;  %v7202_v14 = vld [vmem:[#allocation10 + $0x20] sm:$0xff] }
 0x4f8   : > { %3898 = vmatmul.bf16.gmra.mxu1 %v10693_v63  ;;  %v3962_v37 = vadd.f32 %v9372_v20, %v3926_v3  ;;  %v9431_v26 = vsel %vm7924_vm4, 0, %v4295_v21  ;;  %v7242_v3 = vld [vmem:[#allocation10 + $0x160] sm:$0xff] }
 0x4f9   : > { %10694 = vst [vmem:[#allocation33_spill] sm:$0xff] %v9431_v26  ;;  %v3681_v38 = vpop.f32.mrf.mxu3  ;;  %4661 = vmatmul.bf16.gmra.mxu2 %v9431_v26  ;;  %5056 = vmatpush.bf16.msrb.mxu1 %v7203_v34 }
 0x4fa   : > { %v3994_v43 = vmax.f32 %v3962_v37, 0.0  ;;  %v3771_v13 = vadd.f32 %v3770_v16, %v3681_v38  ;;  %4735 = vmatpush.bf16.msrb.mxu3 %v7234_v11 }
 0x4fb   : > { %v3772_v6 = vpop.f32.mrf.mxu0  ;;  %4824 = vmatpush.bf16.msrb.mxu0 %v7242_v3 }
 0x4fc   : > { %v4026_v55 = vpack.c.bf16 %v3994_v43, %v3994_v43  ;;  %v3860_v57 = vadd.f32 %v3859_v42, %v3771_v13  ;;  %v10696_v43 = vld [vmem:[#allocation67_spill] sm:$0xff] }
 0x4fd   : > { %v3861_v36 = vpop.f32.mrf.mxu1  ;;  %5057 = vmatpush.bf16.msrb.mxu1 %v7202_v14 }
 0x4fe   : > { %v4234_v15 = vunpack.c.l.b16 %v4026_v55  ;;  %v3927_v22 = vadd.f32 %v3860_v57, %v10695_v2  ;;  %v7412_v55 = vld [vmem:[%s7850_s16 + $0x70] sm:$0xff]  ;;  %v7241_v2 = vld [vmem:[#allocation10 + $0x158] sm:$0xff] }
 0x4ff   : > { %4825 = vmatpush.bf16.msrb.mxu0 %v7241_v2 }
 0x500   : > { %v9435_v29 = vpack.c.b16 %v4234_v15, %v4233_v60  ;;  %v3963_v4 = vadd.f32 %v9372_v20, %v3927_v22  ;;  %v7211_v60 = vld [vmem:[#allocation10 + $0x68] sm:$0xff]  ;;  %v7233_v15 = vld [vmem:[#allocation10 + $0x118] sm:$0xff] }
 0x501   : > { %v3683_v30 = vpop.f32.mrf.mxu3  ;;  %5145 = vmatpush.bf16.msrb.mxu2 %v7211_v60  ;;  %4736 = vmatpush.bf16.msrb.mxu3 %v7233_v15 }
 0x502   : > { %v3773_v16 = vadd.f32 %v3772_v6, %v3683_v30  ;;  %v4297_v48 = vshrl.u32 %v9435_v29, 16  ;;  %v4300_v42 = vshll.u32 %v9435_v29, 16  ;;  %v3995_v5 = vmax.f32 %v3963_v4, 0.0  ;;  %v10697_v6 = vld [vmem:[#allocation23_spill] sm:$0xff] }
 0x503   : > { %v3775_v18 = vpop.f32.mrf.mxu0 }
 0x504   : > { %v3862_v21 = vadd.f32 %v3861_v36, %v3773_v16  ;;  %v4299_v37 = vrot.slane %v4297_v48, 7  ;;  %v4425_v38 = vrot.slane %v4300_v42, 1  ;;  %v7201_v36 = vld [vmem:[#allocation10 + $0x18] sm:$0xff]  ;;  %v4027_v30 = vpack.c.bf16 %v3995_v5, %v3995_v5  ;;  %v7199_v5 = vld [vmem:[#allocation10 + $0x8] sm:$0xff] }
 0x505   : > { %v3864_v63 = vpop.f32.mrf.mxu1  ;;  %5058 = vmatpush.bf16.msrb.mxu1 %v7201_v36  ;;  %v7230_v36 = vld [vmem:[#allocation10 + $0x100] sm:$0xff] }
 0x506   : > { %v3928_v13 = vadd.f32 %v3862_v21, %v10696_v43  ;;  %3725 = vmatmul.bf16.gmra.mxu3 %v10697_v6  ;;  %3814 = vmatmul.bf16.gmra.mxu0 %v7412_v55  ;;  %v4302_v57 = vor.u32 %v4300_v42, %v4299_v37  ;;  %v9443_v22 = vor.u32 %v4425_v38, %v4297_v48  ;;  %v7232_v48 = vld [vmem:[#allocation10 + $0x110] sm:$0xff]  ;;  %v4235_v37 = vunpack.c.l.b16 %v4027_v30  ;;  %v7231_v6 = vld [vmem:[#allocation10 + $0x108] sm:$0xff] }
 0x507   : > { %v7240_v42 = vld [vmem:[#allocation10 + $0x150] sm:$0xff]  ;;  %4737 = vmatpush.bf16.msrb.mxu3 %v7232_v48  ;;  %v7239_v55 = vld [vmem:[#allocation10 + $0x148] sm:$0xff]  ;;  %v7198_v48 = vld [vmem:[#allocation10] sm:$0xff] }
 0x508   : > { %3903 = vmatmul.bf16.gmra.mxu1 %v9239_v23  ;;  %v3964_v46 = vadd.f32 %v9372_v20, %v3928_v13  ;;  %v9449_v44 = vsel %vm7924_vm4, 0, %v4302_v57  ;;  %v7200_v23 = vld [vmem:[#allocation10 + $0x10] sm:$0xff]  ;;  %4826 = vmatpush.bf16.msrb.mxu0 %v7240_v42 }
 0x509   : > { %10698 = vst [vmem:[#allocation69_spill] sm:$0xff] %v9449_v44  ;;  %v3686_v34 = vpop.f32.mrf.mxu3  ;;  %4666 = vmatmul.bf16.gmra.mxu2 %v9449_v44  ;;  %v10699_v43 = vld [vmem:[#allocation68_spill] sm:$0xff]  ;;  %5059 = vmatpush.bf16.msrb.mxu1 %v7200_v23 }
 0x50a   : > { %v3996_v4 = vmax.f32 %v3964_v46, 0.0  ;;  %v3776_v16 = vadd.f32 %v3775_v18, %v3686_v34  ;;  %v7238_v46 = vld [vmem:[#allocation10 + $0x140] sm:$0xff] }
 0x50b   : > { %v3777_v11 = vpop.f32.mrf.mxu0  ;;  %4738 = vmatpush.bf16.msrb.mxu3 %v7231_v6 }
 0x50c   : > { %v4028_v3 = vpack.c.bf16 %v3996_v4, %v3996_v4  ;;  %v3865_v14 = vadd.f32 %v3864_v63, %v3776_v16  ;;  %4827 = vmatpush.bf16.msrb.mxu0 %v7239_v55 }
 0x50d   : > { %v3866_v21 = vpop.f32.mrf.mxu1  ;;  %5060 = vmatpush.bf16.msrb.mxu1 %v7199_v5 }
 0x50e   : > { %v4236_v38 = vunpack.c.l.b16 %v4028_v3  ;;  %v3929_v13 = vadd.f32 %v3865_v14, %v10699_v43  ;;  %v10700_v3 = vld [vmem:[#allocation32_spill] sm:$0xff] }
 0x50f   : > { %4739 = vmatpush.bf16.msrb.mxu3 %v7230_v36 }
 0x510   : > { %v9453_v57 = vpack.c.b16 %v4236_v38, %v4235_v37  ;;  %v3965_v60 = vadd.f32 %v9372_v20, %v3929_v13  ;;  %4828 = vmatpush.bf16.msrb.mxu0 %v7238_v46 }
 0x511   : > { %v3688_v18 = vpop.f32.mrf.mxu3  ;;  %5061 = vmatpush.bf16.msrb.mxu1 %v7198_v48 }
 0x512   : > { %v3778_v15 = vadd.f32 %v3777_v11, %v3688_v18  ;;  %v4304_v63 = vshrl.u32 %v9453_v57, 16  ;;  %v4307_v2 = vshll.u32 %v9453_v57, 16  ;;  %v3997_v23 = vmax.f32 %v3965_v60, 0.0 }
 0x513   : > { %v3780_v34 = vpop.f32.mrf.mxu0 }
 0x514   : > { %v3867_v30 = vadd.f32 %v3866_v21, %v3778_v15  ;;  %v4306_v16 = vrot.slane %v4304_v63, 7  ;;  %v4427_v42 = vrot.slane %v4307_v2, 1  ;;  %v4029_v13 = vpack.c.bf16 %v3997_v23, %v3997_v23 }
 0x515   : > { %v3869_v4 = vpop.f32.mrf.mxu1 }
 0x516   : > { %v3930_v14 = vadd.f32 %v3867_v30, %v10700_v3  ;;  %3730 = vmatmul.bf16.gmra.mxu3 %v9256_v9  ;;  %3819 = vmatmul.bf16.gmra.mxu0 %v9234_v47  ;;  %v4309_v11 = vor.u32 %v4307_v2, %v4306_v16  ;;  %v9461_v37 = vor.u32 %v4427_v42, %v4304_v63  ;;  %v4237_v60 = vunpack.c.l.b16 %v4029_v13 }
 0x518   : > { %3908 = vmatmul.bf16.gmra.mxu1 %v9261_v53  ;;  %v3966_v21 = vadd.f32 %v9372_v20, %v3930_v14  ;;  %v9467_v38 = vsel %vm7924_vm4, 0, %v4309_v11  ;;  %v10702_v11 = vmov 0  }
 0x519   : > { %10701 = vst [vmem:[#allocation26_spill] sm:$0xff] %v9467_v38  ;;  %v3691_v43 = vpop.f32.mrf.mxu3  ;;  %4671 = vmatmul.bf16.gmra.mxu2 %v9467_v38 }
 0x51a   : > { %v3998_v6 = vmax.f32 %v3966_v21, 0.0  ;;  %v3781_v9 = vadd.f32 %v3780_v34, %v3691_v43  ;;  %v7210_v21 = vld [vmem:[#allocation10 + $0x60] sm:$0xff] }
 0x51b   : > { %v3782_v55 = vpop.f32.mrf.mxu0  ;;  %5146 = vmatpush.bf16.msrb.mxu2 %v7210_v21  ;;  %v9497_v21 = vsel %vm7928_vm5, %v9389_v45, 0 }
 0x51c   : > { %v4030_v47 = vpack.c.bf16 %v3998_v6, %v3998_v6  ;;  %v3870_v5 = vadd.f32 %v3869_v4, %v3781_v9 }
 0x51d   : > { %v3871_v18 = vpop.f32.mrf.mxu1 }
 0x51e   : > { %v4238_v15 = vunpack.c.l.b16 %v4030_v47  ;;  %v3931_v53 = vadd.f32 %v3870_v5, %v9251_v61 }
 0x520   : > { %v9471_v63 = vpack.c.b16 %v4238_v15, %v4237_v60  ;;  %v3967_v36 = vadd.f32 %v9372_v20, %v3931_v53 }
 0x521   : > { %v3693_v2 = vpop.f32.mrf.mxu3 }
 0x522   : > { %v3783_v46 = vadd.f32 %v3782_v55, %v3693_v2  ;;  %v4311_v30 = vshrl.u32 %v9471_v63, 16  ;;  %v4314_v16 = vshll.u32 %v9471_v63, 16  ;;  %v3999_v3 = vmax.f32 %v3967_v36, 0.0 }
 0x523   : > { %v3785_v48 = vpop.f32.mrf.mxu0 }
 0x524   : > { %v3872_v34 = vadd.f32 %v3871_v18, %v3783_v46  ;;  %v4313_v23 = vrot.slane %v4311_v30, 7  ;;  %v4429_v4 = vrot.slane %v4314_v16, 1 }
 0x525   : > { %v3874_v42 = vpop.f32.mrf.mxu1 }
 0x526   : > { %v3932_v14 = vadd.f32 %v3872_v34, %v9263_v10  ;;  %3735 = vmatmul.bf16.gmra.mxu3 %v10702_v11  ;;  %3824 = vmatmul.bf16.gmra.mxu0 %v10702_v11  ;;  %v4316_v61 = vor.u32 %v4314_v16, %v4313_v23  ;;  %v9479_v43 = vor.u32 %v4429_v4, %v4311_v30 }
 0x527   : > { %v4031_v10 = vpack.c.bf16 %v3999_v3, %v3999_v3 }
 0x528   : > { %3913 = vmatmul.bf16.gmra.mxu1 %v10702_v11  ;;  %v3968_v13 = vadd.f32 %v9372_v20, %v3932_v14  ;;  %v9485_v6 = vsel %vm7924_vm4, 0, %v4316_v61 }
 0x529   : > { %10703 = vst [vmem:[#allocation28_spill] sm:$0xff] %v9485_v6  ;;  %v3696_v9 = vpop.f32.mrf.mxu3  ;;  %4676 = vmatmul.bf16.gmra.mxu2 %v9485_v6  ;;  %v4239_v53 = vunpack.c.l.b16 %v4031_v10 }
 0x52a   : > { %v4000_v55 = vmax.f32 %v3968_v13, 0.0  ;;  %v3786_v47 = vadd.f32 %v3785_v48, %v3696_v9 }
 0x52b   : > { %v3787_v5 = vpop.f32.mrf.mxu0 }
 0x52c   : > { %v4032_v18 = vpack.c.bf16 %v4000_v55, %v4000_v55  ;;  %v3875_v60 = vadd.f32 %v3874_v42, %v3786_v47 }
 0x52d   : > { %v3876_v15 = vpop.f32.mrf.mxu1 }
 0x52e   : > { %v4240_v2 = vunpack.c.l.b16 %v4032_v18  ;;  %v3933_v36 = vadd.f32 %v3875_v60, %v9271_v0 }
 0x530   : > { %v9489_v46 = vpack.c.b16 %v4240_v2, %v4239_v53  ;;  %v3969_v16 = vadd.f32 %v9372_v20, %v3933_v36 }
 0x531   : > { %v3698_v30 = vpop.f32.mrf.mxu3 }
 0x532   : > { %10704 = vst [vmem:[#allocation20_spill] sm:$0xff] %v9489_v46  ;;  %v3788_v34 = vadd.f32 %v3787_v5, %v3698_v30  ;;  %v4318_v23 = vshrl.u32 %v9489_v46, 16  ;;  %v4321_v4 = vshll.u32 %v9489_v46, 16  ;;  %v4001_v0 = vmax.f32 %v3969_v16, 0.0 }
 0x533   : > { %v3790_v3 = vpop.f32.mrf.mxu0 }
 0x534   : > { %v3877_v48 = vadd.f32 %v3876_v15, %v3788_v34  ;;  %v4320_v61 = vrot.slane %v4318_v23, 7  ;;  %v4431_v42 = vrot.slane %v4321_v4, 1  ;;  %v4033_v5 = vpack.c.bf16 %v4001_v0, %v4001_v0 }
 0x535   : > { %v3879_v14 = vpop.f32.mrf.mxu1 }
 0x536   : > { %v3934_v13 = vadd.f32 %v3877_v48, %v9275_v51  ;;  %4740 = vmatmul.bf16.vlgmr.msrb.gmra.mxu3 %v9381_v56  ;;  %4829 = vmatmul.bf16.vlgmr.msrb.gmra.mxu0 %v9497_v21  ;;  %v4323_v9 = vor.u32 %v4321_v4, %v4320_v61  ;;  %v9502_v10 = vor.u32 %v4431_v42, %v4318_v23  ;;  %v4241_v36 = vunpack.c.l.b16 %v4033_v5 }
 0x538   : > { %5062 = vmatmul.bf16.vlgmr.msrb.gmra.mxu1 %v10702_v11  ;;  %v3970_v55 = vadd.f32 %v9372_v20, %v3934_v13  ;;  %v9508_v47 = vsel %vm7924_vm4, 0, %v4323_v9 }
 0x539   : > { %10705 = vst [vmem:[#allocation21_spill] sm:$0xff] %v9508_v47  ;;  %v3701_v45 = vpop.f32.mrf.mxu3  ;;  %4681 = vmatmul.bf16.gmra.mxu2 %v9508_v47 }
 0x53a   : > { %v4002_v51 = vmax.f32 %v3970_v55, 0.0  ;;  %v3791_v18 = vadd.f32 %v3790_v3, %v3701_v45  ;;  %v9520_v55 = vsel %vm7928_vm5, %v9407_v28, 0 }
 0x53b   : > { %v3792_v60 = vpop.f32.mrf.mxu0  ;;  %10707 = vst [vmem:[#allocation34_spill] sm:$0xff] %v9520_v55 }
 0x53c   : > { %v4034_v15 = vpack.c.bf16 %v4002_v51, %v4002_v51  ;;  %v3880_v53 = vadd.f32 %v3879_v14, %v3791_v18  ;;  %v7209_v51 = vld [vmem:[#allocation10 + $0x58] sm:$0xff] }
 0x53d   : > { %v3881_v2 = vpop.f32.mrf.mxu1  ;;  %5147 = vmatpush.bf16.msrb.mxu2 %v7209_v51 }
 0x53e   : > { %v4242_v30 = vunpack.c.l.b16 %v4034_v15  ;;  %v3935_v16 = vadd.f32 %v3880_v53, %v9282_v52 }
 0x540   : > { %v9512_v34 = vpack.c.b16 %v4242_v30, %v4241_v36  ;;  %v3971_v4 = vadd.f32 %v9372_v20, %v3935_v16 }
 0x541   : > { %v3703_v23 = vpop.f32.mrf.mxu3 }
 0x542   : > { %10706 = vst [vmem:[#allocation30_spill] sm:$0xff] %v9512_v34  ;;  %v3793_v48 = vadd.f32 %v3792_v60, %v3703_v23  ;;  %v4325_v61 = vshrl.u32 %v9512_v34, 16  ;;  %v4328_v42 = vshll.u32 %v9512_v34, 16  ;;  %v4003_v52 = vmax.f32 %v3971_v4, 0.0 }
 0x543   : > { %v3795_v0 = vpop.f32.mrf.mxu0 }
 0x544   : > { %v3882_v3 = vadd.f32 %v3881_v2, %v3793_v48  ;;  %v4327_v9 = vrot.slane %v4325_v61, 7  ;;  %v4433_v14 = vrot.slane %v4328_v42, 1 }
 0x545   : > { %v3884_v13 = vpop.f32.mrf.mxu1 }
 0x546   : > { %v3936_v45 = vadd.f32 %v3882_v3, %v9286_v7  ;;  %4745 = vmatmul.bf16.gmra.mxu3 %v9399_v12  ;;  %4834 = vmatmul.bf16.gmra.mxu0 %v9520_v55  ;;  %v4330_v5 = vor.u32 %v4328_v42, %v4327_v9  ;;  %v9525_v18 = vor.u32 %v4433_v14, %v4325_v61 }
 0x547   : > { %v4035_v7 = vpack.c.bf16 %v4003_v52, %v4003_v52 }
 0x548   : > { %5067 = vmatmul.bf16.gmra.mxu1 %v9395_v1  ;;  %v3972_v60 = vadd.f32 %v9372_v20, %v3936_v45  ;;  %v9531_v15 = vsel %vm7924_vm4, 0, %v4330_v5 }
 0x549   : > { %10708 = vst [vmem:[#allocation24_spill] sm:$0xff] %v9531_v15  ;;  %v3706_v28 = vpop.f32.mrf.mxu3  ;;  %4686 = vmatmul.bf16.gmra.mxu2 %v9531_v15  ;;  %v4243_v4 = vunpack.c.l.b16 %v4035_v7 }
 0x54a   : > { %v4004_v53 = vmax.f32 %v3972_v60, 0.0  ;;  %v3796_v2 = vadd.f32 %v3795_v0, %v3706_v28  ;;  %v9543_v60 = vsel %vm7928_vm5, %v9425_v31, 0 }
 0x54b   : > { %v3797_v36 = vpop.f32.mrf.mxu0  ;;  %10709 = vst [vmem:[#allocation22_spill] sm:$0xff] %v9543_v60 }
 0x54c   : > { %v4036_v30 = vpack.c.bf16 %v4004_v53, %v4004_v53  ;;  %v3885_v16 = vadd.f32 %v3884_v13, %v3796_v2 }
 0x54d   : > { %v3886_v23 = vpop.f32.mrf.mxu1 }
 0x54e   : > { %v4244_v48 = vunpack.c.l.b16 %v4036_v30  ;;  %v3937_v1 = vadd.f32 %v3885_v16, %v9293_v19 }
 0x550   : > { %v9535_v61 = vpack.c.b16 %v4244_v48, %v4243_v4  ;;  %v3973_v3 = vadd.f32 %v9372_v20, %v3937_v1 }
 0x551   : > { %v3708_v42 = vpop.f32.mrf.mxu3 }
 0x552   : > { %v3798_v9 = vadd.f32 %v3797_v36, %v3708_v42  ;;  %v4332_v14 = vshrl.u32 %v9535_v61, 16  ;;  %v4335_v52 = vshll.u32 %v9535_v61, 16  ;;  %v4005_v19 = vmax.f32 %v3973_v3, 0.0 }
 0x553   : > { %v3800_v45 = vpop.f32.mrf.mxu0 }
 0x554   : > { %v3887_v0 = vadd.f32 %v3886_v23, %v3798_v9  ;;  %v4334_v51 = vrot.slane %v4332_v14, 7  ;;  %v4435_v13 = vrot.slane %v4335_v52, 1  ;;  %v4037_v30 = vpack.c.bf16 %v4005_v19, %v4005_v19 }
 0x555   : > { %v3889_v5 = vpop.f32.mrf.mxu1 }
 0x556   : > { %v3938_v28 = vadd.f32 %v3887_v0, %v9297_v50  ;;  %4750 = vmatmul.bf16.gmra.mxu3 %v9417_v32  ;;  %4839 = vmatmul.bf16.gmra.mxu0 %v9543_v60  ;;  %v4337_v7 = vor.u32 %v4335_v52, %v4334_v51  ;;  %v9548_v53 = vor.u32 %v4435_v13, %v4332_v14  ;;  %v4245_v3 = vunpack.c.l.b16 %v4037_v30 }
 0x558   : > { %5072 = vmatmul.bf16.gmra.mxu1 %v9413_v17  ;;  %v3974_v2 = vadd.f32 %v9372_v20, %v3938_v28  ;;  %v9554_v36 = vsel %vm7924_vm4, 0, %v4337_v7 }
 0x559   : > { %v3711_v31 = vpop.f32.mrf.mxu3  ;;  %4691 = vmatmul.bf16.gmra.mxu2 %v9554_v36 }
 0x55a   : > { %v4006_v50 = vmax.f32 %v3974_v2, 0.0  ;;  %v3801_v16 = vadd.f32 %v3800_v45, %v3711_v31 }
 0x55b   : > { %v3802_v23 = vpop.f32.mrf.mxu0 }
 0x55c   : > { %v4038_v4 = vpack.c.bf16 %v4006_v50, %v4006_v50  ;;  %v3890_v48 = vadd.f32 %v3889_v5, %v3801_v16  ;;  %v9557_v42 = vpop.f32.mrf.mxu2 }
 0x55d   : > { %v3891_v1 = vpop.f32.mrf.mxu1 }
 0x55e   : > { %v4246_v9 = vunpack.c.l.b16 %v4038_v4  ;;  %v3939_v14 = vadd.f32 %v3890_v48, %v9304_v8  ;;  %v9570_v8 = vsel %vm7928_vm5, %v9443_v22, 0  ;;  %v7208_v4 = vld [vmem:[#allocation10 + $0x50] sm:$0xff] }
 0x55f   : > { %10710 = vst [vmem:[#allocation35_spill] sm:$0xff] %v9570_v8  ;;  %5148 = vmatpush.bf16.msrb.mxu2 %v7208_v4 }
 0x560   : > { %v9560_v52 = vpack.c.b16 %v4246_v9, %v4245_v3  ;;  %v3975_v51 = vadd.f32 %v9372_v20, %v3939_v14 }
 0x561   : > { %v3713_v0 = vpop.f32.mrf.mxu3 }
 0x562   : > { %v3803_v13 = vadd.f32 %v3802_v23, %v3713_v0  ;;  %v4339_v19 = vshrl.u32 %v9560_v52, 16  ;;  %v4342_v45 = vshll.u32 %v9560_v52, 16  ;;  %v4007_v50 = vmax.f32 %v3975_v51, 0.0 }
 0x563   : > { %v3805_v28 = vpop.f32.mrf.mxu0 }
 0x564   : > { %v3892_v7 = vadd.f32 %v3891_v1, %v3803_v13  ;;  %v9565_v2 = vpop.f32.mrf.mxu2  ;;  %v4341_v31 = vrot.slane %v4339_v19, 7  ;;  %v4437_v30 = vrot.slane %v4342_v45, 1 }
 0x565   : > { %v3894_v5 = vpop.f32.mrf.mxu1 }
 0x566   : > { %v3940_v16 = vadd.f32 %v3892_v7, %v9308_v49  ;;  %4755 = vmatmul.bf16.gmra.mxu3 %v9435_v29  ;;  %4844 = vmatmul.bf16.gmra.mxu0 %v9570_v8  ;;  %v4344_v23 = vor.u32 %v4342_v45, %v4341_v31  ;;  %v9575_v48 = vor.u32 %v4437_v30, %v4339_v19 }
 0x567   : > { %v4039_v49 = vpack.c.bf16 %v4007_v50, %v4007_v50 }
 0x568   : > { %5077 = vmatmul.bf16.gmra.mxu1 %v9431_v26  ;;  %v3976_v1 = vadd.f32 %v9372_v20, %v3940_v16  ;;  %v9581_v3 = vsel %vm7924_vm4, 0, %v4344_v23 }
 0x569   : > { %v3716_v22 = vpop.f32.mrf.mxu3  ;;  %4696 = vmatmul.bf16.gmra.mxu2 %v9581_v3  ;;  %v4247_v7 = vunpack.c.l.b16 %v4039_v49 }
 0x56a   : > { %v4008_v9 = vmax.f32 %v3976_v1, 0.0  ;;  %v3806_v14 = vadd.f32 %v3805_v28, %v3716_v22 }
 0x56b   : > { %v3807_v0 = vpop.f32.mrf.mxu0 }
 0x56c   : > { %v4040_v51 = vpack.c.bf16 %v4008_v9, %v4008_v9  ;;  %v3895_v13 = vadd.f32 %v3894_v5, %v3806_v14  ;;  %v9584_v45 = vpop.f32.mrf.mxu2 }
 0x56d   : > { %v3896_v19 = vpop.f32.mrf.mxu1 }
 0x56e   : > { %v4248_v31 = vunpack.c.l.b16 %v4040_v51  ;;  %v3941_v30 = vadd.f32 %v3895_v13, %v9315_v40  ;;  %v9597_v40 = vsel %vm7928_vm5, %v9461_v37, 0 }
 0x56f   : > { %10711 = vst [vmem:[#allocation29_spill] sm:$0xff] %v9597_v40 }
 0x570   : > { %v9587_v16 = vpack.c.b16 %v4248_v31, %v4247_v7  ;;  %v3977_v4 = vadd.f32 %v9372_v20, %v3941_v30 }
 0x571   : > { %v3718_v23 = vpop.f32.mrf.mxu3 }
 0x572   : > { %v3808_v8 = vadd.f32 %v3807_v0, %v3718_v23  ;;  %v4346_v50 = vshrl.u32 %v9587_v16, 16  ;;  %v4349_v28 = vshll.u32 %v9587_v16, 16  ;;  %v4009_v51 = vmax.f32 %v3977_v4, 0.0 }
 0x573   : > { %v3810_v1 = vpop.f32.mrf.mxu0 }
 0x574   : > { %v3897_v22 = vadd.f32 %v3896_v19, %v3808_v8  ;;  %v9592_v9 = vpop.f32.mrf.mxu2  ;;  %v4348_v14 = vrot.slane %v4346_v50, 7  ;;  %v4439_v49 = vrot.slane %v4349_v28, 1  ;;  %v4041_v31 = vpack.c.bf16 %v4009_v51, %v4009_v51 }
 0x575   : > { %v3899_v5 = vpop.f32.mrf.mxu1 }
 0x576   : > { %v3942_v13 = vadd.f32 %v3897_v22, %v9319_v24  ;;  %4760 = vmatmul.bf16.gmra.mxu3 %v9453_v57  ;;  %4849 = vmatmul.bf16.gmra.mxu0 %v9597_v40  ;;  %v4351_v0 = vor.u32 %v4349_v28, %v4348_v14  ;;  %v9602_v7 = vor.u32 %v4439_v49, %v4346_v50  ;;  %v4249_v14 = vunpack.c.l.b16 %v4041_v31 }
 0x578   : > { %5082 = vmatmul.bf16.gmra.mxu1 %v9449_v44  ;;  %v3978_v8 = vadd.f32 %v9372_v20, %v3942_v13  ;;  %v9608_v19 = vsel %vm7924_vm4, 0, %v4351_v0 }
 0x579   : > { %10712 = vst [vmem:[#allocation36_spill] sm:$0xff] %v9608_v19  ;;  %v3721_v37 = vpop.f32.mrf.mxu3  ;;  %4701 = vmatmul.bf16.gmra.mxu2 %v9608_v19 }
 0x57a   : > { %v4010_v24 = vmax.f32 %v3978_v8, 0.0  ;;  %v3811_v30 = vadd.f32 %v3810_v1, %v3721_v37 }
 0x57b   : > { %v3812_v23 = vpop.f32.mrf.mxu0 }
 0x57c   : > { %v4042_v4 = vpack.c.bf16 %v4010_v24, %v4010_v24  ;;  %v3900_v22 = vadd.f32 %v3899_v5, %v3811_v30  ;;  %v9611_v50 = vpop.f32.mrf.mxu2 }
 0x57d   : > { %v3901_v28 = vpop.f32.mrf.mxu1 }
 0x57e   : > { %v4250_v49 = vunpack.c.l.b16 %v4042_v4  ;;  %v3943_v13 = vadd.f32 %v3900_v22, %v9326_v54  ;;  %v9624_v54 = vsel %vm7928_vm5, %v9479_v43, 0 }
 0x57f   : > { %10713 = vst [vmem:[#allocation25_spill] sm:$0xff] %v9624_v54 }
 0x580   : > { %v9614_v40 = vpack.c.b16 %v4250_v49, %v4249_v14  ;;  %v3979_v60 = vadd.f32 %v9372_v20, %v3943_v13  ;;  %v7207_v14 = vld [vmem:[#allocation10 + $0x48] sm:$0xff] }
 0x581   : > { %v3723_v0 = vpop.f32.mrf.mxu3  ;;  %5149 = vmatpush.bf16.msrb.mxu2 %v7207_v14 }
 0x582   : > { %v3813_v44 = vadd.f32 %v3812_v23, %v3723_v0  ;;  %v4353_v51 = vshrl.u32 %v9614_v40, 16  ;;  %v4356_v1 = vshll.u32 %v9614_v40, 16  ;;  %v4011_v4 = vmax.f32 %v3979_v60, 0.0 }
 0x583   : > { %v3815_v8 = vpop.f32.mrf.mxu0 }
 0x584   : > { %v3902_v37 = vadd.f32 %v3901_v28, %v3813_v44  ;;  %v9619_v24 = vpop.f32.mrf.mxu2  ;;  %v4355_v30 = vrot.slane %v4353_v51, 7  ;;  %v4441_v31 = vrot.slane %v4356_v1, 1 }
 0x585   : > { %v3904_v5 = vpop.f32.mrf.mxu1 }
 0x586   : > { %v3944_v22 = vadd.f32 %v3902_v37, %v9330_v39  ;;  %4765 = vmatmul.bf16.gmra.mxu3 %v9471_v63  ;;  %4854 = vmatmul.bf16.gmra.mxu0 %v9624_v54  ;;  %v4358_v23 = vor.u32 %v4356_v1, %v4355_v30  ;;  %v9629_v44 = vor.u32 %v4441_v31, %v4353_v51 }
 0x587   : > { %v4043_v39 = vpack.c.bf16 %v4011_v4, %v4011_v4 }
 0x588   : > { %5087 = vmatmul.bf16.gmra.mxu1 %v9467_v38  ;;  %v3980_v28 = vadd.f32 %v9372_v20, %v3944_v22  ;;  %v9635_v49 = vsel %vm7924_vm4, 0, %v4358_v23 }
 0x589   : > { %10714 = vst [vmem:[#allocation18_spill] sm:$0xff] %v9635_v49  ;;  %v3726_v43 = vpop.f32.mrf.mxu3  ;;  %4706 = vmatmul.bf16.gmra.mxu2 %v9635_v49  ;;  %v4251_v31 = vunpack.c.l.b16 %v4043_v39 }
 0x58a   : > { %v4012_v60 = vmax.f32 %v3980_v28, 0.0  ;;  %v3816_v13 = vadd.f32 %v3815_v8, %v3726_v43 }
 0x58b   : > { %v3817_v0 = vpop.f32.mrf.mxu0 }
 0x58c   : > { %v4044_v1 = vpack.c.bf16 %v4012_v60, %v4012_v60  ;;  %v3905_v37 = vadd.f32 %v3904_v5, %v3816_v13  ;;  %v9638_v30 = vpop.f32.mrf.mxu2 }
 0x58d   : > { %v3906_v51 = vpop.f32.mrf.mxu1 }
 0x58e   : > { %v4252_v54 = vunpack.c.l.b16 %v4044_v1  ;;  %v3945_v22 = vadd.f32 %v3905_v37, %v9337_v35  ;;  %v9651_v35 = vsel %vm7928_vm5, %v9502_v10, 0 }
 0x58f   : > { %10715 = vst [vmem:[#allocation37_spill] sm:$0xff] %v9651_v35 }
 0x590   : > { %v9641_v38 = vpack.c.b16 %v4252_v54, %v4251_v31  ;;  %v3981_v14 = vadd.f32 %v9372_v20, %v3945_v22 }
 0x591   : > { %v3728_v23 = vpop.f32.mrf.mxu3 }
 0x592   : > { %v3818_v55 = vadd.f32 %v3817_v0, %v3728_v23  ;;  %v4360_v4 = vshrl.u32 %v9641_v38, 16  ;;  %v4363_v8 = vshll.u32 %v9641_v38, 16  ;;  %v4013_v54 = vmax.f32 %v3981_v14, 0.0 }
 0x593   : > { %v3820_v28 = vpop.f32.mrf.mxu0 }
 0x594   : > { %v3907_v43 = vadd.f32 %v3906_v51, %v3818_v55  ;;  %v9646_v60 = vpop.f32.mrf.mxu2  ;;  %v4362_v13 = vrot.slane %v4360_v4, 7  ;;  %v4443_v39 = vrot.slane %v4363_v8, 1  ;;  %v4045_v31 = vpack.c.bf16 %v4013_v54, %v4013_v54  ;;  %v7413_v54 = vld [vmem:[%s10287_s4] ss:$0 sm:$0xff] }
 0x595   : > { %v3909_v5 = vpop.f32.mrf.mxu1 }
 0x596   : > { %v3946_v1 = vadd.f32 %v3907_v43, %v9341_v41  ;;  %4770 = vmatmul.bf16.gmra.mxu3 %v9489_v46  ;;  %4859 = vmatmul.bf16.gmra.mxu0 %v9651_v35  ;;  %v4365_v0 = vor.u32 %v4363_v8, %v4362_v13  ;;  %v9656_v37 = vor.u32 %v4443_v39, %v4360_v4  ;;  %v4253_v13 = vunpack.c.l.b16 %v4045_v31 }
 0x598   : > { %5092 = vmatmul.bf16.gmra.mxu1 %v9485_v6  ;;  %v3982_v55 = vadd.f32 %v9372_v20, %v3946_v1  ;;  %v9662_v51 = vsel %vm7924_vm4, 0, %v4365_v0  ;;  %v7206_v0 = vld [vmem:[#allocation10 + $0x40] sm:$0xff] }
 0x599   : > { %10716 = vst [vmem:[#allocation38_spill] sm:$0xff] %v9662_v51  ;;  %v3731_v10 = vpop.f32.mrf.mxu3  ;;  %4711 = vmatmul.bf16.gmra.mxu2 %v9662_v51 }
 0x59a   : > { %v4014_v41 = vmax.f32 %v3982_v55, 0.0  ;;  %v3821_v22 = vadd.f32 %v3820_v28, %v3731_v10  ;;  %5150 = vmatpush.bf16.msrb.mxu2 %v7206_v0 }
 0x59b   : > { %v3822_v23 = vpop.f32.mrf.mxu0 }
 0x59c   : > { %v4046_v14 = vpack.c.bf16 %v4014_v41, %v4014_v41  ;;  %v3910_v43 = vadd.f32 %v3909_v5, %v3821_v22  ;;  %v9665_v4 = vpop.f32.mrf.mxu2 }
 0x59d   : > { %v3911_v8 = vpop.f32.mrf.mxu1 }
 0x59e   : > { %v4254_v39 = vunpack.c.l.b16 %v4046_v14  ;;  %v3947_v20 = vadd.f32 %v3910_v43, %v9348_v58 }
 0x5a0   : > { %v9668_v1 = vpack.c.b16 %v4254_v39, %v4253_v13  ;;  %v3983_v55 = vadd.f32 %v7413_v54, %v3947_v20  ;;  %v9680_v13 = vsel %vm7928_vm5, %v9525_v18, 0 }
 0x5a1   : > { %v3733_v35 = vpop.f32.mrf.mxu3  ;;  %10717 = vst [vmem:[#allocation27_spill] sm:$0xff] %v9680_v13 }
 0x5a2   : > { %v3823_v28 = vadd.f32 %v3822_v23, %v3733_v35  ;;  %v4367_v10 = vshrl.u32 %v9668_v1, 16  ;;  %v4370_v5 = vshll.u32 %v9668_v1, 16  ;;  %v4015_v39 = vmax.f32 %v3983_v55, 0.0 }
 0x5a3   : > { %v3825_v41 = vpop.f32.mrf.mxu0 }
 0x5a4   : > { %v3912_v31 = vadd.f32 %v3911_v8, %v3823_v28  ;;  %v9675_v14 = vpop.f32.mrf.mxu2  ;;  %v4369_v58 = vrot.slane %v4367_v10, 7  ;;  %v4445_v43 = vrot.slane %v4370_v5, 1  ;;  %v4047_v18 = vpack.c.bf16 %v4015_v39, %v4015_v39 }
 0x5a5   : > { %v3914_v22 = vpop.f32.mrf.mxu1 }
 0x5a6   : > { %v3948_v35 = vadd.f32 %v3912_v31, %v9352_v59  ;;  %4775 = vmatmul.bf16.gmra.mxu3 %v9512_v34  ;;  %4864 = vmatmul.bf16.gmra.mxu0 %v9680_v13  ;;  %v4372_v23 = vor.u32 %v4370_v5, %v4369_v58  ;;  %v9685_v20 = vor.u32 %v4445_v43, %v4367_v10  ;;  %v4255_v10 = vunpack.c.l.b16 %v4047_v18 }
 0x5a8   : > { %5097 = vmatmul.bf16.gmra.mxu1 %v9508_v47  ;;  %v3984_v8 = vadd.f32 %v7413_v54, %v3948_v35  ;;  %v9690_v0 = vsel %vm7924_vm4, 0, %v4372_v23 }
 0x5a9   : > { %v3736_v28 = vpop.f32.mrf.mxu3  ;;  %4716 = vmatmul.bf16.gmra.mxu2 %v9690_v0 }
 0x5aa   : > { %v4016_v55 = vmax.f32 %v3984_v8, 0.0  ;;  %v3826_v59 = vadd.f32 %v3825_v41, %v3736_v28 }
 0x5ab   : > { %v3827_v31 = vpop.f32.mrf.mxu0 }
 0x5ac   : > { %v4048_v6 = vpack.c.bf16 %v4016_v55, %v4016_v55  ;;  %v3915_v34 = vadd.f32 %v3914_v22, %v3826_v59  ;;  %v9693_v5 = vpop.f32.mrf.mxu2 }
 0x5ad   : > { %v3916_v13 = vpop.f32.mrf.mxu1 }
 0x5ae   : > { %v4256_v58 = vunpack.c.l.b16 %v4048_v6  ;;  %v3949_v43 = vadd.f32 %v3915_v34, %v9359_v27  ;;  %v9705_v27 = vsel %vm7928_vm5, %v9548_v53, 0 }
 0x5af   : > { %10718 = vst [vmem:[#allocation19_spill] sm:$0xff] %v9705_v27 }
 0x5b0   : > { %v9696_v35 = vpack.c.b16 %v4256_v58, %v4255_v10  ;;  %v3985_v47 = vadd.f32 %v7413_v54, %v3949_v43 }
 0x5b1   : > { %v3738_v23 = vpop.f32.mrf.mxu3 }
 0x5b2   : > { %v3828_v46 = vadd.f32 %v3827_v31, %v3738_v23  ;;  %v4374_v26 = vshrl.u32 %v9696_v35, 16  ;;  %v4377_v39 = vshll.u32 %v9696_v35, 16  ;;  %v4017_v6 = vmax.f32 %v3985_v47, 0.0 }
 0x5b3   : > { %v4830_v41 = vpop.f32.mrf.mxu0 }
 0x5b4   : > { %v3917_v8 = vadd.f32 %v3916_v13, %v3828_v46  ;;  %v9700_v22 = vpop.f32.mrf.mxu2  ;;  %v4376_v55 = vrot.slane %v4374_v26, 7  ;;  %v4447_v59 = vrot.slane %v4377_v39, 1  ;;  %v4049_v47 = vpack.c.bf16 %v4017_v6, %v4017_v6 }
 0x5b5   : > { %v5063_v28 = vpop.f32.mrf.mxu1 }
 0x5b6   : > { %v3950_v34 = vadd.f32 %v3917_v8, %v9363_v62  ;;  %4780 = vmatmul.bf16.gmra.mxu3 %v9535_v61  ;;  %4869 = vmatmul.bf16.gmra.mxu0 %v9705_v27  ;;  %v4379_v18 = vor.u32 %v4377_v39, %v4376_v55  ;;  %v9710_v31 = vor.u32 %v4447_v59, %v4374_v26  ;;  %v7221_v8 = vld [vmem:[#allocation10 + $0xb8] sm:$0xff] }
 0x5b7   : > { %v7269_v55 = vld [vmem:[#allocation10 + $0x238] sm:$0xff]  ;;  %5232 = vmatpush.bf16.msra.mxu3 %v7221_v8 }
 0x5b8   : > { %5102 = vmatmul.bf16.gmra.mxu1 %v9531_v15  ;;  %v3986_v46 = vadd.f32 %v7413_v54, %v3950_v34  ;;  %v9715_v13 = vsel %vm7924_vm4, 0, %v4379_v18  ;;  %v7253_v54 = vld [vmem:[#allocation10 + $0x1b8] sm:$0xff]  ;;  %v4257_v34 = vunpack.c.l.b16 %v4049_v47  ;;  %5643 = vmatpush.bf16.msra.mxu2 %v7269_v55 }
 0x5b9   : > { %10719 = vst [vmem:[#allocation39_spill] sm:$0xff] %v9715_v13  ;;  %4721 = vmatmul.bf16.gmra.mxu2 %v9715_v13  ;;  %v4741_v53 = vpop.f32.mrf.mxu3  ;;  %v7261_v59 = vld [vmem:[#allocation10 + $0x1f8] sm:$0xff]  ;;  %5465 = vmatpush.bf16.msra.mxu0 %v7253_v54 }
 0x5ba   : > { %v4018_v10 = vmax.f32 %v3986_v46, 0.0  ;;  %v4742_v62 = vadd.f32 %v4741_v53, %v9557_v42  ;;  %5554 = vmatpush.bf16.msra.mxu1 %v7261_v59 }
 0x5bb   : > { %v4832_v58 = vpop.f32.mrf.mxu0 }
 0x5bc   : > { %v4050_v43 = vpack.c.bf16 %v4018_v10, %v4018_v10  ;;  %v4831_v23 = vadd.f32 %v4830_v41, %v4742_v62  ;;  %v9719_v26 = vpop.f32.mrf.mxu2 }
 0x5bd   : > { %v5065_v39 = vpop.f32.mrf.mxu1 }
 0x5be   : > { %v4258_v18 = vunpack.c.l.b16 %v4050_v43  ;;  %v9721_v27 = vadd.f32 %v5063_v28, %v4831_v23  ;;  %v9733_v28 = vsel %vm7928_vm5, %v9575_v48, 0 }
 0x5bf   : > { %10721 = vst [vmem:[#allocation41_spill] sm:$0xff] %v9733_v28 }
 0x5c0   : > { %v9723_v6 = vpack.c.b16 %v4258_v18, %v4257_v34 }
 0x5c1   : > { %v4743_v42 = vpop.f32.mrf.mxu3 }
 0x5c2   : > { %10720 = vst [vmem:[#allocation40_spill] sm:$0xff] %v9723_v6  ;;  %v4744_v41 = vadd.f32 %v4743_v42, %v9565_v2  ;;  %v4381_v46 = vshrl.u32 %v9723_v6, 16  ;;  %v4384_v53 = vshll.u32 %v9723_v6, 16 }
 0x5c3   : > { %v4835_v10 = vpop.f32.mrf.mxu0 }
 0x5c4   : > { %v4833_v62 = vadd.f32 %v4832_v58, %v4744_v41  ;;  %v9728_v47 = vpop.f32.mrf.mxu2  ;;  %v4383_v43 = vrot.slane %v4381_v46, 7  ;;  %v4449_v8 = vrot.slane %v4384_v53, 1 }
 0x5c5   : > { %v5068_v15 = vpop.f32.mrf.mxu1 }
 0x5c6   : > { %4785 = vmatmul.bf16.gmra.mxu3 %v9560_v52  ;;  %4874 = vmatmul.bf16.gmra.mxu0 %v9733_v28  ;;  %v4386_v2 = vor.u32 %v4384_v53, %v4383_v43  ;;  %v9737_v23 = vor.u32 %v4449_v8, %v4381_v46  ;;  %v9739_v55 = vadd.f32 %v5065_v39, %v4833_v62  ;;  %v9758_v8 = vsel %vm7928_vm5, %v9602_v7, 0  ;;  %v7220_v7 = vld [vmem:[#allocation10 + $0xb0] sm:$0xff] }
 0x5c7   : > { %10723 = vst [vmem:[#allocation43_spill] sm:$0xff] %v9758_v8  ;;  %5233 = vmatpush.bf16.msra.mxu3 %v7220_v7 }
 0x5c8   : > { %5107 = vmatmul.bf16.gmra.mxu1 %v9554_v36  ;;  %v9744_v58 = vsel %vm7924_vm4, 0, %v4386_v2 }
 0x5c9   : > { %10722 = vst [vmem:[#allocation42_spill] sm:$0xff] %v9744_v58  ;;  %4726 = vmatmul.bf16.gmra.mxu2 %v9744_v58  ;;  %v4746_v54 = vpop.f32.mrf.mxu3 }
 0x5ca   : > { %v4747_v48 = vadd.f32 %v4746_v54, %v9584_v45 }
 0x5cb   : > { %v4837_v59 = vpop.f32.mrf.mxu0 }
 0x5cc   : > { %v4836_v34 = vadd.f32 %v4835_v10, %v4747_v48  ;;  %v9748_v42 = vpop.f32.mrf.mxu2 }
 0x5cd   : > { %v5070_v18 = vpop.f32.mrf.mxu1 }
 0x5ce   : > { %v9750_v41 = vadd.f32 %v5068_v15, %v4836_v34  ;;  %v7252_v34 = vld [vmem:[#allocation10 + $0x1b0] sm:$0xff] }
 0x5cf   : > { %5466 = vmatpush.bf16.msra.mxu0 %v7252_v34 }
 0x5d1   : > { %v4748_v39 = vpop.f32.mrf.mxu3 }
 0x5d2   : > { %v4749_v46 = vadd.f32 %v4748_v39, %v9592_v9  ;;  %v7260_v39 = vld [vmem:[#allocation10 + $0x1f0] sm:$0xff] }
 0x5d3   : > { %v4840_v53 = vpop.f32.mrf.mxu0  ;;  %5555 = vmatpush.bf16.msra.mxu1 %v7260_v39 }
 0x5d4   : > { %v4838_v62 = vadd.f32 %v4837_v59, %v4749_v46  ;;  %v9753_v43 = vpop.f32.mrf.mxu2  ;;  %v7268_v59 = vld [vmem:[#allocation10 + $0x230] sm:$0xff] }
 0x5d5   : > { %v5073_v33 = vpop.f32.mrf.mxu1  ;;  %5644 = vmatpush.bf16.msra.mxu2 %v7268_v59 }
 0x5d6   : > { %4790 = vmatmul.bf16.gmra.mxu3 %v9587_v16  ;;  %4879 = vmatmul.bf16.gmra.mxu0 %v9758_v8  ;;  %v9762_v45 = vadd.f32 %v5070_v18, %v4838_v62  ;;  %v7218_v8 = vld [vmem:[#allocation10 + $0xa0] sm:$0xff] }
 0x5d8   : > { %5112 = vmatmul.bf16.gmra.mxu1 %v9581_v3 }
 0x5d9   : > { %v4751_v15 = vpop.f32.mrf.mxu3  ;;  %5151 = vmatmul.bf16.vlgmr.msrb.gmra.mxu2 %v10702_v11 }
 0x5da   : > { %v4752_v9 = vadd.f32 %v4751_v15, %v9611_v50 }
 0x5db   : > { %v4842_v10 = vpop.f32.mrf.mxu0 }
 0x5dc   : > { %v4841_v2 = vadd.f32 %v4840_v53, %v4752_v9  ;;  %v9767_v48 = vpop.f32.mrf.mxu2  ;;  %v9777_v9 = vsel %vm7928_vm5, %v9629_v44, 0 }
 0x5dd   : > { %v5075_v54 = vpop.f32.mrf.mxu1  ;;  %10724 = vst [vmem:[#allocation44_spill] sm:$0xff] %v9777_v9 }
 0x5de   : > { %v9769_v18 = vadd.f32 %v5073_v33, %v4841_v2 }
 0x5e1   : > { %v4753_v46 = vpop.f32.mrf.mxu3 }
 0x5e2   : > { %v4754_v62 = vadd.f32 %v4753_v46, %v9619_v24 }
 0x5e3   : > { %v4845_v58 = vpop.f32.mrf.mxu0 }
 0x5e4   : > { %v4843_v50 = vadd.f32 %v4842_v10, %v4754_v62  ;;  %v9772_v53 = vpop.f32.mrf.mxu2 }
 0x5e5   : > { %v5078_v15 = vpop.f32.mrf.mxu1 }
 0x5e6   : > { %4795 = vmatmul.bf16.gmra.mxu3 %v9614_v40  ;;  %4884 = vmatmul.bf16.gmra.mxu0 %v9777_v9  ;;  %v9781_v33 = vadd.f32 %v5075_v54, %v4843_v50 }
 0x5e8   : > { %5117 = vmatmul.bf16.gmra.mxu1 %v9608_v19 }
 0x5e9   : > { %v4756_v2 = vpop.f32.mrf.mxu3  ;;  %5156 = vmatmul.bf16.gmra.mxu2 %v9381_v56  ;;  %v9796_v56 = vsel %vm7928_vm5, %v9656_v37, 0  ;;  %v7219_v37 = vld [vmem:[#allocation10 + $0xa8] sm:$0xff] }
 0x5ea   : > { %v4757_v24 = vadd.f32 %v4756_v2, %v9638_v30  ;;  %10725 = vst [vmem:[#allocation45_spill] sm:$0xff] %v9796_v56  ;;  %5234 = vmatpush.bf16.msra.mxu3 %v7219_v37  ;;  %v7257_v37 = vld [vmem:[#allocation10 + $0x1d8] sm:$0xff] }
 0x5eb   : > { %v4847_v10 = vpop.f32.mrf.mxu0 }
 0x5ec   : > { %v4846_v7 = vadd.f32 %v4845_v58, %v4757_v24  ;;  %v9786_v34 = vpop.f32.mrf.mxu2 }
 0x5ed   : > { %v5080_v59 = vpop.f32.mrf.mxu1 }
 0x5ee   : > { %v9788_v44 = vadd.f32 %v5078_v15, %v4846_v7  ;;  %v7267_v7 = vld [vmem:[#allocation10 + $0x228] sm:$0xff]  ;;  %5235 = vmatpush.bf16.msra.mxu3 %v7218_v8 }
 0x5ef   : > { %5645 = vmatpush.bf16.msra.mxu2 %v7267_v7 }
 0x5f1   : > { %v4758_v39 = vpop.f32.mrf.mxu3 }
 0x5f2   : > { %v4759_v46 = vadd.f32 %v4758_v39, %v9646_v60  ;;  %v7251_v39 = vld [vmem:[#allocation10 + $0x1a8] sm:$0xff] }
 0x5f3   : > { %v4850_v62 = vpop.f32.mrf.mxu0  ;;  %5467 = vmatpush.bf16.msra.mxu0 %v7251_v39  ;;  %v7256_v39 = vld [vmem:[#allocation10 + $0x1d0] sm:$0xff] }
 0x5f4   : > { %v4848_v54 = vadd.f32 %v4847_v10, %v4759_v46  ;;  %v9791_v9 = vpop.f32.mrf.mxu2  ;;  %v7259_v46 = vld [vmem:[#allocation10 + $0x1e8] sm:$0xff] }
 0x5f5   : > { %v5083_v50 = vpop.f32.mrf.mxu1  ;;  %5556 = vmatpush.bf16.msra.mxu1 %v7259_v46 }
 0x5f6   : > { %4800 = vmatmul.bf16.gmra.mxu3 %v9641_v38  ;;  %4889 = vmatmul.bf16.gmra.mxu0 %v9796_v56  ;;  %v9800_v30 = vadd.f32 %v5080_v59, %v4848_v54 }
 0x5f8   : > { %5122 = vmatmul.bf16.gmra.mxu1 %v9635_v49 }
 0x5f9   : > { %v4761_v58 = vpop.f32.mrf.mxu3  ;;  %5161 = vmatmul.bf16.gmra.mxu2 %v9399_v12 }
 0x5fa   : > { %v4762_v60 = vadd.f32 %v4761_v58, %v9665_v4  ;;  %v7250_v4 = vld [vmem:[#allocation10 + $0x1a0] sm:$0xff] }
 0x5fb   : > { %v4852_v15 = vpop.f32.mrf.mxu0  ;;  %v7258_v58 = vld [vmem:[#allocation10 + $0x1e0] sm:$0xff]  ;;  %5468 = vmatpush.bf16.msra.mxu0 %v7250_v4 }
 0x5fc   : > { %v4851_v2 = vadd.f32 %v4850_v62, %v4762_v60  ;;  %v9805_v10 = vpop.f32.mrf.mxu2  ;;  %5557 = vmatpush.bf16.msra.mxu1 %v7258_v58 }
 0x5fd   : > { %v5085_v24 = vpop.f32.mrf.mxu1 }
 0x5fe   : > { %v9807_v59 = vadd.f32 %v5083_v50, %v4851_v2  ;;  %v9815_v50 = vsel %vm7928_vm5, %v9685_v20, 0  ;;  %v7249_v2 = vld [vmem:[#allocation10 + $0x198] sm:$0xff] }
 0x5ff   : > { %10726 = vst [vmem:[#allocation46_spill] sm:$0xff] %v9815_v50  ;;  %5469 = vmatpush.bf16.msra.mxu0 %v7249_v2 }
 0x600   : > { %5558 = vmatpush.bf16.msra.mxu1 %v7257_v37 }
 0x601   : > { %v4763_v54 = vpop.f32.mrf.mxu3 }
 0x602   : > { %v4764_v56 = vadd.f32 %v4763_v54, %v9675_v14  ;;  %v7217_v14 = vld [vmem:[#allocation10 + $0x98] sm:$0xff] }
 0x603   : > { %v4855_v62 = vpop.f32.mrf.mxu0  ;;  %5236 = vmatpush.bf16.msra.mxu3 %v7217_v14  ;;  %v7255_v14 = vld [vmem:[#allocation10 + $0x1c8] sm:$0xff] }
 0x604   : > { %v4853_v60 = vadd.f32 %v4852_v15, %v4764_v56  ;;  %v9810_v28 = vpop.f32.mrf.mxu2  ;;  %v7216_v56 = vld [vmem:[#allocation10 + $0x90] sm:$0xff]  ;;  %5559 = vmatpush.bf16.msra.mxu1 %v7256_v39 }
 0x605   : > { %v5088_v49 = vpop.f32.mrf.mxu1  ;;  %v7248_v15 = vld [vmem:[#allocation10 + $0x190] sm:$0xff] }
 0x606   : > { %4805 = vmatmul.bf16.gmra.mxu3 %v9668_v1  ;;  %4894 = vmatmul.bf16.gmra.mxu0 %v9815_v50  ;;  %v9819_v7 = vadd.f32 %v5085_v24, %v4853_v60  ;;  %v7215_v24 = vld [vmem:[#allocation10 + $0x88] sm:$0xff]  ;;  %v7246_v50 = vld [vmem:[#allocation10 + $0x180] sm:$0xff] }
 0x607   : > { %5237 = vmatpush.bf16.msra.mxu3 %v7216_v56  ;;  %5470 = vmatpush.bf16.msra.mxu0 %v7248_v15  ;;  %v7247_v60 = vld [vmem:[#allocation10 + $0x188] sm:$0xff] }
 0x608   : > { %5127 = vmatmul.bf16.gmra.mxu1 %v9662_v51 }
 0x609   : > { %v4766_v8 = vpop.f32.mrf.mxu3  ;;  %5166 = vmatmul.bf16.gmra.mxu2 %v9417_v32  ;;  %5560 = vmatpush.bf16.msra.mxu1 %v7255_v14 }
 0x60a   : > { %v4767_v20 = vadd.f32 %v4766_v8, %v9693_v5  ;;  %v7214_v8 = vld [vmem:[#allocation10 + $0x80] sm:$0xff] }
 0x60b   : > { %v4857_v46 = vpop.f32.mrf.mxu0  ;;  %5238 = vmatpush.bf16.msra.mxu3 %v7215_v24  ;;  %5471 = vmatpush.bf16.msra.mxu0 %v7247_v60 }
 0x60c   : > { %v4856_v54 = vadd.f32 %v4855_v62, %v4767_v20  ;;  %v9824_v58 = vpop.f32.mrf.mxu2  ;;  %v7254_v62 = vld [vmem:[#allocation10 + $0x1c0] sm:$0xff] }
 0x60d   : > { %v5090_v4 = vpop.f32.mrf.mxu1  ;;  %5561 = vmatpush.bf16.msra.mxu1 %v7254_v62 }
 0x60e   : > { %v9826_v2 = vadd.f32 %v5088_v49, %v4856_v54  ;;  %v9834_v49 = vsel %vm7928_vm5, %v9710_v31, 0  ;;  %v7266_v31 = vld [vmem:[#allocation10 + $0x220] sm:$0xff] }
 0x60f   : > { %5239 = vmatpush.bf16.msra.mxu3 %v7214_v8  ;;  %5472 = vmatpush.bf16.msra.mxu0 %v7246_v50  ;;  %10727 = vst [vmem:[#allocation47_spill] sm:$0xff] %v9834_v49 }
 0x610   : > { %5646 = vmatpush.bf16.msra.mxu2 %v7266_v31 }
 0x611   : > { %v4768_v37 = vpop.f32.mrf.mxu3 }
 0x612   : > { %v4769_v5 = vadd.f32 %v4768_v37, %v9700_v22 }
 0x613   : > { %v4860_v20 = vpop.f32.mrf.mxu0 }
 0x614   : > { %v4858_v51 = vadd.f32 %v4857_v46, %v4769_v5  ;;  %v9829_v56 = vpop.f32.mrf.mxu2 }
 0x615   : > { %v5093_v19 = vpop.f32.mrf.mxu1 }
 0x616   : > { %4810 = vmatmul.bf16.gmra.mxu3 %v9696_v35  ;;  %4899 = vmatmul.bf16.gmra.mxu0 %v9834_v49  ;;  %v9838_v22 = vadd.f32 %v5090_v4, %v4858_v51 }
 0x618   : > { %5132 = vmatmul.bf16.gmra.mxu1 %v9690_v0 }
 0x619   : > { %v4771_v15 = vpop.f32.mrf.mxu3  ;;  %5171 = vmatmul.bf16.gmra.mxu2 %v9435_v29 }
 0x61a   : > { %v4772_v39 = vadd.f32 %v4771_v15, %v9719_v26  ;;  %v9853_v26 = vsel %vm7928_vm5, %v9737_v23, 0 }
 0x61b   : > { %v4862_v50 = vpop.f32.mrf.mxu0  ;;  %10728 = vst [vmem:[#allocation58_spill] sm:$0xff] %v9853_v26 }
 0x61c   : > { %v4861_v46 = vadd.f32 %v4860_v20, %v4772_v39  ;;  %v9843_v24 = vpop.f32.mrf.mxu2 }
 0x61d   : > { %v5095_v54 = vpop.f32.mrf.mxu1 }
 0x61e   : > { %v9845_v60 = vadd.f32 %v5093_v19, %v4861_v46 }
 0x621   : > { %v4773_v14 = vpop.f32.mrf.mxu3 }
 0x622   : > { %v4774_v51 = vadd.f32 %v4773_v14, %v9728_v47 }
 0x623   : > { %v4865_v4 = vpop.f32.mrf.mxu0 }
 0x624   : > { %v4863_v37 = vadd.f32 %v4862_v50, %v4774_v51  ;;  %v9848_v8 = vpop.f32.mrf.mxu2 }
 0x625   : > { %v5098_v5 = vpop.f32.mrf.mxu1 }
 0x626   : > { %4815 = vmatmul.bf16.gmra.mxu3 %v9723_v6  ;;  %4904 = vmatmul.bf16.gmra.mxu0 %v9853_v26  ;;  %v9857_v62 = vadd.f32 %v5095_v54, %v4863_v37 }
 0x628   : > { %5137 = vmatmul.bf16.gmra.mxu1 %v9715_v13 }
 0x629   : > { %v4776_v19 = vpop.f32.mrf.mxu3  ;;  %5176 = vmatmul.bf16.gmra.mxu2 %v9453_v57 }
 0x62a   : > { %v4777_v47 = vadd.f32 %v4776_v19, %v9748_v42 }
 0x62b   : > { %v4867_v20 = vpop.f32.mrf.mxu0 }
 0x62c   : > { %v4866_v15 = vadd.f32 %v4865_v4, %v4777_v47  ;;  %v9862_v50 = vpop.f32.mrf.mxu2 }
 0x62d   : > { %v5100_v39 = vpop.f32.mrf.mxu1 }
 0x62e   : > { %v9864_v25 = vadd.f32 %v5098_v5, %v4866_v15 }
 0x631   : > { %v4778_v23 = vpop.f32.mrf.mxu3 }
 0x632   : > { %v4779_v46 = vadd.f32 %v4778_v23, %v9753_v43 }
 0x633   : > { %v4870_v31 = vpop.f32.mrf.mxu0 }
 0x634   : > { %v4868_v54 = vadd.f32 %v4867_v20, %v4779_v46  ;;  %v9867_v51 = vpop.f32.mrf.mxu2  ;;  %v7265_v20 = vld [vmem:[#allocation10 + $0x218] sm:$0xff] }
 0x635   : > { %v5103_v14 = vpop.f32.mrf.mxu1  ;;  %5647 = vmatpush.bf16.msra.mxu2 %v7265_v20 }
 0x636   : > { %5240 = vmatmul.bf16.vlgmr.msra.gmra.mxu3 %v10702_v11  ;;  %5473 = vmatmul.bf16.vlgmr.msra.gmra.mxu0 %v9413_v17  ;;  %v9871_v42 = vadd.f32 %v5100_v39, %v4868_v54  ;;  %v10732_v11 = vld [vmem:[#allocation69_spill] sm:$0xff] }
 0x638   : > { %5562 = vmatmul.bf16.vlgmr.msra.gmra.mxu1 %v9399_v12 }
 0x639   : > { %v4781_v4 = vpop.f32.mrf.mxu3  ;;  %5181 = vmatmul.bf16.gmra.mxu2 %v9471_v63 }
 0x63a   : > { %v4782_v37 = vadd.f32 %v4781_v4, %v9767_v48  ;;  %v10729_v48 = vld [vmem:[#allocation33_spill] sm:$0xff] }
 0x63b   : > { %v4872_v5 = vpop.f32.mrf.mxu0 }
 0x63c   : > { %v4871_v43 = vadd.f32 %v4870_v31, %v4782_v37  ;;  %v9876_v47 = vpop.f32.mrf.mxu2  ;;  %v10730_v37 = vld [vmem:[#allocation20_spill] sm:$0xff] }
 0x63d   : > { %v5105_v19 = vpop.f32.mrf.mxu1 }
 0x63e   : > { %v9878_v15 = vadd.f32 %v5103_v14, %v4871_v43 }
 0x641   : > { %v4783_v23 = vpop.f32.mrf.mxu3 }
 0x642   : > { %v4784_v17 = vadd.f32 %v4783_v23, %v9772_v53 }
 0x643   : > { %v4875_v39 = vpop.f32.mrf.mxu0 }
 0x644   : > { %v4873_v46 = vadd.f32 %v4872_v5, %v4784_v17  ;;  %v9881_v54 = vpop.f32.mrf.mxu2 }
 0x645   : > { %v5108_v12 = vpop.f32.mrf.mxu1 }
 0x646   : > { %5245 = vmatmul.bf16.gmra.mxu3 %v9497_v21  ;;  %5478 = vmatmul.bf16.gmra.mxu0 %v10729_v48  ;;  %v9885_v31 = vadd.f32 %v5105_v19, %v4873_v46 }
 0x648   : > { %5567 = vmatmul.bf16.gmra.mxu1 %v9417_v32  ;;  %v10731_v32 = vld [vmem:[#allocation34_spill] sm:$0xff] }
 0x649   : > { %v4786_v4 = vpop.f32.mrf.mxu3  ;;  %5186 = vmatmul.bf16.gmra.mxu2 %v10730_v37 }
 0x64a   : > { %v4787_v14 = vadd.f32 %v4786_v4, %v9786_v34  ;;  %v10733_v4 = vld [vmem:[#allocation30_spill] sm:$0xff] }
 0x64b   : > { %v4877_v43 = vpop.f32.mrf.mxu0 }
 0x64c   : > { %v4876_v53 = vadd.f32 %v4875_v39, %v4787_v14  ;;  %v9890_v5 = vpop.f32.mrf.mxu2 }
 0x64d   : > { %v5110_v20 = vpop.f32.mrf.mxu1 }
 0x64e   : > { %v9892_v23 = vadd.f32 %v5108_v12, %v4876_v53 }
 0x651   : > { %v4788_v17 = vpop.f32.mrf.mxu3 }
 0x652   : > { %v4789_v21 = vadd.f32 %v4788_v17, %v9791_v9  ;;  %v7264_v17 = vld [vmem:[#allocation10 + $0x210] sm:$0xff] }
 0x653   : > { %v4880_v48 = vpop.f32.mrf.mxu0  ;;  %5648 = vmatpush.bf16.msra.mxu2 %v7264_v17 }
 0x654   : > { %v4878_v19 = vadd.f32 %v4877_v43, %v4789_v21  ;;  %v9895_v26 = vpop.f32.mrf.mxu2 }
 0x655   : > { %v5113_v46 = vpop.f32.mrf.mxu1 }
 0x656   : > { %5250 = vmatmul.bf16.gmra.mxu3 %v10731_v32  ;;  %5483 = vmatmul.bf16.gmra.mxu0 %v10732_v11  ;;  %v9899_v34 = vadd.f32 %v5110_v20, %v4878_v19 }
 0x658   : > { %5572 = vmatmul.bf16.gmra.mxu1 %v9435_v29 }
 0x659   : > { %v4791_v39 = vpop.f32.mrf.mxu3  ;;  %5191 = vmatmul.bf16.gmra.mxu2 %v10733_v4 }
 0x65a   : > { %v4792_v12 = vadd.f32 %v4791_v39, %v9805_v10  ;;  %v10735_v39 = vld [vmem:[#allocation26_spill] sm:$0xff] }
 0x65b   : > { %v4882_v14 = vpop.f32.mrf.mxu0 }
 0x65c   : > { %v4881_v9 = vadd.f32 %v4880_v48, %v4792_v12  ;;  %v5152_v43 = vpop.f32.mrf.mxu2  ;;  %v10734_v48 = vld [vmem:[#allocation22_spill] sm:$0xff] }
 0x65d   : > { %v5115_v53 = vpop.f32.mrf.mxu1  ;;  %v9905_v21 = vadd.f32 %v5152_v43, %v9721_v27 }
 0x65e   : > { %v9907_v49 = vadd.f32 %v5113_v46, %v4881_v9 }
 0x661   : > { %v4793_v11 = vpop.f32.mrf.mxu3 }
 0x662   : > { %v4794_v20 = vadd.f32 %v4793_v11, %v9810_v28 }
 0x663   : > { %v4885_v29 = vpop.f32.mrf.mxu0 }
 0x664   : > { %v4883_v19 = vadd.f32 %v4882_v14, %v4794_v20  ;;  %v5154_v13 = vpop.f32.mrf.mxu2 }
 0x665   : > { %v5118_v6 = vpop.f32.mrf.mxu1  ;;  %v9911_v10 = vadd.f32 %v5154_v13, %v9739_v55 }
 0x666   : > { %5255 = vmatmul.bf16.gmra.mxu3 %v10734_v48  ;;  %5488 = vmatmul.bf16.gmra.mxu0 %v10735_v39  ;;  %v9915_v12 = vadd.f32 %v5115_v53, %v4883_v19 }
 0x668   : > { %5577 = vmatmul.bf16.gmra.mxu1 %v9453_v57 }
 0x669   : > { %v4796_v27 = vpop.f32.mrf.mxu3  ;;  %5196 = vmatmul.bf16.gmra.mxu2 %v9535_v61 }
 0x66a   : > { %v4797_v28 = vadd.f32 %v4796_v27, %v9824_v58  ;;  %v10736_v58 = vld [vmem:[#allocation35_spill] sm:$0xff] }
 0x66b   : > { %v4887_v46 = vpop.f32.mrf.mxu0 }
 0x66c   : > { %v4886_v14 = vadd.f32 %v4885_v29, %v4797_v28  ;;  %v5157_v43 = vpop.f32.mrf.mxu2  ;;  %v10737_v29 = vld [vmem:[#allocation28_spill] sm:$0xff] }
 0x66d   : > { %v5120_v9 = vpop.f32.mrf.mxu1  ;;  %v9921_v13 = vadd.f32 %v5157_v43, %v9750_v41  ;;  %v7263_v43 = vld [vmem:[#allocation10 + $0x208] sm:$0xff] }
 0x66e   : > { %v9923_v55 = vadd.f32 %v5118_v6, %v4886_v14  ;;  %5649 = vmatpush.bf16.msra.mxu2 %v7263_v43 }
 0x671   : > { %v4798_v17 = vpop.f32.mrf.mxu3 }
 0x672   : > { %v4799_v53 = vadd.f32 %v4798_v17, %v9829_v56 }
 0x673   : > { %v4890_v11 = vpop.f32.mrf.mxu0 }
 0x674   : > { %v4888_v20 = vadd.f32 %v4887_v46, %v4799_v53  ;;  %v5159_v19 = vpop.f32.mrf.mxu2 }
 0x675   : > { %v5123_v57 = vpop.f32.mrf.mxu1  ;;  %v9927_v39 = vadd.f32 %v5159_v19, %v9762_v45 }
 0x676   : > { %5260 = vmatmul.bf16.gmra.mxu3 %v10736_v58  ;;  %5493 = vmatmul.bf16.gmra.mxu0 %v10737_v29  ;;  %v9931_v27 = vadd.f32 %v5120_v9, %v4888_v20 }
 0x678   : > { %5582 = vmatmul.bf16.gmra.mxu1 %v9471_v63 }
 0x679   : > { %v4801_v6 = vpop.f32.mrf.mxu3  ;;  %5201 = vmatmul.bf16.gmra.mxu2 %v9560_v52 }
 0x67a   : > { %v4802_v41 = vadd.f32 %v4801_v6, %v9843_v24  ;;  %v10739_v6 = vld [vmem:[#allocation21_spill] sm:$0xff] }
 0x67b   : > { %v4892_v56 = vpop.f32.mrf.mxu0 }
 0x67c   : > { %v4891_v28 = vadd.f32 %v4890_v11, %v4802_v41  ;;  %v5162_v14 = vpop.f32.mrf.mxu2  ;;  %v10738_v11 = vld [vmem:[#allocation29_spill] sm:$0xff] }
 0x67d   : > { %v5125_v46 = vpop.f32.mrf.mxu1  ;;  %v9937_v45 = vadd.f32 %v5162_v14, %v9769_v18 }
 0x67e   : > { %v9939_v17 = vadd.f32 %v5123_v57, %v4891_v28 }
 0x681   : > { %v4803_v9 = vpop.f32.mrf.mxu3 }
 0x682   : > { %v4804_v53 = vadd.f32 %v4803_v9, %v9848_v8 }
 0x683   : > { %v4895_v63 = vpop.f32.mrf.mxu0 }
 0x684   : > { %v4893_v20 = vadd.f32 %v4892_v56, %v4804_v53  ;;  %v5164_v29 = vpop.f32.mrf.mxu2 }
 0x685   : > { %v5128_v19 = vpop.f32.mrf.mxu1  ;;  %v9943_v24 = vadd.f32 %v5164_v29, %v9781_v33 }
 0x686   : > { %5265 = vmatmul.bf16.gmra.mxu3 %v10738_v11  ;;  %5498 = vmatmul.bf16.gmra.mxu0 %v10739_v6  ;;  %v9947_v41 = vadd.f32 %v5125_v46, %v4893_v20 }
 0x688   : > { %5587 = vmatmul.bf16.gmra.mxu1 %v10730_v37 }
 0x689   : > { %v4806_v18 = vpop.f32.mrf.mxu3  ;;  %5206 = vmatmul.bf16.gmra.mxu2 %v9587_v16 }
 0x68a   : > { %v4807_v8 = vadd.f32 %v4806_v18, %v9862_v50  ;;  %v10740_v50 = vld [vmem:[#allocation25_spill] sm:$0xff] }
 0x68b   : > { %v4897_v57 = vpop.f32.mrf.mxu0 }
 0x68c   : > { %v4896_v56 = vadd.f32 %v4895_v63, %v4807_v8  ;;  %v5167_v14 = vpop.f32.mrf.mxu2  ;;  %v10741_v63 = vld [vmem:[#allocation24_spill] sm:$0xff] }
 0x68d   : > { %v5130_v28 = vpop.f32.mrf.mxu1  ;;  %v9953_v33 = vadd.f32 %v5167_v14, %v9788_v44 }
 0x68e   : > { %v9955_v43 = vadd.f32 %v5128_v19, %v4896_v56  ;;  %v7262_v19 = vld [vmem:[#allocation10 + $0x200] sm:$0xff] }
 0x68f   : > { %5650 = vmatpush.bf16.msra.mxu2 %v7262_v19 }
 0x691   : > { %v4808_v9 = vpop.f32.mrf.mxu3 }
 0x692   : > { %v4809_v46 = vadd.f32 %v4808_v9, %v9867_v51 }
 0x693   : > { %v4900_v53 = vpop.f32.mrf.mxu0 }
 0x694   : > { %v4898_v20 = vadd.f32 %v4897_v57, %v4809_v46  ;;  %v5169_v29 = vpop.f32.mrf.mxu2 }
 0x695   : > { %v5133_v37 = vpop.f32.mrf.mxu1  ;;  %v9959_v6 = vadd.f32 %v5169_v29, %v9800_v30 }
 0x696   : > { %5270 = vmatmul.bf16.gmra.mxu3 %v10740_v50  ;;  %5503 = vmatmul.bf16.gmra.mxu0 %v10741_v63  ;;  %v9963_v18 = vadd.f32 %v5130_v28, %v4898_v20 }
 0x698   : > { %5592 = vmatmul.bf16.gmra.mxu1 %v10733_v4 }
 0x699   : > { %v4811_v44 = vpop.f32.mrf.mxu3  ;;  %5211 = vmatmul.bf16.gmra.mxu2 %v9614_v40 }
 0x69a   : > { %v4812_v51 = vadd.f32 %v4811_v44, %v9876_v47  ;;  %v10742_v44 = vld [vmem:[#allocation37_spill] sm:$0xff] }
 0x69b   : > { %v4902_v8 = vpop.f32.mrf.mxu0 }
 0x69c   : > { %v4901_v57 = vadd.f32 %v4900_v53, %v4812_v51  ;;  %v5172_v14 = vpop.f32.mrf.mxu2 }
 0x69d   : > { %v5135_v56 = vpop.f32.mrf.mxu1  ;;  %v9969_v30 = vadd.f32 %v5172_v14, %v9807_v59 }
 0x69e   : > { %v9971_v9 = vadd.f32 %v5133_v37, %v4901_v57 }
 0x6a1   : > { %v4813_v28 = vpop.f32.mrf.mxu3 }
 0x6a2   : > { %v4814_v46 = vadd.f32 %v4813_v28, %v9881_v54 }
 0x6a3   : > { %v4905_v4 = vpop.f32.mrf.mxu0 }
 0x6a4   : > { %v4903_v20 = vadd.f32 %v4902_v8, %v4814_v46  ;;  %v5174_v63 = vpop.f32.mrf.mxu2 }
 0x6a5   : > { %v5138_v29 = vpop.f32.mrf.mxu1  ;;  %v9975_v47 = vadd.f32 %v5174_v63, %v9819_v7 }
 0x6a6   : > { %5275 = vmatmul.bf16.gmra.mxu3 %v10742_v44  ;;  %5508 = vmatmul.bf16.gmra.mxu0 %v9554_v36  ;;  %v9979_v53 = vadd.f32 %v5135_v56, %v4903_v20 }
 0x6a8   : > { %5597 = vmatmul.bf16.gmra.mxu1 %v9535_v61 }
 0x6a9   : > { %v4816_v59 = vpop.f32.mrf.mxu3  ;;  %5216 = vmatmul.bf16.gmra.mxu2 %v9641_v38 }
 0x6aa   : > { %v4817_v54 = vadd.f32 %v4816_v59, %v9890_v5 }
 0x6ab   : > { %v4907_v37 = vpop.f32.mrf.mxu0 }
 0x6ac   : > { %v4906_v51 = vadd.f32 %v4905_v4, %v4817_v54  ;;  %v5177_v8 = vpop.f32.mrf.mxu2  ;;  %v10743_v4 = vld [vmem:[#allocation27_spill] sm:$0xff] }
 0x6ad   : > { %v5140_v19 = vpop.f32.mrf.mxu1  ;;  %v9985_v7 = vadd.f32 %v5177_v8, %v9826_v2 }
 0x6ae   : > { %v9987_v57 = vadd.f32 %v5138_v29, %v4906_v51 }
 0x6b1   : > { %v4818_v14 = vpop.f32.mrf.mxu3 }
 0x6b2   : > { %v4819_v36 = vadd.f32 %v4818_v14, %v9895_v26 }
 0x6b3   : > { %v5474_v56 = vpop.f32.mrf.mxu0 }
 0x6b4   : > { %v4908_v28 = vadd.f32 %v4907_v37, %v4819_v36  ;;  %v5179_v46 = vpop.f32.mrf.mxu2  ;;  %v10744_v36 = vld [vmem:[#allocation19_spill] sm:$0xff] }
 0x6b5   : > { %v5563_v61 = vpop.f32.mrf.mxu1  ;;  %v9993_v5 = vadd.f32 %v5179_v46, %v9838_v22 }
 0x6b6   : > { %v9990_v20 = vadd.f32 %v5563_v61, %v5474_v56  ;;  %5280 = vmatmul.bf16.gmra.mxu3 %v10743_v4  ;;  %5513 = vmatmul.bf16.gmra.mxu0 %v9581_v3  ;;  %v9997_v2 = vadd.f32 %v5140_v19, %v4908_v28  ;;  %v10745_v56 = vld [vmem:[#allocation36_spill] sm:$0xff] }
 0x6b8   : > { %5602 = vmatmul.bf16.gmra.mxu1 %v9560_v52 }
 0x6b9   : > { %5221 = vmatmul.bf16.gmra.mxu2 %v9668_v1  ;;  %v5241_v26 = vpop.f32.mrf.mxu3 }
 0x6ba   : > { %v10002_v29 = vadd.f32 %v5241_v26, %v9905_v21 }
 0x6bb   : > { %v5476_v63 = vpop.f32.mrf.mxu0 }
 0x6bc   : > { %v5182_v54 = vpop.f32.mrf.mxu2 }
 0x6bd   : > { %v5565_v59 = vpop.f32.mrf.mxu1  ;;  %v10007_v22 = vadd.f32 %v5182_v54, %v9845_v60 }
 0x6be   : > { %v10004_v37 = vadd.f32 %v5565_v59, %v5476_v63 }
 0x6c1   : > { %v5243_v51 = vpop.f32.mrf.mxu3 }
 0x6c2   : > { %v10010_v3 = vadd.f32 %v5243_v51, %v9911_v10 }
 0x6c3   : > { %v5479_v19 = vpop.f32.mrf.mxu0 }
 0x6c4   : > { %v5184_v8 = vpop.f32.mrf.mxu2 }
 0x6c5   : > { %v5568_v52 = vpop.f32.mrf.mxu1  ;;  %v10015_v21 = vadd.f32 %v5184_v8, %v9857_v62  ;;  %v10747_v8 = vld [vmem:[#allocation18_spill] sm:$0xff] }
 0x6c6   : > { %v10012_v14 = vadd.f32 %v5568_v52, %v5479_v19  ;;  %5285 = vmatmul.bf16.gmra.mxu3 %v10744_v36  ;;  %5518 = vmatmul.bf16.gmra.mxu0 %v10745_v56  ;;  %v10746_v52 = vld [vmem:[#allocation41_spill] sm:$0xff] }
 0x6c8   : > { %5607 = vmatmul.bf16.gmra.mxu1 %v9587_v16 }
 0x6c9   : > { %5226 = vmatmul.bf16.gmra.mxu2 %v9696_v35  ;;  %v5246_v60 = vpop.f32.mrf.mxu3 }
 0x6ca   : > { %v10022_v10 = vadd.f32 %v5246_v60, %v9921_v13 }
 0x6cb   : > { %v5481_v28 = vpop.f32.mrf.mxu0 }
 0x6cc   : > { %v5187_v46 = vpop.f32.mrf.mxu2 }
 0x6cd   : > { %v5570_v61 = vpop.f32.mrf.mxu1  ;;  %v10027_v62 = vadd.f32 %v5187_v46, %v9864_v25 }
 0x6ce   : > { %v10024_v26 = vadd.f32 %v5570_v61, %v5481_v28 }
 0x6d1   : > { %v5248_v63 = vpop.f32.mrf.mxu3 }
 0x6d2   : > { %v10030_v59 = vadd.f32 %v5248_v63, %v9927_v39 }
 0x6d3   : > { %v5484_v54 = vpop.f32.mrf.mxu0 }
 0x6d4   : > { %v5189_v51 = vpop.f32.mrf.mxu2 }
 0x6d5   : > { %v5573_v16 = vpop.f32.mrf.mxu1  ;;  %v10035_v13 = vadd.f32 %v5189_v51, %v9871_v42 }
 0x6d6   : > { %v10032_v19 = vadd.f32 %v5573_v16, %v5484_v54  ;;  %5290 = vmatmul.bf16.gmra.mxu3 %v10746_v52  ;;  %5523 = vmatmul.bf16.gmra.mxu0 %v10747_v8  ;;  %v10749_v8 = vld [vmem:[#allocation38_spill] sm:$0xff] }
 0x6d8   : > { %5612 = vmatmul.bf16.gmra.mxu1 %v9614_v40 }
 0x6d9   : > { %v5251_v25 = vpop.f32.mrf.mxu3  ;;  %5651 = vmatmul.bf16.vlgmr.msra.gmra.mxu2 %v10731_v32 }
 0x6da   : > { %v10042_v39 = vadd.f32 %v5251_v25, %v9937_v45  ;;  %v10748_v45 = vld [vmem:[#allocation43_spill] sm:$0xff] }
 0x6db   : > { %v5486_v56 = vpop.f32.mrf.mxu0 }
 0x6dc   : > { %v5192_v28 = vpop.f32.mrf.mxu2 }
 0x6dd   : > { %v5575_v60 = vpop.f32.mrf.mxu1  ;;  %v10047_v42 = vadd.f32 %v5192_v28, %v9878_v15 }
 0x6de   : > { %v10044_v61 = vadd.f32 %v5575_v60, %v5486_v56 }
 0x6e1   : > { %v5253_v46 = vpop.f32.mrf.mxu3 }
 0x6e2   : > { %v10050_v63 = vadd.f32 %v5253_v46, %v9943_v24 }
 0x6e3   : > { %v5489_v54 = vpop.f32.mrf.mxu0 }
 0x6e4   : > { %v5194_v16 = vpop.f32.mrf.mxu2 }
 0x6e5   : > { %v5578_v40 = vpop.f32.mrf.mxu1  ;;  %v10055_v32 = vadd.f32 %v5194_v16, %v9885_v31 }
 0x6e6   : > { %v10052_v51 = vadd.f32 %v5578_v40, %v5489_v54  ;;  %5295 = vmatmul.bf16.gmra.mxu3 %v10748_v45  ;;  %5528 = vmatmul.bf16.gmra.mxu0 %v10749_v8  ;;  %v10751_v8 = vld [vmem:[#allocation45_spill] sm:$0xff] }
 0x6e8   : > { %5617 = vmatmul.bf16.gmra.mxu1 %v9641_v38 }
 0x6e9   : > { %v5256_v15 = vpop.f32.mrf.mxu3  ;;  %5656 = vmatmul.bf16.gmra.mxu2 %v10734_v48  ;;  %v10750_v48 = vld [vmem:[#allocation44_spill] sm:$0xff] }
 0x6ea   : > { %v10062_v24 = vadd.f32 %v5256_v15, %v9953_v33  ;;  %v10753_v15 = vld [vmem:[#allocation46_spill] sm:$0xff] }
 0x6eb   : > { %v5491_v25 = vpop.f32.mrf.mxu0 }
 0x6ec   : > { %v5197_v60 = vpop.f32.mrf.mxu2 }
 0x6ed   : > { %v5580_v56 = vpop.f32.mrf.mxu1  ;;  %v10067_v31 = vadd.f32 %v5197_v60, %v9892_v23  ;;  %v10756_v60 = vld [vmem:[#allocation47_spill] sm:$0xff] }
 0x6ee   : > { %v10064_v28 = vadd.f32 %v5580_v56, %v5491_v25  ;;  %v10755_v25 = vld [vmem:[#allocation40_spill] sm:$0xff] }
 0x6f1   : > { %v5258_v46 = vpop.f32.mrf.mxu3 }
 0x6f2   : > { %v10070_v54 = vadd.f32 %v5258_v46, %v9959_v6 }
 0x6f4   : > { %v5199_v40 = vpop.f32.mrf.mxu2 }
 0x6f5   : > { %v10073_v38 = vadd.f32 %v5199_v40, %v9899_v34  ;;  %v10752_v34 = vld [vmem:[#allocation39_spill] sm:$0xff] }
 0x6f6   : > { %5300 = vmatmul.bf16.gmra.mxu3 %v10750_v48  ;;  %5533 = vmatmul.bf16.gmra.mxu0 %v9690_v0 }
 0x6f8   : > { %5622 = vmatmul.bf16.gmra.mxu1 %v9668_v1 }
 0x6f9   : > { %5661 = vmatmul.bf16.gmra.mxu2 %v10736_v58 }
 0x6fc   : > { %v5202_v33 = vpop.f32.mrf.mxu2 }
 0x6fd   : > { %v10080_v23 = vadd.f32 %v5202_v33, %v9907_v49 }
 0x704   : > { %v5204_v16 = vpop.f32.mrf.mxu2 }
 0x705   : > { %v10083_v6 = vadd.f32 %v5204_v16, %v9915_v12  ;;  %v10754_v12 = vld [vmem:[#allocation42_spill] sm:$0xff] }
 0x706   : > { %5305 = vmatmul.bf16.gmra.mxu3 %v10751_v8  ;;  %5538 = vmatmul.bf16.gmra.mxu0 %v10752_v34 }
 0x708   : > { %5627 = vmatmul.bf16.gmra.mxu1 %v9696_v35 }
 0x709   : > { %5666 = vmatmul.bf16.gmra.mxu2 %v10738_v11 }
 0x70c   : > { %v5207_v0 = vpop.f32.mrf.mxu2 }
 0x70d   : > { %v10090_v1 = vadd.f32 %v5207_v0, %v9923_v55 }
 0x714   : > { %v5209_v58 = vpop.f32.mrf.mxu2 }
 0x715   : > { %v10093_v49 = vadd.f32 %v5209_v58, %v9931_v27  ;;  %v10757_v27 = vmov 0  }
 0x716   : > { %5310 = vmatmul.bf16.gmra.mxu3 %v10753_v15  ;;  %5543 = vmatmul.bf16.gmra.mxu0 %v10754_v12 }
 0x718   : > { %5632 = vmatmul.bf16.gmra.mxu1 %v10755_v25  ;;  %v5494_v25 = vpop.f32.mrf.mxu0 }
 0x719   : > { %5671 = vmatmul.bf16.gmra.mxu2 %v10740_v50 }
 0x71c   : > { %v5212_v56 = vpop.f32.mrf.mxu2 }
 0x71d   : > { %v10100_v35 = vadd.f32 %v5212_v56, %v9939_v17 }
 0x724   : > { %v5214_v11 = vpop.f32.mrf.mxu2 }
 0x725   : > { %v10103_v55 = vadd.f32 %v5214_v11, %v9947_v41  ;;  %v5261_v11 = vpop.f32.mrf.mxu3 }
 0x726   : > { %5315 = vmatmul.bf16.gmra.mxu3 %v10756_v60  ;;  %5548 = vmatmul.bf16.gmra.mxu0 %v10757_v27 }
 0x728   : > { %5637 = vmatmul.bf16.gmra.mxu1 %v10757_v27 }
 0x729   : > { %5676 = vmatmul.bf16.gmra.mxu2 %v10742_v44 }
 0x72c   : > { %v5217_v46 = vpop.f32.mrf.mxu2 }
 0x72d   : > { %v10110_v40 = vadd.f32 %v5217_v46, %v9955_v43 }
 0x734   : > { %v5219_v50 = vpop.f32.mrf.mxu2 }
 0x735   : > { %v10113_v17 = vadd.f32 %v5219_v50, %v9963_v18 }
 0x739   : > { %5681 = vmatmul.bf16.gmra.mxu2 %v10743_v4 }
 0x73c   : > { %v5222_v41 = vpop.f32.mrf.mxu2 }
 0x73d   : > { %v10117_v33 = vadd.f32 %v5222_v41, %v9971_v9 }
 0x744   : > { %v5224_v16 = vpop.f32.mrf.mxu2 }
 0x745   : > { %v10120_v34 = vadd.f32 %v5224_v16, %v9979_v53  ;;  %v10134_v53 = vld [vmem:[%s10289_s6] ss:$0 sm:$0xff] }
 0x749   : > { %5686 = vmatmul.bf16.gmra.mxu2 %v10744_v36 }
 0x74c   : > { %v5227_v44 = vpop.f32.mrf.mxu2 }
 0x74d   : > { %v10124_v43 = vadd.f32 %v5227_v44, %v9987_v57  ;;  %v5496_v44 = vpop.f32.mrf.mxu0 }
 0x754   : > { %v5229_v0 = vpop.f32.mrf.mxu2 }
 0x755   : > { %v10127_v18 = vadd.f32 %v5229_v0, %v9997_v2 }
 0x759   : > { %5691 = vmatmul.bf16.gmra.mxu2 %v10746_v52 }
 0x75c   : > { %v5652_v4 = vpop.f32.mrf.mxu2 }
 0x75d   : > { %v5653_v9 = vadd.f32 %v5652_v4, %v9990_v20  ;;  %v5263_v4 = vpop.f32.mrf.mxu3 }
 0x75f   : > { %v5732_v36 = vadd.f32 %v5653_v9, %v10002_v29  ;;  %v5583_v29 = vpop.f32.mrf.mxu1 }
 0x761   : > { %v5768_v57 = vadd.f32 %v10134_v53, %v5732_v36 }
 0x763   : > { %v5800_v58 = vmax.f32 %v5768_v57, 0.0 }
 0x764   : > { %v5654_v12 = vpop.f32.mrf.mxu2 }
 0x765   : > { %5832 = vst [vmem:[%s10139_s9] sm:$0xff] %v5800_v58  ;;  %v5655_v2 = vadd.f32 %v5654_v12, %v10004_v37  ;;  %v5499_v58 = vpop.f32.mrf.mxu0 }
 0x767   : > { %v5733_v20 = vadd.f32 %v5655_v2, %v10010_v3  ;;  %v5585_v0 = vpop.f32.mrf.mxu1 }
 0x769   : > { %v5769_v52 = vadd.f32 %v10134_v53, %v5733_v20  ;;  %5696 = vmatmul.bf16.gmra.mxu2 %v10748_v45  ;;  %v5266_v20 = vpop.f32.mrf.mxu3 }
 0x76b   : > { %v5801_v56 = vmax.f32 %v5769_v52, 0.0 }
 0x76c   : > { %v5657_v46 = vpop.f32.mrf.mxu2 }
 0x76d   : > { %5833 = vst [vmem:[%s10139_s9 + $0x8] sm:$0xff] %v5801_v56  ;;  %v5658_v50 = vadd.f32 %v5657_v46, %v10012_v14  ;;  %v5501_v46 = vpop.f32.mrf.mxu0 }
 0x76f   : > { %v5734_v41 = vadd.f32 %v5658_v50, %v10022_v10  ;;  %v5588_v12 = vpop.f32.mrf.mxu1 }
 0x771   : > { %v5770_v37 = vadd.f32 %v10134_v53, %v5734_v41  ;;  %v5268_v41 = vpop.f32.mrf.mxu3 }
 0x773   : > { %v5802_v16 = vmax.f32 %v5770_v37, 0.0 }
 0x774   : > { %v5659_v3 = vpop.f32.mrf.mxu2 }
 0x775   : > { %5834 = vst [vmem:[%s10139_s9 + $0x10] sm:$0xff] %v5802_v16  ;;  %v5660_v45 = vadd.f32 %v5659_v3, %v10024_v26 }
 0x777   : > { %v5735_v9 = vadd.f32 %v5660_v45, %v10030_v59  ;;  %v5590_v50 = vpop.f32.mrf.mxu1 }
 0x779   : > { %v5771_v36 = vadd.f32 %v10134_v53, %v5735_v9  ;;  %5701 = vmatmul.bf16.gmra.mxu2 %v10750_v48 }
 0x77b   : > { %v5803_v14 = vmax.f32 %v5771_v36, 0.0  ;;  %v5271_v36 = vpop.f32.mrf.mxu3 }
 0x77c   : > { %v5662_v57 = vpop.f32.mrf.mxu2 }
 0x77d   : > { %5835 = vst [vmem:[%s10139_s9 + $0x18] sm:$0xff] %v5803_v14  ;;  %v5663_v10 = vadd.f32 %v5662_v57, %v10032_v19 }
 0x77f   : > { %v5736_v2 = vadd.f32 %v5663_v10, %v10042_v39 }
 0x781   : > { %v5772_v26 = vadd.f32 %v10134_v53, %v5736_v2 }
 0x783   : > { %v5804_v52 = vmax.f32 %v5772_v26, 0.0  ;;  %v5262_v26 = vadd.f32 %v5261_v11, %v9969_v30 }
 0x784   : > { %v5664_v56 = vpop.f32.mrf.mxu2 }
 0x785   : > { %5836 = vst [vmem:[%s10139_s9 + $0x20] sm:$0xff] %v5804_v52  ;;  %v5665_v59 = vadd.f32 %v5664_v56, %v10044_v61  ;;  %v5504_v61 = vpop.f32.mrf.mxu0 }
 0x787   : > { %v5737_v48 = vadd.f32 %v5665_v59, %v10050_v63  ;;  %v5593_v63 = vpop.f32.mrf.mxu1 }
 0x789   : > { %v5773_v19 = vadd.f32 %v10134_v53, %v5737_v48  ;;  %5706 = vmatmul.bf16.gmra.mxu2 %v10751_v8  ;;  %v5273_v48 = vpop.f32.mrf.mxu3 }
 0x78b   : > { %v5805_v37 = vmax.f32 %v5773_v19, 0.0 }
 0x78c   : > { %v5667_v39 = vpop.f32.mrf.mxu2 }
 0x78d   : > { %5837 = vst [vmem:[%s10139_s9 + $0x28] sm:$0xff] %v5805_v37  ;;  %v5668_v16 = vadd.f32 %v5667_v39, %v10052_v51  ;;  %v5584_v51 = vadd.f32 %v5583_v29, %v5494_v25  ;;  %v5506_v52 = vpop.f32.mrf.mxu0  ;;  %v5586_v37 = vadd.f32 %v5585_v0, %v5496_v44  ;;  %v5267_v44 = vadd.f32 %v5266_v20, %v9985_v7  ;;  %v10758_v7 = vld [vmem:[#allocation58_spill] sm:$0xff] }
 0x78e   : > { %v5594_v20 = vadd.f32 %v5593_v63, %v5504_v61 }
 0x78f   : > { %v5738_v3 = vadd.f32 %v5668_v16, %v10062_v24  ;;  %v5595_v56 = vpop.f32.mrf.mxu1 }
 0x791   : > { %v5774_v45 = vadd.f32 %v10134_v53, %v5738_v3  ;;  %v5276_v30 = vpop.f32.mrf.mxu3 }
 0x793   : > { %v5806_v9 = vmax.f32 %v5774_v45, 0.0  ;;  %v5589_v45 = vadd.f32 %v5588_v12, %v5499_v58 }
 0x794   : > { %v5669_v14 = vpop.f32.mrf.mxu2 }
 0x795   : > { %5838 = vst [vmem:[%s10139_s9 + $0x30] sm:$0xff] %v5806_v9  ;;  %v5670_v57 = vadd.f32 %v5669_v14, %v10064_v28  ;;  %v5509_v29 = vpop.f32.mrf.mxu0 }
 0x797   : > { %v5739_v8 = vadd.f32 %v5670_v57, %v10070_v54  ;;  %v5598_v16 = vpop.f32.mrf.mxu1 }
 0x799   : > { %v5775_v10 = vadd.f32 %v10134_v53, %v5739_v8  ;;  %5711 = vmatmul.bf16.gmra.mxu2 %v10753_v15  ;;  %v5264_v15 = vadd.f32 %v5263_v4, %v9975_v47 }
 0x79b   : > { %v5807_v24 = vmax.f32 %v5775_v10, 0.0  ;;  %v5278_v10 = vpop.f32.mrf.mxu3 }
 0x79c   : > { %v5672_v2 = vpop.f32.mrf.mxu2 }
 0x79d   : > { %5839 = vst [vmem:[%s10139_s9 + $0x38] sm:$0xff] %v5807_v24  ;;  %v5673_v59 = vadd.f32 %v5672_v2, %v5584_v51  ;;  %v5511_v47 = vpop.f32.mrf.mxu0  ;;  %v5591_v51 = vadd.f32 %v5590_v50, %v5501_v46  ;;  %v5272_v46 = vadd.f32 %v5271_v36, %v10007_v22  ;;  %v5599_v22 = vadd.f32 %v5598_v16, %v5509_v29 }
 0x79f   : > { %v5740_v19 = vadd.f32 %v5673_v59, %v5262_v26  ;;  %v5600_v4 = vpop.f32.mrf.mxu1 }
 0x7a1   : > { %v5776_v28 = vadd.f32 %v10134_v53, %v5740_v19 }
 0x7a3   : > { %v5808_v54 = vmax.f32 %v5776_v28, 0.0 }
 0x7a4   : > { %v5674_v39 = vpop.f32.mrf.mxu2 }
 0x7a5   : > { %5840 = vst [vmem:[%s10139_s9 + $0x40] sm:$0xff] %v5808_v54  ;;  %v5675_v25 = vadd.f32 %v5674_v39, %v5586_v37  ;;  %v5514_v59 = vpop.f32.mrf.mxu0  ;;  %v5281_v37 = vpop.f32.mrf.mxu3 }
 0x7a7   : > { %v5741_v3 = vadd.f32 %v5675_v25, %v5264_v15  ;;  %v5603_v19 = vpop.f32.mrf.mxu1 }
 0x7a9   : > { %v5777_v11 = vadd.f32 %v10134_v53, %v5741_v3  ;;  %5716 = vmatmul.bf16.gmra.mxu2 %v10756_v60  ;;  %v5269_v60 = vadd.f32 %v5268_v41, %v9993_v5  ;;  %v5596_v41 = vadd.f32 %v5595_v56, %v5506_v52  ;;  %v5274_v3 = vadd.f32 %v5273_v48, %v10015_v21 }
 0x7aa   : > { %v5277_v52 = vadd.f32 %v5276_v30, %v10027_v62 }
 0x7ab   : > { %v5809_v9 = vmax.f32 %v5777_v11, 0.0 }
 0x7ac   : > { %v5677_v14 = vpop.f32.mrf.mxu2 }
 0x7ad   : > { %5841 = vst [vmem:[%s10139_s9 + $0x48] sm:$0xff] %v5809_v9  ;;  %v5678_v0 = vadd.f32 %v5677_v14, %v5589_v45  ;;  %v5516_v61 = vpop.f32.mrf.mxu0  ;;  %v5283_v45 = vpop.f32.mrf.mxu3 }
 0x7af   : > { %v5742_v57 = vadd.f32 %v5678_v0, %v5267_v44  ;;  %v5605_v63 = vpop.f32.mrf.mxu1 }
 0x7b1   : > { %v5778_v8 = vadd.f32 %v10134_v53, %v5742_v57 }
 0x7b3   : > { %v5810_v24 = vmax.f32 %v5778_v8, 0.0 }
 0x7b4   : > { %v5679_v2 = vpop.f32.mrf.mxu2 }
 0x7b5   : > { %5842 = vst [vmem:[%s10139_s9 + $0x50] sm:$0xff] %v5810_v24  ;;  %v5680_v58 = vadd.f32 %v5679_v2, %v5591_v51  ;;  %v5519_v0 = vpop.f32.mrf.mxu0  ;;  %v5286_v57 = vpop.f32.mrf.mxu3  ;;  %v5601_v51 = vadd.f32 %v5600_v4, %v5511_v47 }
 0x7b7   : > { %v5743_v12 = vadd.f32 %v5680_v58, %v5269_v60  ;;  %v5608_v21 = vpop.f32.mrf.mxu1 }
 0x7b9   : > { %v5779_v26 = vadd.f32 %v10134_v53, %v5743_v12  ;;  %5721 = vmatmul.bf16.gmra.mxu2 %v10758_v7  ;;  %v5604_v12 = vadd.f32 %v5603_v19, %v5514_v59 }
 0x7bb   : > { %v5811_v28 = vmax.f32 %v5779_v26, 0.0 }
 0x7bc   : > { %v5682_v54 = vpop.f32.mrf.mxu2 }
 0x7bd   : > { %5843 = vst [vmem:[%s10139_s9 + $0x58] sm:$0xff] %v5811_v28  ;;  %v5683_v50 = vadd.f32 %v5682_v54, %v5594_v20  ;;  %v5521_v60 = vpop.f32.mrf.mxu0  ;;  %v5288_v30 = vpop.f32.mrf.mxu3  ;;  %v5282_v20 = vadd.f32 %v5281_v37, %v10047_v42  ;;  %v5609_v42 = vadd.f32 %v5608_v21, %v5519_v0 }
 0x7bf   : > { %v5744_v39 = vadd.f32 %v5683_v50, %v5272_v46  ;;  %v5610_v58 = vpop.f32.mrf.mxu1 }
 0x7c1   : > { %v5780_v5 = vadd.f32 %v10134_v53, %v5744_v39 }
 0x7c3   : > { %v5812_v15 = vmax.f32 %v5780_v5, 0.0  ;;  %v5284_v5 = vadd.f32 %v5283_v45, %v10055_v32  ;;  %v5611_v32 = vadd.f32 %v5610_v58, %v5521_v60 }
 0x7c4   : > { %v5684_v25 = vpop.f32.mrf.mxu2 }
 0x7c5   : > { %5844 = vst [vmem:[%s10139_s9 + $0x60] sm:$0xff] %v5812_v15  ;;  %v5685_v11 = vadd.f32 %v5684_v25, %v5596_v41  ;;  %v5291_v50 = vpop.f32.mrf.mxu3  ;;  %v5287_v25 = vadd.f32 %v5286_v57, %v10067_v31 }
 0x7c7   : > { %v5745_v9 = vadd.f32 %v5685_v11, %v5274_v3  ;;  %v5613_v54 = vpop.f32.mrf.mxu1 }
 0x7c9   : > { %v5781_v14 = vadd.f32 %v10134_v53, %v5745_v9  ;;  %5726 = vmatmul.bf16.gmra.mxu2 %v10757_v27  ;;  %v5279_v27 = vadd.f32 %v5278_v10, %v10035_v13  ;;  %v5606_v13 = vadd.f32 %v5605_v63, %v5516_v61  ;;  %v5524_v10 = vpop.f32.mrf.mxu0 }
 0x7cb   : > { %v5813_v36 = vmax.f32 %v5781_v14, 0.0 }
 0x7cc   : > { %v5687_v44 = vpop.f32.mrf.mxu2 }
 0x7cd   : > { %5845 = vst [vmem:[%s10139_s9 + $0x68] sm:$0xff] %v5813_v36  ;;  %v5688_v56 = vadd.f32 %v5687_v44, %v5599_v22  ;;  %v5293_v11 = vpop.f32.mrf.mxu3  ;;  %v5289_v36 = vadd.f32 %v5288_v30, %v10073_v38 }
 0x7ce   : > { %v5294_v30 = vadd.f32 %v5293_v11, %v10083_v6 }
 0x7cf   : > { %v5746_v48 = vadd.f32 %v5688_v56, %v5277_v52  ;;  %v5615_v61 = vpop.f32.mrf.mxu1 }
 0x7d1   : > { %v5782_v8 = vadd.f32 %v10134_v53, %v5746_v48  ;;  %v5526_v3 = vpop.f32.mrf.mxu0  ;;  %v5614_v48 = vadd.f32 %v5613_v54, %v5524_v10 }
 0x7d2   : > { %v5616_v60 = vadd.f32 %v5615_v61, %v5526_v3 }
 0x7d3   : > { %v5814_v24 = vmax.f32 %v5782_v8, 0.0 }
 0x7d4   : > { %v5689_v2 = vpop.f32.mrf.mxu2 }
 0x7d5   : > { %5846 = vst [vmem:[%s10139_s9 + $0x70] sm:$0xff] %v5814_v24  ;;  %v5690_v29 = vadd.f32 %v5689_v2, %v5601_v51  ;;  %v5296_v31 = vpop.f32.mrf.mxu3  ;;  %v5292_v51 = vadd.f32 %v5291_v50, %v10080_v23 }
 0x7d6   : > { %v5297_v10 = vadd.f32 %v5296_v31, %v10090_v1 }
 0x7d7   : > { %v5747_v16 = vadd.f32 %v5690_v29, %v5279_v27  ;;  %v5618_v56 = vpop.f32.mrf.mxu1 }
 0x7d9   : > { %v5783_v62 = vadd.f32 %v10134_v53, %v5747_v16  ;;  %v5529_v52 = vpop.f32.mrf.mxu0 }
 0x7da   : > { %v5619_v23 = vadd.f32 %v5618_v56, %v5529_v52 }
 0x7db   : > { %v5815_v26 = vmax.f32 %v5783_v62, 0.0 }
 0x7dc   : > { %v5692_v7 = vpop.f32.mrf.mxu2 }
 0x7dd   : > { %5847 = vst [vmem:[%s10139_s9 + $0x78] sm:$0xff] %v5815_v26  ;;  %v5693_v47 = vadd.f32 %v5692_v7, %v5604_v12  ;;  %v5298_v16 = vpop.f32.mrf.mxu3 }
 0x7df   : > { %v5748_v4 = vadd.f32 %v5693_v47, %v5282_v20  ;;  %v5620_v29 = vpop.f32.mrf.mxu1 }
 0x7e1   : > { %v5784_v28 = vadd.f32 %v10134_v53, %v5748_v4  ;;  %v5531_v27 = vpop.f32.mrf.mxu0 }
 0x7e2   : > { %v5621_v6 = vadd.f32 %v5620_v29, %v5531_v27 }
 0x7e3   : > { %v5816_v46 = vmax.f32 %v5784_v28, 0.0 }
 0x7e4   : > { %v5694_v39 = vpop.f32.mrf.mxu2 }
 0x7e5   : > { %5848 = vst [vmem:[%s10139_s9 + $0x80] sm:$0xff] %v5816_v46  ;;  %v5695_v59 = vadd.f32 %v5694_v39, %v5606_v13  ;;  %v5301_v28 = vpop.f32.mrf.mxu3 }
 0x7e7   : > { %v5749_v19 = vadd.f32 %v5695_v59, %v5284_v5  ;;  %v5623_v47 = vpop.f32.mrf.mxu1  ;;  %v5299_v59 = vadd.f32 %v5298_v16, %v10093_v49 }
 0x7e9   : > { %v5785_v41 = vadd.f32 %v10134_v53, %v5749_v19  ;;  %v5534_v20 = vpop.f32.mrf.mxu0 }
 0x7ea   : > { %v5624_v1 = vadd.f32 %v5623_v47, %v5534_v20 }
 0x7eb   : > { %v5817_v37 = vmax.f32 %v5785_v41, 0.0 }
 0x7ec   : > { %v5697_v15 = vpop.f32.mrf.mxu2 }
 0x7ed   : > { %5849 = vst [vmem:[%s10139_s9 + $0x88] sm:$0xff] %v5817_v37  ;;  %v5698_v63 = vadd.f32 %v5697_v15, %v5609_v42  ;;  %v5303_v37 = vpop.f32.mrf.mxu3 }
 0x7ee   : > { %v5304_v52 = vadd.f32 %v5303_v37, %v10103_v55 }
 0x7ef   : > { %v5750_v9 = vadd.f32 %v5698_v63, %v5287_v25  ;;  %v5625_v41 = vpop.f32.mrf.mxu1  ;;  %v5302_v63 = vadd.f32 %v5301_v28, %v10100_v35 }
 0x7f1   : > { %v5786_v14 = vadd.f32 %v10134_v53, %v5750_v9  ;;  %v5536_v19 = vpop.f32.mrf.mxu0 }
 0x7f3   : > { %v5818_v45 = vmax.f32 %v5786_v14, 0.0 }
 0x7f4   : > { %v5699_v22 = vpop.f32.mrf.mxu2 }
 0x7f5   : > { %5850 = vst [vmem:[%s10139_s9 + $0x90] sm:$0xff] %v5818_v45  ;;  %v5700_v44 = vadd.f32 %v5699_v22, %v5611_v32  ;;  %v5306_v49 = vpop.f32.mrf.mxu3  ;;  %v5626_v22 = vadd.f32 %v5625_v41, %v5536_v19 }
 0x7f7   : > { %v5751_v0 = vadd.f32 %v5700_v44, %v5289_v36  ;;  %v5628_v14 = vpop.f32.mrf.mxu1 }
 0x7f9   : > { %v5787_v21 = vadd.f32 %v10134_v53, %v5751_v0  ;;  %v5539_v9 = vpop.f32.mrf.mxu0 }
 0x7fb   : > { %v5819_v57 = vmax.f32 %v5787_v21, 0.0 }
 0x7fc   : > { %v5702_v8 = vpop.f32.mrf.mxu2 }
 0x7fd   : > { %5851 = vst [vmem:[%s10139_s9 + $0x98] sm:$0xff] %v5819_v57  ;;  %v5703_v24 = vadd.f32 %v5702_v8, %v5614_v48  ;;  %v5308_v48 = vpop.f32.mrf.mxu3  ;;  %v5629_v57 = vadd.f32 %v5628_v14, %v5539_v9 }
 0x7ff   : > { %v5752_v2 = vadd.f32 %v5703_v24, %v5292_v51  ;;  %v5630_v21 = vpop.f32.mrf.mxu1  ;;  %v5307_v24 = vadd.f32 %v5306_v49, %v10110_v40 }
 0x801   : > { %v5788_v38 = vadd.f32 %v10134_v53, %v5752_v2  ;;  %v5541_v31 = vpop.f32.mrf.mxu0 }
 0x802   : > { %v5631_v55 = vadd.f32 %v5630_v21, %v5541_v31 }
 0x803   : > { %v5820_v58 = vmax.f32 %v5788_v38, 0.0 }
 0x804   : > { %v5704_v62 = vpop.f32.mrf.mxu2 }
 0x805   : > { %5852 = vst [vmem:[%s10139_s9 + $0xa0] sm:$0xff] %v5820_v58  ;;  %v5705_v12 = vadd.f32 %v5704_v62, %v5616_v60  ;;  %v5311_v58 = vpop.f32.mrf.mxu3 }
 0x806   : > { %v5312_v47 = vadd.f32 %v5311_v58, %v10117_v33 }
 0x807   : > { %v5753_v26 = vadd.f32 %v5705_v12, %v5294_v30  ;;  %v5633_v16 = vpop.f32.mrf.mxu1  ;;  %v5309_v30 = vadd.f32 %v5308_v48, %v10113_v17 }
 0x809   : > { %v5789_v7 = vadd.f32 %v10134_v53, %v5753_v26  ;;  %v5544_v38 = vpop.f32.mrf.mxu0 }
 0x80a   : > { %v5634_v40 = vadd.f32 %v5633_v16, %v5544_v38 }
 0x80b   : > { %v5821_v4 = vmax.f32 %v5789_v7, 0.0 }
 0x80c   : > { %v5707_v13 = vpop.f32.mrf.mxu2 }
 0x80d   : > { %5853 = vst [vmem:[%s10139_s9 + $0xa8] sm:$0xff] %v5821_v4  ;;  %v5708_v54 = vadd.f32 %v5707_v13, %v5619_v23 }
 0x80f   : > { %v5754_v46 = vadd.f32 %v5708_v54, %v5297_v10  ;;  %v5635_v13 = vpop.f32.mrf.mxu1  ;;  %v5313_v10 = vpop.f32.mrf.mxu3 }
 0x811   : > { %v5790_v50 = vadd.f32 %v10134_v53, %v5754_v46  ;;  %v5546_v4 = vpop.f32.mrf.mxu0 }
 0x812   : > { %v5636_v17 = vadd.f32 %v5635_v13, %v5546_v4 }
 0x813   : > { %v5822_v39 = vmax.f32 %v5790_v50, 0.0 }
 0x814   : > { %v5709_v5 = vpop.f32.mrf.mxu2 }
 0x815   : > { %5854 = vst [vmem:[%s10139_s9 + $0xb0] sm:$0xff] %v5822_v39  ;;  %v5710_v42 = vadd.f32 %v5709_v5, %v5621_v6  ;;  %v5314_v39 = vadd.f32 %v5313_v10, %v10120_v34 }
 0x817   : > { %v5755_v15 = vadd.f32 %v5710_v42, %v5299_v59  ;;  %v5638_v19 = vpop.f32.mrf.mxu1  ;;  %v5316_v41 = vpop.f32.mrf.mxu3 }
 0x819   : > { %v5791_v25 = vadd.f32 %v10134_v53, %v5755_v15  ;;  %v5549_v59 = vpop.f32.mrf.mxu0 }
 0x81a   : > { %v5639_v42 = vadd.f32 %v5638_v19, %v5549_v59 }
 0x81b   : > { %v5823_v3 = vmax.f32 %v5791_v25, 0.0 }
 0x81c   : > { %v5712_v61 = vpop.f32.mrf.mxu2 }
 0x81d   : > { %5855 = vst [vmem:[%s10139_s9 + $0xb8] sm:$0xff] %v5823_v3  ;;  %v5713_v11 = vadd.f32 %v5712_v61, %v5624_v1  ;;  %v5317_v1 = vadd.f32 %v5316_v41, %v10124_v43 }
 0x81f   : > { %v5756_v32 = vadd.f32 %v5713_v11, %v5302_v63  ;;  %v5640_v63 = vpop.f32.mrf.mxu1  ;;  %v5318_v9 = vpop.f32.mrf.mxu3 }
 0x820   : > { %v5319_v43 = vadd.f32 %v5318_v9, %v10127_v18 }
 0x821   : > { %v5792_v45 = vadd.f32 %v10134_v53, %v5756_v32  ;;  %v5551_v34 = vpop.f32.mrf.mxu0 }
 0x822   : > { %v5641_v14 = vadd.f32 %v5640_v63, %v5551_v34 }
 0x823   : > { %v5824_v36 = vmax.f32 %v5792_v45, 0.0 }
 0x824   : > { %v5714_v44 = vpop.f32.mrf.mxu2 }
 0x825   : > { %5856 = vst [vmem:[%s10139_s9 + $0xc0] sm:$0xff] %v5824_v36  ;;  %v5715_v56 = vadd.f32 %v5714_v44, %v5626_v22 }
 0x827   : > { %v5757_v0 = vadd.f32 %v5715_v56, %v5304_v52 }
 0x829   : > { %v5793_v35 = vadd.f32 %v10134_v53, %v5757_v0 }
 0x82b   : > { %v5825_v8 = vmax.f32 %v5793_v35, 0.0 }
 0x82c   : > { %v5717_v51 = vpop.f32.mrf.mxu2 }
 0x82d   : > { %5857 = vst [vmem:[%s10139_s9 + $0xc8] sm:$0xff] %v5825_v8  ;;  %v5718_v2 = vadd.f32 %v5717_v51, %v5629_v57 }
 0x82f   : > { %v5758_v27 = vadd.f32 %v5718_v2, %v5307_v24 }
 0x831   : > { %v5794_v29 = vadd.f32 %v10134_v53, %v5758_v27 }
 0x833   : > { %v5826_v60 = vmax.f32 %v5794_v29, 0.0 }
 0x834   : > { %v5719_v62 = vpop.f32.mrf.mxu2 }
 0x835   : > { %5858 = vst [vmem:[%s10139_s9 + $0xd0] sm:$0xff] %v5826_v60  ;;  %v5720_v12 = vadd.f32 %v5719_v62, %v5631_v55 }
 0x837   : > { %v5759_v26 = vadd.f32 %v5720_v12, %v5309_v30 }
 0x839   : > { %v5795_v7 = vadd.f32 %v10134_v53, %v5759_v26 }
 0x83b   : > { %v5827_v23 = vmax.f32 %v5795_v7, 0.0 }
 0x83c   : > { %v5722_v20 = vpop.f32.mrf.mxu2 }
 0x83d   : > { %5859 = vst [vmem:[%s10139_s9 + $0xd8] sm:$0xff] %v5827_v23  ;;  %v5723_v28 = vadd.f32 %v5722_v20, %v5634_v40 }
 0x83f   : > { %v5760_v54 = vadd.f32 %v5723_v28, %v5312_v47 }
 0x841   : > { %v5796_v46 = vadd.f32 %v10134_v53, %v5760_v54 }
 0x843   : > { %v5828_v50 = vmax.f32 %v5796_v46, 0.0 }
 0x844   : > { %v5724_v6 = vpop.f32.mrf.mxu2 }
 0x845   : > { %5860 = vst [vmem:[%s10139_s9 + $0xe0] sm:$0xff] %v5828_v50  ;;  %v5725_v5 = vadd.f32 %v5724_v6, %v5636_v17 }
 0x847   : > { %v5761_v33 = vadd.f32 %v5725_v5, %v5314_v39 }
 0x849   : > { %v5797_v37 = vadd.f32 %v10134_v53, %v5761_v33 }
 0x84b   : > { %v5829_v15 = vmax.f32 %v5797_v37, 0.0 }
 0x84c   : > { %v5727_v25 = vpop.f32.mrf.mxu2 }
 0x84d   : > { %5861 = vst [vmem:[%s10139_s9 + $0xe8] sm:$0xff] %v5829_v15  ;;  %v5728_v3 = vadd.f32 %v5727_v25, %v5639_v42 }
 0x84f   : > { %v5762_v61 = vadd.f32 %v5728_v3, %v5317_v1 }
 0x851   : > { %v5798_v11 = vadd.f32 %v10134_v53, %v5762_v61 }
 0x853   : > { %v5830_v32 = vmax.f32 %v5798_v11, 0.0 }
 0x854   : > { %v5729_v49 = vpop.f32.mrf.mxu2 }
 0x855   : > { %5862 = vst [vmem:[%s10139_s9 + $0xf0] sm:$0xff] %v5830_v32  ;;  %v5730_v45 = vadd.f32 %v5729_v49, %v5641_v14 }
 0x857   : > { %v5763_v22 = vadd.f32 %v5730_v45, %v5319_v43 }
 0x859   : > { %v5799_v36 = vadd.f32 %v10134_v53, %v5763_v22 }
 0x85b   : > { %v5831_v44 = vmax.f32 %v5799_v36, 0.0 }
 0x85d   : > { %5863 = vst [vmem:[%s10139_s9 + $0xf8] sm:$0xff] %v5831_v44 }
 0x85e   : > { %7591 = shalt.err (!%p7588_p11)
}
 0x85f   : > { %s7650_s10 = smov 128   ;;  %s7651_s3 = smov 8  }
 0x860   : > { %7311 = dma.vmem_to_hbm [thread:$0]  (%p7784_p7), %s5878_s0, 4096, %s5880_s14, %s5865_s28, %s7650_s10, %s7650_s10, %s7651_s3  }
 0x861 PF: > { %s5894_s17 = sand.u32 1, %s7630_s24   ;;  %p10759_p12 = scmp.ge.s32.totalorder %s7642_s27, 2 }
 0x862   : > { %s5895_s15 = scalar_lea.sflag [#allocation4], %s5894_s17 }
 0x863   : > { %p7331_p13 = pnand %p10759_p12, %p7727_p6 }
 0x865   : > { %p7332_p0 = pneg %p7331_p13 }
 0x867   : > { %7625 = dma.done.wait (%p7332_p0), %s5895_s15, 4096  }
 0x868   : > { %7627 = vsyncadd (%p7332_p0), %s5895_s15, 4294963200  ;;  %s10760_s19 = sld [smem:[#allocation17_spill]]  ;;  %p24_p3 = scmp.ge.s32.totalorder %s7765_s13, 4  }
 0x869   : > { %s10761_s24 = smov %s7634_s25  ;;  %s10762_s25 = smov %s7638_s26 }
 0x86a   : > { %s10764_s27 = smov %s7765_s13  ;;  %26 = sbr.rel (!%p24_p3) target bundleno = 13 (0xd), region = 118 }
 0x86e   : > { %s10763_s26 = smov %s10760_s19 }
 0x86f   :  { %5901 = vsyncpa [#allocation3], 1 }
 0x870   :  { %5903 = vsyncpa [#allocation3 + $0x1], 1 }
 0x871   :  { %5904 = vsyncpa [#allocation6], 1 }
 0x872   :  { %5906 = vsyncpa [#allocation6 + $0x1], 1 }
 0x873   :  { %5907 = vsyncpa [#allocation9], 1 }
 0x874   :  { %5908 = vsyncpa [#allocation4], 1 }
 0x875   :  { %5910 = vsyncpa [#allocation4 + $0x1], 1 }

</bundles_post_ra>
